<compile_context>
chip_gen: v5e
topology: v5e:2x2
jax: 0.10.0
libtpu: 0.0.40
codegen_flags: <defaults>
</compile_context>

<pallas_src>
import math

import jax
import jax.numpy as jnp
import numpy as np
from jax.experimental import pallas as pl
from jax.experimental.pallas import tpu as pltpu


def _pos_enc_kernel(t_ref, freq_ref, phase_ref, out_ref):
    # t_ref    : (bn, 1)   type indices for this row block
    # freq_ref : (1, dim)  [freq_half, freq_half]        (resident, constant map)
    # phase_ref: (1, dim)  [0,...,0, pi/2,...,pi/2]
    # out_ref  : (bn, dim) positional encoding (lane-dense, single unmasked vst)
    t = t_ref[...].astype(jnp.float32)                       # (bn, 1)
    ang = t * freq_ref[...] + phase_ref[...]                 # (bn, dim) lane bcast
    out_ref[...] = jnp.sin(ang).astype(out_ref.dtype)        # one full-width sin


def positional_encoding(type_index, dim, *, block_rows=1024, out_dtype=jnp.float32):
    """type_index: (N,) array; returns (N, dim) encoding matching the PyTorch module."""
    assert dim % 2 == 0, "dim must be even"
    count = dim // 2
    n = type_index.shape[0]

    t = type_index.astype(jnp.float32).reshape(n, 1)

    # Hoisted frequency / phase tables (computed once, outside the kernel).
    step = jnp.arange(count, dtype=jnp.float32) / count
    freq_half = jnp.exp(-math.log(10000.0) * step)                       # (count,)
    freq_full = jnp.concatenate([freq_half, freq_half])[None, :]         # (1, dim)
    phase = jnp.concatenate(
        [jnp.zeros((count,), jnp.float32),
         jnp.full((count,), jnp.float32(math.pi / 2))])[None, :]         # (1, dim)

    # Row tile: multiple of 8 sublanes, capped so the row grid has >= 2 steps
    # (lets v7x's two TensorCores shard the "parallel" axis; harmless on v5e/v6e).
    half_rows = max(8, pl.cdiv(pl.cdiv(n, 2), 8) * 8)
    bn = min(block_rows, half_rows)
    grid = (pl.cdiv(n, bn),)

    return pl.pallas_call(
        _pos_enc_kernel,
        out_shape=jax.ShapeDtypeStruct((n, dim), out_dtype),
        grid=grid,
        in_specs=[
            pl.BlockSpec((bn, 1), lambda i: (i, 0)),      # per-block row slice
            pl.BlockSpec((1, dim), lambda i: (0, 0)),     # constant -> stays resident
            pl.BlockSpec((1, dim), lambda i: (0, 0)),     # constant -> stays resident
        ],
        out_specs=pl.BlockSpec((bn, dim), lambda i: (i, 0)),
        compiler_params=pltpu.CompilerParams(
            dimension_semantics=("parallel",)),
    )(t, freq_full, phase)


def positional_encoding_ref(type_index, dim):
    """Pure-JAX reference matching the PyTorch forward."""
    count = dim // 2
    step = jnp.arange(count, dtype=type_index.dtype) / count
    enc = type_index[:, None] * jnp.exp(-math.log(10000.0) * step[None, :])
    return jnp.concatenate([jnp.sin(enc), jnp.cos(enc)], axis=-1)


if __name__ == "__main__":
    # PositionalEncoding(dim=128) applied to a batch of 256 type indices.
    DIM = 128
    N = 256

    key = jax.random.PRNGKey(0)
    type_index = jax.random.randint(key, (N,), 0, 100).astype(jnp.float32)

    out = positional_encoding(type_index, DIM)
    jax.block_until_ready(out)

    ref = positional_encoding_ref(type_index, DIM)
    np.testing.assert_allclose(np.asarray(out), np.asarray(ref),
                               rtol=1e-4, atol=1e-4)

    print("KERNEL_OK")
</pallas_src>

<mosaic_0001>
module attributes {stable_mosaic.version = 11 : i64} {
  func.func @_pos_enc_kernel(%arg0: i32, %arg1: memref<128x1xf32, #tpu.memory_space<vmem>>, %arg2: memref<1x128xf32, #tpu.memory_space<vmem>>, %arg3: memref<1x128xf32, #tpu.memory_space<vmem>>, %arg4: memref<128x128xf32, #tpu.memory_space<vmem>>) attributes {dimension_semantics = [#tpu.dimension_semantics<parallel>], iteration_bounds = array<i64: 2>, scalar_prefetch = 0 : i64, scratch_operands = 0 : i64, tpu.core_type = #tpu.core_type<tc>, window_params = [{transform_indices = @transform_0, window_bounds = array<i64: 128, 1>}, {pipeline_mode = #tpu.pipeline_mode<synchronous>, transform_indices = @transform_1, window_bounds = array<i64: 1, 128>}, {pipeline_mode = #tpu.pipeline_mode<synchronous>, transform_indices = @transform_2, window_bounds = array<i64: 1, 128>}, {transform_indices = @transform_3, window_bounds = array<i64: 128, 128>}]} {
    %c0 = arith.constant 0 : index
    %c0_0 = arith.constant 0 : index
    %0 = vector.load %arg1[%c0, %c0_0] : memref<128x1xf32, #tpu.memory_space<vmem>>, vector<128x1xf32>
    %c0_1 = arith.constant 0 : index
    %c0_2 = arith.constant 0 : index
    %1 = vector.load %arg2[%c0_1, %c0_2] : memref<1x128xf32, #tpu.memory_space<vmem>>, vector<1x128xf32>
    %2 = vector.broadcast %0 : vector<128x1xf32> to vector<128x128xf32>
    %3 = vector.broadcast %1 : vector<1x128xf32> to vector<128x128xf32>
    %4 = arith.mulf %2, %3 : vector<128x128xf32>
    %c0_3 = arith.constant 0 : index
    %c0_4 = arith.constant 0 : index
    %5 = vector.load %arg3[%c0_3, %c0_4] : memref<1x128xf32, #tpu.memory_space<vmem>>, vector<1x128xf32>
    %6 = vector.broadcast %5 : vector<1x128xf32> to vector<128x128xf32>
    %7 = arith.addf %4, %6 : vector<128x128xf32>
    %8 = math.sin %7 : vector<128x128xf32>
    %c0_5 = arith.constant 0 : index
    %c0_6 = arith.constant 0 : index
    %9 = vector.load %arg4[%c0_5, %c0_6] : memref<128x128xf32, #tpu.memory_space<vmem>>, vector<128x128xf32>
    tpu.vector_store %arg4[%c0_5, %c0_6], %8 {strides = array<i32>} : memref<128x128xf32, #tpu.memory_space<vmem>>, vector<128x128xf32>,
    return
  }
  func.func @transform_0(%arg0: i32) -> (i32, i32) {
    %c0_i32 = arith.constant 0 : i32
    %c0_i32_0 = arith.constant 0 : i32
    return %arg0, %c0_i32 : i32, i32
  }
  func.func @transform_1(%arg0: i32) -> (i32, i32) {
    %c0_i32 = arith.constant 0 : i32
    %c0_i32_0 = arith.constant 0 : i32
    %c0_i32_1 = arith.constant 0 : i32
    return %c0_i32, %c0_i32_0 : i32, i32
  }
  func.func @transform_2(%arg0: i32) -> (i32, i32) {
    %c0_i32 = arith.constant 0 : i32
    %c0_i32_0 = arith.constant 0 : i32
    %c0_i32_1 = arith.constant 0 : i32
    return %c0_i32, %c0_i32_0 : i32, i32
  }
  func.func @transform_3(%arg0: i32) -> (i32, i32) {
    %c0_i32 = arith.constant 0 : i32
    %c0_i32_0 = arith.constant 0 : i32
    return %arg0, %c0_i32 : i32, i32
  }
}

</mosaic_0001>

<bundles_post_ra>
// kernel: tpu_custom_call.1
= control target key start
LH: loop header
LB: loop body
LE: loop exit
PB: predicated region body
PF: predicated region fallthrough
CT: control target
= control target key end

     0   :  { %8 = vsyncpa [#allocation3], 0  ;;  %s4965_s0 = inlined_call_operand.vmem [shape: f32[256,1], index: 0, kind: input, shape index: {}]   ;;  %s4966_s1 = inlined_call_operand.vmem [shape: f32[1,128], index: 1, kind: input, shape index: {}]   ;;  %s4967_s2 = inlined_call_operand.vmem [shape: f32[1,128], index: 2, kind: input, shape index: {}]   ;;  %s4968_s3 = inlined_call_operand.hbm [shape: f32[256,128], index: 3, kind: output, shape index: {}]  }
   0x1   :  { %10 = vsyncpa [#allocation3 + $0x1], 0  ;;  %s3095_s12 = smov 0   ;;  %s3097_s13 = smov 0  }
   0x2   :  { %s3099_s14 = smov 0   ;;  %s3101_s15 = smov 0  }
   0x3 LB: > { %s3116_s16 = sadd.s32 4294967295, %s3064_s15   ;;  %s2882_s17 = sadd.s32 4294967294, %s3064_s15   ;;  %s3064_s15 = sphi %s3101_s15, %s4998_s15   ;;  %s3060_s14 = sphi %s3099_s14, %s4997_s14   ;;  %s3056_s13 = sphi %s3097_s13, %s4996_s13   ;;  %s3052_s12 = sphi %s3095_s12, %s4995_s12  }
   0x4   : > { %s3120_s18 = sadd.s32 1, %s3064_s15   ;;  %s91_s19 = sadd.s32 1, %s3060_s14 }
   0x5   : > { %s88_s20 = ssub.s32 %s3064_s15, %s3120_s18  ;;  %p101_p0 = scmp.ne.s32.totalorder %s3060_s14, %s3056_s13 }
   0x6   : > { %p89_p1 = scmp.eq.s32.totalorder %s88_s20, 0  ;;  %p102_p2 = scmp.eq.s32.totalorder %s3116_s16, 1 }
   0x7   : > { %p107_p3 = scmp.ne.s32.totalorder %s3056_s13, %s3052_s12  ;;  %p108_p4 = scmp.eq.s32.totalorder %s2882_s17, 1 }
   0x8   : > { %s3131_s21 = scalar_select %p89_p1, %s3060_s14, %s91_s19  }
   0x9   : > { %p3133_p5 = por %p102_p2, %p101_p0  ;;  %p3137_p6 = por %p108_p4, %p107_p3 }
   0xa   : > { %p2885_p7 = scmp.ge.s32.totalorder %s3064_s15, 1  ;;  %p141_p8 = scmp.lt.s32.totalorder %s3064_s15, 3 }
   0xc   : > { %p142_p9 = pnand %p2885_p7, %p141_p8 }
   0xd   : > { %s2887_s24 = sshll.u32 (!%p142_p9), %s3116_s16, 4  ;;  %s162_s6 = sand.u32 (!%p142_p9), 1, %s3056_s13  }
   0xe   : > { %145 = sbr.rel (%p142_p9) target bundleno = 791 (0x317), region = 32  ;;  %p166_p10 = scmp.lt.s32.totalorder (!%p142_p9), %s2887_s24, 31 }
   0xf   : > { %s2886_s7 = sshll.u32 (!%p142_p9), %s162_s6, 7  ;;  %s2942_s30 = sshll.u32 (!%p142_p9), %s3116_s16, 7 }
  0x10   : > { %s3458_s8 = scalar_lea.vmem (!%p142_p9), [#allocation2], %s2886_s7  ;;  %s2816_s7 = scalar_lea.hbm (!%p142_p9), %s4968_s3, %s2942_s30 }
  0x11   : > { %s2817_s9 = sshll.u32 (!%p142_p9), %s3458_s8, 4  ;;  %s2819_s10 = sshll.u32 (!%p142_p9), %s2816_s7, 4  ;;  %s2818_s9 = int_to_ptr.vmem [resolvable:$true] %s2817_s9  ;;  %s2820_s10 = int_to_ptr.hbm [resolvable:$true] %s2819_s10 }
  0x12   : > { %s2805_s16 = scalar_lea.sflag (!%p142_p9), [#allocation3], %s162_s6  ;;  %s3016_s11 = sshra.s32 (!%p142_p9), %s2820_s10, 4  ;;  %s3017_s11 = int_to_ptr.hbm [resolvable:$true] %s3016_s11 }
  0x13   : > { %v3066_v0 = vmov 0   ;;  %s5000_s24 = smov (!%p166_p10, %s2887_s24), 31  ;;  %v3171_v17 = vld [vmem:[%s4966_s1] ss:$0 sm:$0xff]  ;;  %v3067_v40 = vmov 683565275   ;;  %p3023_p0 = scmp.lt.s32.totalorder %s3017_s11, %s4968_s3 }
  0x14   : > { %2993 = vset.pattern.permute.xlu2 %v3066_v0  ;;  %2992 = vset.pattern.permute.xlu1 %v3066_v0  ;;  %s2888_s25 = sshll.u32 %s5000_s24, 3  ;;  %v3177_v20 = vld [vmem:[%s4967_s2] ss:$0 sm:$0xff]  ;;  %v3068_v42 = vmov 2475754826   ;;  %s3018_s17 = scalar_lea.hbm %s3017_s11, 128 }
  0x15   : > { %2991 = vset.pattern.permute.xlu0 %v3066_v0  ;;  %s3150_s28 = scalar_lea.vmem %s4965_s0, %s2888_s25  ;;  %v3069_v46 = vmov 2131351028   ;;  %v3070_v49 = vmov 2102212464   ;;  %v3071_v52 = vmov 920167782   ;;  %p3019_p11 = scmp.ne.s32.totalorder %s3017_s11, %s3018_s17 }
  0x16   : > { %v176_v1 = vld [vmem:[%s3150_s28 + $0x20] sm:$0xff]  ;;  %v174_v2 = vld [vmem:[%s3150_s28 + $0x10] sm:$0xff]  ;;  %v177_v4 = vld [vmem:[%s3150_s28 + $0x28] sm:$0xff]  ;;  %v3072_v55 = vmov 1326507024   ;;  %s3022_s24 = scalar_lea.hbm %s4968_s3, 256 }
  0x17   : > { %v172_v3 = vld [vmem:[%s3150_s28] sm:$0xff]  ;;  %211 = vperm.xlu2 %2993, %v176_v1   ;;  %201 = vperm.xlu1 %2992, %v174_v2   ;;  %v175_v5 = vld [vmem:[%s3150_s28 + $0x18] sm:$0xff]  ;;  %v173_v6 = vld [vmem:[%s3150_s28 + $0x8] sm:$0xff]  ;;  %p3020_p12 = pnand %p3019_p11, %p3133_p5  ;;  %p3024_p1 = scmp.lt.s32.totalorder %s3022_s24, %s3018_s17 }
  0x18   : > { %191 = vperm.xlu0 %2991, %v172_v3   ;;  %v180_v7 = vld [vmem:[%s3150_s28 + $0x40] sm:$0xff]  ;;  %v179_v8 = vld [vmem:[%s3150_s28 + $0x38] sm:$0xff]  ;;  %v178_v9 = vld [vmem:[%s3150_s28 + $0x30] sm:$0xff] }
  0x19   : > { %v183_v10 = vld [vmem:[%s3150_s28 + $0x58] sm:$0xff]  ;;  %v182_v11 = vld [vmem:[%s3150_s28 + $0x50] sm:$0xff]  ;;  %v181_v12 = vld [vmem:[%s3150_s28 + $0x48] sm:$0xff]  ;;  %p3021_p13 = pneg %p3020_p12  ;;  %p3025_p2 = por %p3024_p1, %p3023_p0 }
  0x1a   : > { %v186_v13 = vld [vmem:[%s3150_s28 + $0x70] sm:$0xff]  ;;  %v185_v14 = vld [vmem:[%s3150_s28 + $0x68] sm:$0xff]  ;;  %v184_v15 = vld [vmem:[%s3150_s28 + $0x60] sm:$0xff] }
  0x1b   : > { %v187_v16 = vld [vmem:[%s3150_s28 + $0x78] sm:$0xff]  ;;  %p3026_p3 = pnand %p3025_p2, %p3021_p13 }
  0x1f   : > { %216 = vperm.xlu2 %2993, %v177_v4   ;;  %206 = vperm.xlu1 %2992, %v175_v5  }
  0x20   : > { %196 = vperm.xlu0 %2991, %v173_v6  }
  0x27   : > { %231 = vperm.xlu2 %2993, %v180_v7   ;;  %226 = vperm.xlu1 %2992, %v179_v8  }
  0x28   : > { %221 = vperm.xlu0 %2991, %v178_v9  }
  0x2f   : > { %246 = vperm.xlu2 %2993, %v183_v10   ;;  %241 = vperm.xlu1 %2992, %v182_v11  }
  0x30   : > { %236 = vperm.xlu0 %2991, %v181_v12  }
  0x37   : > { %261 = vperm.xlu2 %2993, %v186_v13   ;;  %256 = vperm.xlu1 %2992, %v185_v14  }
  0x38   : > { %251 = vperm.xlu0 %2991, %v184_v15  }
  0x40   : > { %266 = vperm.xlu0 %2991, %v187_v16  }
  0x89   : > { %v202_v23 = vpop.permute.xlu1 %201 }
  0x8a   : > { %v192_v18 = vpop.permute.xlu0 %191  ;;  %v274_v26 = vmul.f32 %v3171_v17, %v202_v23 }
  0x8b   : > { %v272_v19 = vmul.f32 %v3171_v17, %v192_v18 }
  0x8c   : > { %v3187_v31 = vadd.f32 %v3177_v20, %v274_v26 }
  0x8d   : > { %v3180_v21 = vadd.f32 %v3177_v20, %v272_v19 }
  0x8e   : > { %v621_v38 = vand.u32 2139095040, %v3187_v31 }
  0x8f   : > { %v311_v22 = vand.u32 2139095040, %v3180_v21  ;;  %v308_v27 = vand.u32 2147483647, %v3180_v21 }
  0x90   : > { %v622_v60 = vshrl.u32 %v621_v38, 23 }
  0x91   : > { %v312_v24 = vshrl.u32 %v311_v22, 23  ;;  %v315_v32 = vand.u32 8388607, %v308_v27 }
  0x92   : > { %v197_v25 = vpop.permute.xlu0 %196  ;;  %v2895_v10 = vadd.s32 4294967169, %v622_v60 }
  0x93   : > { %v2889_v28 = vadd.s32 4294967169, %v312_v24  ;;  %v273_v29 = vmul.f32 %v3171_v17, %v197_v25  ;;  %v316_v36 = vor.u32 8388608, %v315_v32 }
  0x95   : > { %v318_v30 = vadd.s32 1, %v2889_v28  ;;  %v3192_v33 = vadd.f32 %v3177_v20, %v273_v29  ;;  %v3208_v59 = vshll.u32 %v316_v36, 8  ;;  %v3234_v28 = vadd.s32 1, %v2895_v10 }
  0x97   : > { %vm319_vm0 = vcmp.gt.s32.totalorder %v318_v30, 0  ;;  %v466_v44 = vand.u32 2139095040, %v3192_v33  ;;  %v357_v9 = vand.u32 65535, %v3208_v59  ;;  %v358_v12 = vshrl.u32 %v3208_v59, 16 }
  0x98   : > { %v320_v34 = vsel %vm319_vm0, %v318_v30, 0  ;;  %v463_v26 = vand.u32 2147483647, %v3192_v33  ;;  %vm629_vm10 = vcmp.gt.s32.totalorder %v3234_v28, 0 }
  0x99   : > { %v322_v35 = vand.u32 31, %v320_v34  ;;  %v3195_v39 = vshrl.u32 %v320_v34, 5  ;;  %v467_v4 = vshrl.u32 %v466_v44, 23 }
  0x9b   : > { %v323_v37 = vsub.s32 32, %v322_v35  ;;  %v325_v41 = vshll.u32 %v3067_v40, %v322_v35  ;;  %v328_v43 = vshll.u32 %v3068_v42, %v322_v35  ;;  %v331_v48 = vshll.u32 %v3069_v46, %v322_v35 }
  0x9c   : > { %v334_v50 = vshll.u32 %v3070_v49, %v322_v35  ;;  %v337_v54 = vshll.u32 %v3071_v52, %v322_v35  ;;  %vm340_vm1 = vcmp.lt.s32.totalorder %v3195_v39, 1  ;;  %vm343_vm2 = vcmp.lt.s32.totalorder %v3195_v39, 4 }
  0x9d   : > { %v326_v45 = vshrl.u32 %v3068_v42, %v323_v37  ;;  %v329_v47 = vshrl.u32 %v3069_v46, %v323_v37  ;;  %v332_v51 = vshrl.u32 %v3070_v49, %v323_v37  ;;  %v335_v53 = vshrl.u32 %v3071_v52, %v323_v37 }
  0x9e   : > { %v338_v56 = vshrl.u32 %v3072_v55, %v323_v37  ;;  %vm342_vm3 = vcmp.lt.s32.totalorder %v3195_v39, 3  ;;  %vm341_vm4 = vcmp.lt.s32.totalorder %v3195_v39, 2  ;;  %v2892_v18 = vadd.s32 4294967169, %v467_v4 }
  0x9f   : > { %v327_v57 = vor.u32 %v326_v45, %v325_v41  ;;  %v330_v58 = vor.u32 %v329_v47, %v328_v43  ;;  %v333_v61 = vor.u32 %v332_v51, %v331_v48  ;;  %v336_v62 = vor.u32 %v335_v53, %v334_v50 }
  0xa0   : > { %v339_v63 = vor.u32 %v338_v56, %v337_v54  ;;  %v324_v19 = vshrl.u32 %v3067_v40, %v323_v37  ;;  %v473_v37 = vadd.s32 1, %v2892_v18 }
  0xa1   : > { %v348_v1 = vsel %vm340_vm1, %v327_v57, %v330_v58  ;;  %v349_v2 = vsel %vm343_vm2, %v336_v62, 920167782  ;;  %v352_v3 = vsel %vm340_vm1, %v330_v58, %v333_v61  ;;  %v345_v30 = vsel %vm343_vm2, %v333_v61, 2102212464 }
  0xa2   : > { %v350_v5 = vsel %vm342_vm3, %v333_v61, %v349_v2  ;;  %v353_v6 = vsel %vm343_vm2, %v339_v63, 1326507024  ;;  %v344_v29 = vsel %vm340_vm1, %v324_v19, %v327_v57  ;;  %v346_v50 = vsel %vm342_vm3, %v330_v58, %v345_v30 }
  0xa3   : > { %v351_v7 = vsel %vm341_vm4, %v348_v1, %v350_v5  ;;  %v354_v8 = vsel %vm342_vm3, %v336_v62, %v353_v6  ;;  %v470_v57 = vand.u32 8388607, %v463_v26  ;;  %vm474_vm9 = vcmp.gt.s32.totalorder %v473_v37, 0 }
  0xa4   : > { %v355_v11 = vsel %vm341_vm4, %v352_v3, %v354_v8  ;;  %v381_v13 = vand.u32 65535, %v351_v7  ;;  %v382_v14 = vshrl.u32 %v351_v7, 16  ;;  %v347_v63 = vsel %vm341_vm4, %v344_v29, %v346_v50 }
  0xa5   : > { %v359_v15 = vand.u32 65535, %v355_v11  ;;  %v360_v16 = vshrl.u32 %v355_v11, 16  ;;  %v475_v2 = vsel %vm474_vm9, %v473_v37, 0  ;;  %v618_v8 = vand.u32 2147483647, %v3187_v31 }
  0xa6   : > { %v384_v22 = vmul.u32 %v382_v14, %v357_v9  ;;  %v385_v23 = vmul.u32 %v381_v13, %v358_v12  ;;  %v383_v32 = vmul.u32 %v381_v13, %v357_v9  ;;  %v386_v38 = vmul.u32 %v382_v14, %v358_v12 }
  0xa7   : > { %v362_v24 = vmul.u32 %v360_v16, %v357_v9  ;;  %v363_v25 = vmul.u32 %v359_v15, %v358_v12  ;;  %v361_v35 = vmul.u32 %v359_v15, %v357_v9  ;;  %v364_v41 = vmul.u32 %v360_v16, %v358_v12 }
  0xa8   : > { %v387_v34 = vshll.u32 %v384_v22, 16  ;;  %v389_v43 = vshll.u32 %v385_v23, 16  ;;  %v388_v61 = vshrl.u32 %v384_v22, 16  ;;  %v390_v3 = vshrl.u32 %v385_v23, 16 }
  0xa9   : > { %v365_v36 = vshll.u32 %v362_v24, 16  ;;  %v367_v45 = vshll.u32 %v363_v25, 16  ;;  %v366_v58 = vshrl.u32 %v362_v24, 16  ;;  %v477_v5 = vand.u32 31, %v475_v2 }
  0xaa   : > { %vm391_vm5 = vc.u32 %v383_v32, %v387_v34  ;;  %v393_v44 = vadd.s32 %v387_v34, %v383_v32  ;;  %v368_v6 = vshrl.u32 %v363_v25, 16  ;;  %v401_v10 = vmul.u32 %v3208_v59, %v347_v63 }
  0xab   : > { %vm369_vm6 = vc.u32 %v361_v35, %v365_v36  ;;  %v371_v47 = vadd.s32 %v365_v36, %v361_v35  ;;  %v392_v48 = vsel %vm391_vm5, 1, %v3066_v0  ;;  %v471_v11 = vor.u32 8388608, %v470_v57 }
  0xac   : > { %v370_v51 = vsel %vm369_vm6, 1, %v3066_v0  ;;  %v394_v53 = vadd.s32 %v392_v48, %v386_v38  ;;  %vm395_vm7 = vc.u32 %v393_v44, %v389_v43  ;;  %v478_v12 = vsub.s32 32, %v477_v5 }
  0xad   : > { %v372_v54 = vadd.s32 %v370_v51, %v364_v41  ;;  %vm373_vm8 = vc.u32 %v371_v47, %v367_v45  ;;  %v396_v56 = vsel %vm395_vm7, 1, %v3066_v0  ;;  %v397_v39 = vadd.s32 %v393_v44, %v389_v43 }
  0xae   : > { %v374_v60 = vsel %vm373_vm8, 1, %v3066_v0  ;;  %v398_v62 = vadd.s32 %v396_v56, %v394_v53  ;;  %v476_v14 = vshrl.u32 %v475_v2, 5  ;;  %v480_v15 = vshll.u32 %v3067_v40, %v477_v5 }
  0xaf   : > { %v376_v1 = vadd.s32 %v374_v60, %v372_v54  ;;  %v481_v18 = vshrl.u32 %v3068_v42, %v478_v12  ;;  %v483_v19 = vshll.u32 %v3068_v42, %v477_v5  ;;  %v486_v22 = vshll.u32 %v3069_v46, %v477_v5 }
  0xb0   : > { %v399_v4 = vadd.s32 %v398_v62, %v388_v61  ;;  %v484_v23 = vshrl.u32 %v3069_v46, %v478_v12  ;;  %v487_v24 = vshrl.u32 %v3070_v49, %v478_v12  ;;  %v489_v59 = vshll.u32 %v3070_v49, %v477_v5 }
  0xb1   : > { %v377_v7 = vadd.s32 %v376_v1, %v366_v58  ;;  %v482_v29 = vor.u32 %v481_v18, %v480_v15  ;;  %v490_v30 = vshrl.u32 %v3071_v52, %v478_v12  ;;  %v492_v32 = vshll.u32 %v3071_v52, %v477_v5 }
  0xb2   : > { %v400_v9 = vadd.s32 %v399_v4, %v390_v3  ;;  %v485_v35 = vor.u32 %v484_v23, %v483_v19  ;;  %v488_v36 = vor.u32 %v487_v24, %v486_v22  ;;  %v493_v38 = vshrl.u32 %v3072_v55, %v478_v12 }
  0xb3   : > { %v378_v13 = vadd.s32 %v377_v7, %v368_v6  ;;  %v491_v37 = vor.u32 %v490_v30, %v489_v59  ;;  %v3263_v41 = vshll.u32 %v471_v11, 8  ;;  %v3267_v43 = vand.u32 8388607, %v618_v8 }
  0xb4   : > { %v404_v16 = vadd.s32 1, %v400_v9  ;;  %v630_v44 = vsel %vm629_vm10, %v3234_v28, 0  ;;  %v494_v47 = vor.u32 %v493_v38, %v492_v32  ;;  %vm495_vm12 = vcmp.lt.s32.totalorder %v476_v14, 1 }
  0xb5   : > { %vm403_vm11 = vc.u32 %v378_v13, %v397_v39  ;;  %vm498_vm13 = vcmp.lt.s32.totalorder %v476_v14, 4  ;;  %vm497_vm14 = vcmp.lt.s32.totalorder %v476_v14, 3  ;;  %v503_v48 = vsel %vm495_vm12, %v482_v29, %v485_v35 }
  0xb6   : > { %v405_v25 = vsel %vm403_vm11, %v404_v16, %v400_v9  ;;  %v504_v50 = vsel %vm498_vm13, %v491_v37, 920167782  ;;  %v507_v51 = vsel %vm495_vm12, %v485_v35, %v488_v36  ;;  %vm496_vm15 = vcmp.lt.s32.totalorder %v476_v14, 2 }
  0xb7   : > { %v406_v34 = vadd.s32 %v405_v25, %v401_v10  ;;  %v505_v54 = vsel %vm497_vm14, %v488_v36, %v504_v50  ;;  %v508_v56 = vsel %vm498_vm13, %v494_v47, 1326507024  ;;  %v500_v57 = vsel %vm498_vm13, %v488_v36, 2102212464 }
  0xb8   : > { %v506_v60 = vsel %vm496_vm15, %v503_v48, %v505_v54  ;;  %v509_v28 = vsel %vm497_vm14, %v491_v37, %v508_v56  ;;  %v3279_v61 = vand.u32 31, %v630_v44  ;;  %v479_v63 = vshrl.u32 %v3067_v40, %v478_v12 }
  0xb9   : > { %v407_v45 = vadd.s32 536870912, %v406_v34  ;;  %v510_v58 = vsel %vm496_vm15, %v507_v51, %v509_v28  ;;  %v626_v1 = vor.u32 8388608, %v3267_v43  ;;  %v512_v2 = vand.u32 65535, %v3263_v41 }
  0xba   : > { %v513_v3 = vshrl.u32 %v3263_v41, 16  ;;  %v514_v4 = vand.u32 65535, %v510_v58  ;;  %v515_v5 = vshrl.u32 %v510_v58, 16  ;;  %v499_v7 = vsel %vm495_vm12, %v479_v63, %v482_v29 }
  0xbb   : > { %v3274_v53 = vshrl.u32 %v407_v45, 30  ;;  %v501_v9 = vsel %vm497_vm14, %v485_v35, %v500_v57  ;;  %v537_v10 = vshrl.u32 %v506_v60, 16  ;;  %v3289_v16 = vshrl.u32 %v630_v44, 5 }
  0xbc   : > { %v517_v11 = vmul.u32 %v515_v5, %v512_v2  ;;  %v518_v15 = vmul.u32 %v514_v4, %v513_v3  ;;  %v3292_v12 = vsub.s32 32, %v3279_v61  ;;  %v536_v19 = vand.u32 65535, %v506_v60 }
  0xbd   : > { %v409_v62 = vshll.u32 %v3274_v53, 30  ;;  %v3296_v22 = vshll.u32 %v3067_v40, %v3279_v61  ;;  %v402_v23 = vadd.s32 %v397_v39, %v378_v13  ;;  %v3299_v24 = vsel %vm496_vm15, %v499_v7, %v501_v9 }
  0xbe   : > { %v516_v59 = vmul.u32 %v514_v4, %v512_v2  ;;  %v520_v25 = vshll.u32 %v517_v11, 16  ;;  %v432_v30 = vsub.s32 4, %v3274_v53  ;;  %v519_v32 = vmul.u32 %v515_v5, %v513_v3 }
  0xbf   : > { %v410_v6 = vsub.s32 %v406_v34, %v409_v62  ;;  %v539_v34 = vmul.u32 %v537_v10, %v512_v2  ;;  %v522_v36 = vshll.u32 %v518_v15, 16  ;;  %v538_v44 = vmul.u32 %v536_v19, %v512_v2 }
  0xc0   : > { %vm524_vm1 = vc.u32 %v516_v59, %v520_v25  ;;  %v526_v38 = vadd.s32 %v520_v25, %v516_v59  ;;  %v540_v45 = vmul.u32 %v536_v19, %v513_v3  ;;  %v556_v13 = vmul.u32 %v3263_v41, %v3299_v24 }
  0xc1   : > { %vm411_vm0 = vcmp.lt.s32.totalorder %v410_v6, 0  ;;  %v412_v18 = vsub.s32 0, %v410_v6  ;;  %v525_v37 = vsel %vm524_vm1, 1, %v3066_v0  ;;  %v542_v47 = vshll.u32 %v539_v34, 16 }
  0xc2   : > { %v527_v14 = vadd.s32 %v525_v37, %v519_v32  ;;  %vm528_vm2 = vc.u32 %v526_v38, %v522_v36  ;;  %v521_v48 = vshrl.u32 %v517_v11, 16  ;;  %v523_v50 = vshrl.u32 %v518_v15, 16 }
  0xc3   : > { %v413_v29 = vsel %vm411_vm0, %v412_v18, %v410_v6  ;;  %v529_v51 = vsel %vm528_vm2, 1, %v3066_v0  ;;  %v541_v54 = vmul.u32 %v537_v10, %v513_v3  ;;  %vm546_vm4 = vc.u32 %v538_v44, %v542_v47 }
  0xc4   : > { %v414_v35 = vclz %v413_v29  ;;  %v531_v56 = vadd.s32 %v529_v51, %v527_v14  ;;  %v548_v57 = vadd.s32 %v542_v47, %v538_v44  ;;  %v543_v28 = vshrl.u32 %v539_v34, 16 }
  0xc5   : > { %v544_v62 = vshll.u32 %v540_v45, 16  ;;  %v547_v63 = vsel %vm546_vm4, 1, %v3066_v0  ;;  %vm310_vm5 = vcmp.lt.s32.totalorder %v3180_v21, 0  ;;  %v545_v5 = vshrl.u32 %v540_v45, 16 }
  0xc6   : > { %v2890_v39 = vadd.s32 4294967294, %v414_v35  ;;  %v532_v4 = vadd.s32 %v531_v56, %v521_v48  ;;  %v549_v7 = vadd.s32 %v547_v63, %v541_v54  ;;  %v638_v3 = vshll.u32 %v3068_v42, %v3279_v61 }
  0xc7   : > { %vm550_vm6 = vc.u32 %v548_v57, %v544_v62  ;;  %v639_v9 = vshrl.u32 %v3069_v46, %v3292_v12  ;;  %v641_v25 = vshll.u32 %v3069_v46, %v3279_v61  ;;  %v642_v29 = vshrl.u32 %v3070_v49, %v3292_v12 }
  0xc8   : > { %vm2891_vm3 = vcmp.lt.s32.totalorder %v2890_v39, 0  ;;  %v551_v18 = vsel %vm550_vm6, 1, %v3066_v0  ;;  %v3313_v19 = vadd.s32 %v532_v4, %v523_v50  ;;  %v3319_v35 = vadd.s32 %v548_v57, %v544_v62  ;;  %v212_v50 = vpop.permute.xlu2 %211 }
  0xc9   : > { %v417_v60 = vsel %vm2891_vm3, 0, %v2890_v39  ;;  %v553_v59 = vadd.s32 %v551_v18, %v549_v7  ;;  %v3323_v36 = vor.u32 %v639_v9, %v638_v3  ;;  %v644_v38 = vshll.u32 %v3070_v49, %v3279_v61 }
  0xca   : > { %v418_v58 = vsub.s32 32, %v417_v60  ;;  %v422_v2 = vsub.s32 4294967266, %v417_v60  ;;  %v419_v10 = vshll.u32 %v410_v6, %v417_v60  ;;  %v636_v6 = vshrl.u32 %v3068_v42, %v3292_v12 }
  0xcb   : > { %v645_v37 = vshrl.u32 %v3071_v52, %v3292_v12  ;;  %v3329_v45 = vor.u32 %v642_v29, %v641_v25  ;;  %v647_v39 = vshll.u32 %v3071_v52, %v3279_v61  ;;  %v648_v14 = vshrl.u32 %v3072_v55, %v3292_v12 }
  0xcc   : > { %v420_v11 = vshrl.u32 %v402_v23, %v418_v58  ;;  %v423_v15 = vadd.s32 127, %v422_v2  ;;  %v554_v23 = vadd.s32 %v553_v59, %v543_v28  ;;  %vm558_vm7 = vc.u32 %v3313_v19, %v3319_v35  ;;  %v207_v2 = vpop.permute.xlu1 %206 }
  0xcd   : > { %v646_v48 = vor.u32 %v645_v37, %v644_v38  ;;  %vm650_vm8 = vcmp.lt.s32.totalorder %v3289_v16, 1  ;;  %v649_v56 = vor.u32 %v648_v14, %v647_v39  ;;  %vm653_vm9 = vcmp.lt.s32.totalorder %v3289_v16, 4 }
  0xce   : > { %v421_v32 = vor.u32 %v420_v11, %v419_v10  ;;  %v424_v34 = vshll.u32 %v423_v15, 23  ;;  %v555_v47 = vadd.s32 %v554_v23, %v545_v5  ;;  %v433_v61 = vsel %vm310_vm5, %v432_v30, %v3274_v53 }
  0xcf   : > { %v3345_v60 = vor.u32 %v636_v6, %v3296_v22  ;;  %vm652_vm10 = vcmp.lt.s32.totalorder %v3289_v16, 3  ;;  %vm651_vm11 = vcmp.lt.s32.totalorder %v3289_v16, 2  ;;  %v659_v62 = vsel %vm653_vm9, %v646_v48, 920167782 }
  0xd0   : > { %v425_v44 = vor.u32 4788187, %v424_v34  ;;  %v428_v54 = vcvt.s32.f32 %v421_v32  ;;  %v559_v57 = vadd.s32 1, %v555_v47  ;;  %v662_v63 = vsel %vm650_vm8, %v3323_v36, %v3329_v45 }
  0xd1   : > { %v276_v58 = vmul.f32 %v3171_v17, %v212_v50  ;;  %vm3358_vm12 = vcmp.le.f32.partialorder %v308_v27, 0.7853982  ;;  %v663_v30 = vsel %vm653_vm9, %v649_v56, 1326507024  ;;  %v658_v3 = vsel %vm650_vm8, %v3345_v60, %v3323_v36 }
  0xd2   : > { %v426_v51 = vand.u32 2147483647, %v425_v44  ;;  %v560_v22 = vsel %vm558_vm7, %v559_v57, %v555_v47  ;;  %v435_v5 = vsel %vm3358_vm12, 0, %v433_v61  ;;  %v664_v27 = vsel %vm652_vm10, %v646_v48, %v663_v30 }
  0xd3   : > { %v561_v7 = vadd.s32 %v560_v22, %v556_v13  ;;  %v660_v9 = vsel %vm652_vm10, %v3329_v45, %v659_v62  ;;  %v665_v10 = vsel %vm651_vm11, %v662_v63, %v664_v27  ;;  %v3385_v11 = vshll.u32 %v626_v1, 8 }
  0xd4   : > { %v429_v28 = vmul.f32 %v428_v54, %v426_v51  ;;  %v669_v13 = vand.u32 65535, %v665_v10  ;;  %v670_v15 = vshrl.u32 %v665_v10, 16  ;;  %v275_v18 = vmul.f32 %v3171_v17, %v207_v2 }
  0xd5   : > { %v562_v24 = vadd.s32 536870912, %v561_v7  ;;  %v667_v25 = vand.u32 65535, %v3385_v11  ;;  %v668_v29 = vshrl.u32 %v3385_v11, 16  ;;  %v452_v43 = vadd.s32 3, %v435_v5 }
  0xd6   : > { %v430_v4 = vxor.u32 2147483648, %v429_v28  ;;  %v661_v34 = vsel %vm651_vm11, %v658_v3, %v660_v9  ;;  %v3402_v17 = vadd.f32 %v3177_v20, %v276_v58  ;;  %v3406_v39 = vadd.f32 %v3177_v20, %v275_v18 }
  0xd7   : > { %v3395_v1 = vshrl.u32 %v562_v24, 30  ;;  %v672_v6 = vmul.u32 %v670_v15, %v667_v25  ;;  %v3399_v23 = vmul.u32 %v669_v13, %v668_v29  ;;  %v671_v14 = vmul.u32 %v669_v13, %v667_v25 }
  0xd8   : > { %v431_v41 = vsel %vm310_vm5, %v430_v4, %v429_v28  ;;  %v692_v48 = vshrl.u32 %v661_v34, 16  ;;  %v3408_v54 = vand.u32 3, %v452_v43  ;;  %v674_v61 = vmul.u32 %v670_v15, %v668_v29 }
  0xd9   : > { %v434_v59 = vsel %vm3358_vm12, %v3180_v21, %v431_v41  ;;  %v564_v44 = vshll.u32 %v3395_v1, 30  ;;  %v675_v47 = vshll.u32 %v672_v6, 16  ;;  %v677_v57 = vshll.u32 %v3399_v23, 16 }
  0xda   : > { %v436_v32 = vmul.f32 %v434_v59, %v434_v59  ;;  %v691_v53 = vand.u32 65535, %v661_v34  ;;  %v3416_v22 = vmul.u32 %v692_v48, %v667_v25  ;;  %vm455_vm0 = vcmp.eq.s32.totalorder %v3408_v54, 0 }
  0xdb   : > { %v3410_v56 = vsub.s32 %v561_v7, %v564_v44  ;;  %vm679_vm13 = vc.u32 %v671_v14, %v675_v47  ;;  %v681_v28 = vadd.s32 %v675_v47, %v671_v14  ;;  %v634_v27 = vshrl.u32 %v3067_v40, %v3292_v12 }
  0xdc   : > { %v437_v38 = vmul.f32 -0.001358992, %v436_v32  ;;  %v444_v37 = vmul.f32 -0.00019511016, %v436_v32  ;;  %v680_v58 = vsel %vm679_vm13, 1, %v3066_v0  ;;  %vm454_vm1 = vcmp.lt.s32.totalorder %v3408_v54, 2 }
  0xdd   : > { %vm566_vm14 = vcmp.lt.s32.totalorder %v3410_v56, 0  ;;  %v567_v20 = vsub.s32 0, %v3410_v56  ;;  %vm683_vm15 = vc.u32 %v681_v28, %v677_v57  ;;  %v682_v5 = vadd.s32 %v680_v58, %v674_v61 }
  0xde   : > { %v438_v50 = vadd.f32 0.041655596, %v437_v38  ;;  %v445_v51 = vadd.f32 0.008332121, %v444_v37  ;;  %v684_v3 = vsel %vm683_vm15, 1, %v3066_v0  ;;  %vm458_vm2 = vcmp.eq.s32.totalorder %v3408_v54, 2 }
  0xdf   : > { %v568_v4 = vsel %vm566_vm14, %v567_v20, %v3410_v56  ;;  %v557_v41 = vadd.s32 %v3319_v35, %v3313_v19  ;;  %vm451_vm3 = vweird.f32 %v3180_v21  ;;  %v655_v13 = vsel %vm653_vm9, %v3329_v45, 2102212464 }
  0xe0   : > { %v439_v62 = vmul.f32 %v438_v50, %v436_v32  ;;  %v446_v63 = vmul.f32 %v445_v51, %v436_v32  ;;  %v569_v7 = vclz %v568_v4  ;;  %v686_v12 = vadd.s32 %v684_v3, %v682_v5 }
  0xe1   : > { %v773_v15 = vand.u32 2147483647, %v3406_v39  ;;  %v695_v43 = vmul.u32 %v691_v53, %v668_v29  ;;  %v697_v34 = vshll.u32 %v3416_v22, 16  ;;  %vm465_vm4 = vcmp.lt.s32.totalorder %v3192_v33, 0 }
  0xe2   : > { %v440_v30 = vadd.f32 -0.4999988, %v439_v62  ;;  %v447_v2 = vadd.f32 -0.16666654, %v446_v63  ;;  %v2893_v24 = vadd.s32 4294967294, %v569_v7  ;;  %v587_v19 = vsub.s32 4, %v3395_v1 }
  0xe3   : > { %v676_v35 = vshrl.u32 %v672_v6, 16  ;;  %v693_v38 = vmul.u32 %v691_v53, %v667_v25  ;;  %v696_v14 = vmul.u32 %v692_v48, %v668_v29  ;;  %v699_v57 = vshll.u32 %v695_v43, 16 }
  0xe4   : > { %v441_v9 = vmul.f32 %v440_v30, %v436_v32  ;;  %v448_v10 = vmul.f32 %v447_v2, %v436_v32  ;;  %vm2894_vm5 = vcmp.lt.s32.totalorder %v2893_v24, 0  ;;  %v678_v48 = vshrl.u32 %v3399_v23, 16 }
  0xe5   : > { %v572_v45 = vsel %vm2894_vm5, 0, %v2893_v24  ;;  %v687_v51 = vadd.s32 %v686_v12, %v676_v35  ;;  %vm701_vm6 = vc.u32 %v693_v38, %v697_v34  ;;  %v703_v62 = vadd.s32 %v697_v34, %v693_v38 }
  0xe6   : > { %v442_v18 = vadd.f32 1.0, %v441_v9  ;;  %v449_v32 = vadd.f32 1.0, %v448_v10  ;;  %v573_v47 = vsub.s32 32, %v572_v45  ;;  %v577_v50 = vsub.s32 4294967266, %v572_v45 }
  0xe7   : > { %v702_v28 = vsel %vm701_vm6, 1, %v3066_v0  ;;  %v574_v63 = vshll.u32 %v3410_v56, %v572_v45  ;;  %vm705_vm7 = vc.u32 %v703_v62, %v699_v57  ;;  %v654_v4 = vsel %vm650_vm8, %v634_v27, %v3345_v60 }
  0xe8   : > { %v450_v37 = vmul.f32 %v449_v32, %v434_v59  ;;  %v459_v44 = vxor.u32 2147483648, %v442_v18  ;;  %v575_v6 = vshrl.u32 %v557_v41, %v573_v47  ;;  %v578_v25 = vadd.s32 127, %v577_v50 }
  0xe9   : > { %v704_v20 = vadd.s32 %v702_v28, %v696_v14  ;;  %v706_v2 = vsel %vm705_vm7, 1, %v3066_v0  ;;  %v698_v5 = vshrl.u32 %v3416_v22, 16  ;;  %v656_v23 = vsel %vm652_vm10, %v3323_v36, %v655_v13 }
  0xea   : > { %v456_v61 = vxor.u32 2147483648, %v450_v37  ;;  %v460_v29 = vsel %vm458_vm2, %v459_v44, %v450_v37  ;;  %v576_v53 = vor.u32 %v575_v6, %v574_v63  ;;  %v579_v30 = vshll.u32 %v578_v25, 23 }
  0xeb   : > { %v708_v7 = vadd.s32 %v706_v2, %v704_v20  ;;  %v688_v54 = vadd.s32 %v687_v51, %v678_v48  ;;  %v776_v9 = vand.u32 2139095040, %v3406_v39  ;;  %v588_v21 = vsel %vm465_vm4, %v587_v19, %v3395_v1 }
  0xec   : > { %v457_v59 = vsel %vm455_vm0, %v442_v18, %v456_v61  ;;  %v580_v3 = vor.u32 4788187, %v579_v30  ;;  %v700_v60 = vshrl.u32 %v695_v43, 16  ;;  %v780_v22 = vand.u32 8388607, %v773_v15 }
  0xed   : > { %v461_v58 = vsel %vm454_vm1, %v457_v59, %v460_v29  ;;  %v709_v27 = vadd.s32 %v708_v7, %v698_v5  ;;  %v583_v41 = vcvt.s32.f32 %v576_v53  ;;  %v707_v24 = vadd.s32 %v703_v62, %v699_v57 }
  0xee   : > { %v462_v56 = vsel %vm451_vm3, nan, %v461_v58  ;;  %v581_v10 = vand.u32 2147483647, %v580_v3  ;;  %v777_v36 = vshrl.u32 %v776_v9, 23  ;;  %v657_v13 = vsel %vm651_vm11, %v654_v4, %v656_v23 }
  0xef   : > { %2788 = vst [vmem:[%s3458_s8] sm:$0xff] %v462_v56  ;;  %v710_v12 = vadd.s32 %v709_v27, %v700_v60  ;;  %v931_v18 = vand.u32 2139095040, %v3402_v17  ;;  %vm3471_vm8 = vcmp.le.f32.partialorder %v463_v26, 0.7853982  ;;  %vm713_vm9 = vc.u32 %v688_v54, %v707_v24 }
  0xf0   : > { %v584_v1 = vmul.f32 %v583_v41, %v581_v10  ;;  %v2898_v43 = vadd.s32 4294967169, %v777_v36  ;;  %v590_v34 = vsel %vm3471_vm8, 0, %v588_v21  ;;  %v781_v35 = vor.u32 8388608, %v780_v22 }
  0xf1   : > { %v714_v19 = vadd.s32 1, %v710_v12  ;;  %v711_v16 = vmul.u32 %v3385_v11, %v657_v13  ;;  %v932_v45 = vshrl.u32 %v931_v18, 23  ;;  %v607_v14 = vadd.s32 3, %v590_v34 }
  0xf2   : > { %v585_v38 = vxor.u32 2147483648, %v584_v1  ;;  %v783_v37 = vadd.s32 1, %v2898_v43  ;;  %v3483_v61 = vshll.u32 %v781_v35, 8  ;;  %v928_v57 = vand.u32 2147483647, %v3402_v17 }
  0xf3   : > { %v715_v44 = vsel %vm713_vm9, %v714_v19, %v710_v12  ;;  %vm620_vm11 = vcmp.lt.s32.totalorder %v3187_v31, 0  ;;  %v2901_v63 = vadd.s32 4294967169, %v932_v45  ;;  %v3487_v20 = vand.u32 3, %v607_v14 }
  0xf4   : > { %v586_v26 = vsel %vm465_vm4, %v585_v38, %v584_v1  ;;  %v716_v47 = vadd.s32 %v715_v44, %v711_v16  ;;  %vm784_vm10 = vcmp.gt.s32.totalorder %v783_v37, 0  ;;  %v3489_v29 = vadd.s32 %v707_v24, %v688_v54 }
  0xf5   : > { %v589_v50 = vsel %vm3471_vm8, %v3192_v33, %v586_v26  ;;  %v785_v51 = vsel %vm784_vm10, %v783_v37, 0  ;;  %v3492_v58 = vand.u32 65535, %v3483_v61  ;;  %v3496_v53 = vand.u32 8388607, %v928_v57 }
  0xf6   : > { %v591_v28 = vmul.f32 %v589_v50, %v589_v50  ;;  %v717_v11 = vadd.s32 536870912, %v716_v47  ;;  %v787_v62 = vand.u32 31, %v785_v51  ;;  %vm3500_vm12 = vcmp.le.f32.partialorder %v618_v8, 0.7853982 }
  0xf7   : > { %v3505_v5 = vshrl.u32 %v3483_v61, 16  ;;  %v3507_v7 = vshrl.u32 %v785_v51, 5  ;;  %v3511_v54 = vadd.s32 1, %v2901_v63  ;;  %vm613_vm13 = vcmp.eq.s32.totalorder %v3487_v20, 2 }
  0xf8   : > { %v592_v6 = vmul.f32 -0.001358992, %v591_v28  ;;  %v599_v25 = vmul.f32 -0.00019511016, %v591_v28  ;;  %v718_v59 = vshrl.u32 %v717_v11, 30  ;;  %v788_v48 = vsub.s32 32, %v787_v62 }
  0xf9   : > { %v790_v3 = vshll.u32 %v3067_v40, %v787_v62  ;;  %v793_v23 = vshll.u32 %v3068_v42, %v787_v62  ;;  %v796_v10 = vshll.u32 %v3069_v46, %v787_v62  ;;  %vm610_vm15 = vcmp.eq.s32.totalorder %v3487_v20, 0 }
  0xfa   : > { %v593_v30 = vadd.f32 0.041655596, %v592_v6  ;;  %v600_v2 = vadd.f32 0.008332121, %v599_v25  ;;  %v719_v4 = vshll.u32 %v718_v59, 30  ;;  %v742_v8 = vsub.s32 4, %v718_v59 }
  0xfb   : > { %v791_v27 = vshrl.u32 %v3068_v42, %v788_v48  ;;  %v794_v22 = vshrl.u32 %v3069_v46, %v788_v48  ;;  %v797_v41 = vshrl.u32 %v3070_v49, %v788_v48  ;;  %v789_v12 = vshrl.u32 %v3067_v40, %v788_v48 }
  0xfc   : > { %v594_v9 = vmul.f32 %v593_v30, %v591_v28  ;;  %v601_v21 = vmul.f32 %v600_v2, %v591_v28  ;;  %v3513_v60 = vsub.s32 %v716_v47, %v719_v4  ;;  %v799_v18 = vshll.u32 %v3070_v49, %v787_v62 }
  0xfd   : > { %v800_v32 = vshrl.u32 %v3071_v52, %v788_v48  ;;  %v803_v1 = vshrl.u32 %v3072_v55, %v788_v48  ;;  %vm609_vm0 = vcmp.lt.s32.totalorder %v3487_v20, 2  ;;  %v743_v35 = vsel %vm620_vm11, %v742_v8, %v718_v59 }
  0xfe   : > { %v595_v24 = vadd.f32 -0.4999988, %v594_v9  ;;  %v602_v36 = vadd.f32 -0.16666654, %v601_v21  ;;  %vm721_vm14 = vcmp.lt.s32.totalorder %v3513_v60, 0  ;;  %v722_v13 = vsub.s32 0, %v3513_v60 }
  0xff   : > { %vm606_vm1 = vweird.f32 %v3192_v33  ;;  %v792_v16 = vor.u32 %v791_v27, %v790_v3  ;;  %v801_v37 = vor.u32 %v800_v32, %v799_v18  ;;  %v802_v44 = vshll.u32 %v3071_v52, %v787_v62 }
 0x100   : > { %v596_v43 = vmul.f32 %v595_v24, %v591_v28  ;;  %v603_v34 = vmul.f32 %v602_v36, %v591_v28  ;;  %v723_v19 = vsel %vm721_vm14, %v722_v13, %v3513_v60  ;;  %v795_v14 = vor.u32 %v794_v22, %v793_v23 }
 0x101   : > { %v724_v38 = vclz %v723_v19  ;;  %v798_v47 = vor.u32 %v797_v41, %v796_v10  ;;  %v745_v28 = vsel %vm3500_vm12, 0, %v743_v35  ;;  %v804_v11 = vor.u32 %v803_v1, %v802_v44 }
 0x102   : > { %v597_v45 = vadd.f32 1.0, %v596_v43  ;;  %v604_v26 = vadd.f32 1.0, %v603_v34  ;;  %vm805_vm2 = vcmp.lt.s32.totalorder %v3507_v7, 1  ;;  %vm806_vm3 = vcmp.lt.s32.totalorder %v3507_v7, 2 }
 0x103   : > { %v2896_v51 = vadd.s32 4294967294, %v724_v38  ;;  %vm808_vm4 = vcmp.lt.s32.totalorder %v3507_v7, 4  ;;  %vm807_vm6 = vcmp.lt.s32.totalorder %v3507_v7, 3  ;;  %v809_v62 = vsel %vm805_vm2, %v789_v12, %v792_v16 }
 0x104   : > { %v605_v63 = vmul.f32 %v604_v26, %v589_v50  ;;  %v614_v6 = vxor.u32 2147483648, %v597_v45  ;;  %v814_v25 = vsel %vm808_vm4, %v801_v37, 920167782  ;;  %v810_v30 = vsel %vm808_vm4, %v798_v47, 2102212464 }
 0x105   : > { %vm2897_vm5 = vcmp.lt.s32.totalorder %v2896_v51, 0  ;;  %v813_v50 = vsel %vm805_vm2, %v792_v16, %v795_v14  ;;  %v815_v21 = vsel %vm807_vm6, %v798_v47, %v814_v25  ;;  %v817_v8 = vsel %vm805_vm2, %v795_v14, %v798_v47 }
 0x106   : > { %v611_v59 = vxor.u32 2147483648, %v605_v63  ;;  %v727_v48 = vsel %vm2897_vm5, 0, %v2896_v51  ;;  %v615_v2 = vsel %vm613_vm13, %v614_v6, %v605_v63  ;;  %v818_v27 = vsel %vm808_vm4, %v804_v11, 1326507024 }
 0x107   : > { %v728_v4 = vsub.s32 32, %v727_v48  ;;  %v729_v3 = vshll.u32 %v3513_v60, %v727_v48  ;;  %v732_v23 = vsub.s32 4294967266, %v727_v48  ;;  %v816_v41 = vsel %vm806_vm3, %v813_v50, %v815_v21 }
 0x108   : > { %v612_v9 = vsel %vm610_vm15, %v597_v45, %v611_v59  ;;  %v819_v36 = vsel %vm807_vm6, %v801_v37, %v818_v27  ;;  %v846_v13 = vand.u32 65535, %v816_v41  ;;  %v847_v12 = vshrl.u32 %v816_v41, 16 }
 0x109   : > { %v616_v22 = vsel %vm609_vm0, %v612_v9, %v615_v2  ;;  %v730_v10 = vshrl.u32 %v3489_v29, %v728_v4  ;;  %v733_v60 = vadd.s32 127, %v732_v23  ;;  %v811_v20 = vsel %vm807_vm6, %v795_v14, %v810_v30 }
 0x10a   : > { %v617_v24 = vsel %vm606_vm1, nan, %v616_v22  ;;  %v820_v29 = vsel %vm806_vm3, %v817_v8, %v819_v36  ;;  %v849_v34 = vmul.u32 %v847_v12, %v3492_v58  ;;  %v936_v33 = vor.u32 8388608, %v3496_v53 }
 0x10b   : > { %v731_v18 = vor.u32 %v730_v10, %v729_v3  ;;  %v734_v32 = vshll.u32 %v733_v60, 23  ;;  %2789 = vst [vmem:[%s3458_s8 + $0x8] sm:$0xff] %v617_v24  ;;  %v824_v1 = vand.u32 65535, %v820_v29  ;;  %v825_v43 = vshrl.u32 %v820_v29, 16 }
 0x10c   : > { %v3574_v35 = vadd.s32 3, %v745_v28  ;;  %v850_v38 = vmul.u32 %v846_v13, %v3505_v5  ;;  %vm939_vm7 = vcmp.gt.s32.totalorder %v3511_v54, 0  ;;  %v3580_v16 = vsel %vm806_vm3, %v809_v62, %v811_v20 }
 0x10d   : > { %v735_v19 = vor.u32 4788187, %v734_v32  ;;  %v827_v37 = vmul.u32 %v825_v43, %v3492_v58  ;;  %v828_v44 = vmul.u32 %v824_v1, %v3505_v5  ;;  %v848_v45 = vmul.u32 %v846_v13, %v3492_v58 }
 0x10e   : > { %v738_v14 = vcvt.s32.f32 %v731_v18  ;;  %v851_v47 = vmul.u32 %v847_v12, %v3505_v5  ;;  %v852_v51 = vshll.u32 %v849_v34, 16  ;;  %v826_v28 = vmul.u32 %v824_v1, %v3492_v58 }
 0x10f   : > { %v736_v26 = vand.u32 2147483647, %v735_v19  ;;  %v829_v11 = vmul.u32 %v825_v43, %v3505_v5  ;;  %v830_v63 = vshll.u32 %v827_v37, 16  ;;  %v854_v6 = vshll.u32 %v850_v38, 16 }
 0x110   : > { %v832_v62 = vshll.u32 %v828_v44, 16  ;;  %vm856_vm8 = vc.u32 %v848_v45, %v852_v51  ;;  %v858_v25 = vadd.s32 %v852_v51, %v848_v45  ;;  %v940_v30 = vsel %vm939_vm7, %v3511_v54, 0 }
 0x111   : > { %v739_v7 = vmul.f32 %v738_v14, %v736_v26  ;;  %vm834_vm9 = vc.u32 %v826_v28, %v830_v63  ;;  %v836_v59 = vadd.s32 %v830_v63, %v826_v28  ;;  %v857_v48 = vsel %vm856_vm8, 1, %v3066_v0 }
 0x112   : > { %v835_v2 = vsel %vm834_vm9, 1, %v3066_v0  ;;  %v859_v58 = vadd.s32 %v857_v48, %v851_v47  ;;  %vm860_vm10 = vc.u32 %v858_v25, %v854_v6  ;;  %v853_v4 = vshrl.u32 %v849_v34, 16 }
 0x113   : > { %v740_v50 = vxor.u32 2147483648, %v739_v7  ;;  %v837_v5 = vadd.s32 %v835_v2, %v829_v11  ;;  %vm838_vm13 = vc.u32 %v836_v59, %v832_v62  ;;  %v861_v3 = vsel %vm860_vm10, 1, %v3066_v0  ;;  %v217_v2 = vpop.permute.xlu2 %216 }
 0x114   : > { %v831_v9 = vshrl.u32 %v827_v37, 16  ;;  %v839_v21 = vsel %vm838_vm13, 1, %v3066_v0  ;;  %v863_v8 = vadd.s32 %v861_v3, %v859_v58  ;;  %v833_v27 = vshrl.u32 %v828_v44, 16 }
 0x115   : > { %v741_v23 = vsel %vm620_vm11, %v740_v50, %v739_v7  ;;  %v841_v22 = vadd.s32 %v839_v21, %v837_v5  ;;  %v942_v10 = vand.u32 31, %v940_v30  ;;  %v855_v41 = vshrl.u32 %v850_v38, 16 }
 0x116   : > { %v3600_v54 = vsel %vm3500_vm12, %v3187_v31, %v741_v23  ;;  %v3604_v24 = vadd.s32 %v858_v25, %v854_v6  ;;  %v864_v36 = vadd.s32 %v863_v8, %v853_v4  ;;  %v3606_v12 = vshrl.u32 %v940_v30, 5 }
 0x117   : > { %v746_v60 = vmul.f32 %v3600_v54, %v3600_v54  ;;  %v842_v13 = vadd.s32 %v841_v22, %v831_v9  ;;  %v3608_v18 = vsub.s32 32, %v942_v10  ;;  %v945_v32 = vshll.u32 %v3067_v40, %v942_v10 }
 0x118   : > { %v865_v29 = vadd.s32 %v864_v36, %v855_v41  ;;  %v948_v1 = vshll.u32 %v3068_v42, %v942_v10  ;;  %v951_v38 = vshll.u32 %v3069_v46, %v942_v10  ;;  %v866_v14 = vmul.u32 %v3483_v61, %v3580_v16 }
 0x119   : > { %v747_v56 = vmul.f32 -0.001358992, %v746_v60  ;;  %v754_v20 = vmul.f32 -0.00019511016, %v746_v60  ;;  %v3612_v43 = vadd.s32 %v842_v13, %v833_v27  ;;  %v946_v34 = vshrl.u32 %v3068_v42, %v3608_v18 }
 0x11a   : > { %v949_v19 = vshrl.u32 %v3069_v46, %v3608_v18  ;;  %v869_v45 = vadd.s32 1, %v865_v29  ;;  %v952_v26 = vshrl.u32 %v3070_v49, %v3608_v18  ;;  %vm960_vm12 = vcmp.lt.s32.totalorder %v3606_v12, 1 }
 0x11b   : > { %v748_v37 = vadd.f32 0.041655596, %v747_v56  ;;  %v755_v44 = vadd.f32 0.008332121, %v754_v20  ;;  %vm868_vm11 = vc.u32 %v3612_v43, %v3604_v24  ;;  %v3625_v47 = vor.u32 %v946_v34, %v945_v32 }
 0x11c   : > { %v870_v11 = vsel %vm868_vm11, %v869_v45, %v865_v29  ;;  %v3628_v63 = vor.u32 %v949_v19, %v948_v1  ;;  %v954_v7 = vshll.u32 %v3070_v49, %v942_v10  ;;  %v955_v62 = vshrl.u32 %v3071_v52, %v3608_v18 }
 0x11d   : > { %v749_v51 = vmul.f32 %v748_v37, %v746_v60  ;;  %v756_v28 = vmul.f32 %v755_v44, %v746_v60  ;;  %v871_v6 = vadd.s32 %v870_v11, %v866_v14  ;;  %v957_v61 = vshll.u32 %v3071_v52, %v942_v10  ;;  %v3660_v10 = vld [vmem:[%s4966_s1] ss:$0 sm:$0xff] }
 0x11e   : > { %v3634_v59 = vor.u32 %v952_v26, %v951_v38  ;;  %v958_v48 = vshrl.u32 %v3072_v55, %v3608_v18  ;;  %v956_v50 = vor.u32 %v955_v62, %v954_v7  ;;  %vm962_vm14 = vcmp.lt.s32.totalorder %v3606_v12, 3 }
 0x11f   : > { %v750_v16 = vadd.f32 -0.4999988, %v749_v51  ;;  %v757_v25 = vadd.f32 -0.16666654, %v756_v28  ;;  %v872_v30 = vadd.s32 536870912, %v871_v6  ;;  %vm963_vm15 = vcmp.lt.s32.totalorder %v3606_v12, 4 }
 0x120   : > { %v763_v4 = vand.u32 3, %v3574_v35  ;;  %v959_v3 = vor.u32 %v958_v48, %v957_v61  ;;  %vm961_vm0 = vcmp.lt.s32.totalorder %v3606_v12, 2  ;;  %v969_v9 = vsel %vm963_vm15, %v956_v50, 920167782 }
 0x121   : > { %v751_v58 = vmul.f32 %v750_v16, %v746_v60  ;;  %v758_v5 = vmul.f32 %v757_v25, %v746_v60  ;;  %v3641_v23 = vshrl.u32 %v872_v30, 30  ;;  %v3648_v21 = vshll.u32 %v936_v33, 8  ;;  %v3686_v16 = vld [vmem:[%s4967_s2] ss:$0 sm:$0xff] }
 0x122   : > { %v968_v22 = vsel %vm960_vm12, %v3625_v47, %v3628_v63  ;;  %v970_v35 = vsel %vm962_vm14, %v3634_v59, %v969_v9  ;;  %v277_v53 = vmul.f32 %v3660_v10, %v217_v2  ;;  %vm761_vm1 = vweird.f32 %v3187_v31 }
 0x123   : > { %v752_v8 = vadd.f32 1.0, %v751_v58  ;;  %v759_v27 = vadd.f32 1.0, %v758_v5  ;;  %v874_v33 = vshll.u32 %v3641_v23, 30  ;;  %v972_v60 = vsel %vm960_vm12, %v3628_v63, %v3634_v59 }
 0x124   : > { %vm764_vm2 = vcmp.lt.s32.totalorder %v763_v4, 2  ;;  %v973_v13 = vsel %vm963_vm15, %v959_v3, 1326507024  ;;  %vm765_vm3 = vcmp.eq.s32.totalorder %v763_v4, 0  ;;  %v971_v56 = vsel %vm961_vm0, %v968_v22, %v970_v35 }
 0x125   : > { %v760_v41 = vmul.f32 %v759_v27, %v3600_v54  ;;  %v769_v36 = vxor.u32 2147483648, %v752_v8  ;;  %v875_v32 = vsub.s32 %v871_v6, %v874_v33  ;;  %v974_v20 = vsel %vm962_vm14, %v956_v50, %v973_v13 }
 0x126   : > { %v975_v1 = vsel %vm961_vm0, %v972_v60, %v974_v20  ;;  %v977_v34 = vand.u32 65535, %v3648_v21  ;;  %v978_v54 = vshrl.u32 %v3648_v21, 16  ;;  %vm768_vm4 = vcmp.eq.s32.totalorder %v763_v4, 2 }
 0x127   : > { %v766_v29 = vxor.u32 2147483648, %v760_v41  ;;  %vm876_vm5 = vcmp.lt.s32.totalorder %v875_v32, 0  ;;  %v877_v19 = vsub.s32 0, %v875_v32  ;;  %v979_v38 = vand.u32 65535, %v975_v1 }
 0x128   : > { %v770_v44 = vsel %vm768_vm4, %v769_v36, %v760_v41  ;;  %v980_v45 = vshrl.u32 %v975_v1, 16  ;;  %v1001_v26 = vand.u32 65535, %v971_v56  ;;  %v1002_v11 = vshrl.u32 %v971_v56, 16 }
 0x129   : > { %v767_v37 = vsel %vm765_vm3, %v752_v8, %v766_v29  ;;  %v878_v51 = vsel %vm876_vm5, %v877_v19, %v875_v32  ;;  %v981_v28 = vmul.u32 %v979_v38, %v977_v34  ;;  %v983_v61 = vmul.u32 %v979_v38, %v978_v54 }
 0x12a   : > { %v771_v14 = vsel %vm764_vm2, %v767_v37, %v770_v44  ;;  %v879_v7 = vclz %v878_v51  ;;  %v982_v62 = vmul.u32 %v980_v45, %v977_v34  ;;  %v3689_v25 = vadd.f32 %v3686_v16, %v277_v53 }
 0x12b   : > { %v772_v6 = vsel %vm761_vm1, nan, %v771_v14  ;;  %v944_v30 = vshrl.u32 %v3067_v40, %v3608_v18  ;;  %v984_v50 = vmul.u32 %v980_v45, %v978_v54  ;;  %v987_v31 = vshll.u32 %v983_v61, 16 }
 0x12c   : > { %2790 = vst [vmem:[%s3458_s8 + $0x10] sm:$0xff] %v772_v6  ;;  %v2899_v48 = vadd.s32 4294967294, %v879_v7  ;;  %v985_v2 = vshll.u32 %v982_v62, 16  ;;  %v1003_v58 = vmul.u32 %v1001_v26, %v977_v34  ;;  %v1004_v5 = vmul.u32 %v1002_v11, %v977_v34 }
 0x12d   : > { %v1005_v4 = vmul.u32 %v1001_v26, %v978_v54  ;;  %v867_v3 = vadd.s32 %v3604_v24, %v3612_v43  ;;  %v1006_v22 = vmul.u32 %v1002_v11, %v978_v54  ;;  %v986_v18 = vshrl.u32 %v982_v62, 16 }
 0x12e   : > { %vm2900_vm6 = vcmp.lt.s32.totalorder %v2899_v48, 0  ;;  %vm989_vm7 = vc.u32 %v981_v28, %v985_v2  ;;  %v991_v9 = vadd.s32 %v985_v2, %v981_v28  ;;  %v1007_v35 = vshll.u32 %v1004_v5, 16 }
 0x12f   : > { %v882_v8 = vsel %vm2900_vm6, 0, %v2899_v48  ;;  %v990_v27 = vsel %vm989_vm7, 1, %v3066_v0  ;;  %v1009_v36 = vshll.u32 %v1005_v4, 16  ;;  %v965_v20 = vsel %vm963_vm15, %v3634_v59, 2102212464 }
 0x130   : > { %v883_v53 = vsub.s32 32, %v882_v8  ;;  %v887_v33 = vsub.s32 4294967266, %v882_v8  ;;  %v992_v60 = vadd.s32 %v990_v27, %v984_v50  ;;  %v884_v41 = vshll.u32 %v875_v32, %v882_v8  ;;  %v222_v27 = vpop.permute.xlu0 %221 }
 0x131   : > { %vm993_vm8 = vc.u32 %v991_v9, %v987_v31  ;;  %vm1011_vm9 = vc.u32 %v1003_v58, %v1007_v35  ;;  %v1013_v1 = vadd.s32 %v1007_v35, %v1003_v58  ;;  %v988_v38 = vshrl.u32 %v983_v61, 16 }
 0x132   : > { %v885_v13 = vshrl.u32 %v867_v3, %v883_v53  ;;  %v888_v56 = vadd.s32 127, %v887_v33  ;;  %v994_v24 = vsel %vm993_vm8, 1, %v3066_v0  ;;  %v1012_v43 = vsel %vm1011_vm9, 1, %v3066_v0 }
 0x133   : > { %v996_v29 = vadd.s32 %v994_v24, %v992_v60  ;;  %v1014_v34 = vadd.s32 %v1012_v43, %v1006_v22  ;;  %v964_v32 = vsel %vm960_vm12, %v944_v30, %v3625_v47  ;;  %v1008_v44 = vshrl.u32 %v1004_v5, 16 }
 0x134   : > { %v886_v54 = vor.u32 %v885_v13, %v884_v41  ;;  %v889_v19 = vshll.u32 %v888_v56, 23  ;;  %vm1015_vm10 = vc.u32 %v1013_v1, %v1009_v36  ;;  %v897_v26 = vsub.s32 4, %v3641_v23 }
 0x135   : > { %v997_v37 = vadd.s32 %v996_v29, %v986_v18  ;;  %v966_v59 = vsel %vm962_vm14, %v3628_v63, %v965_v20  ;;  %v1016_v14 = vsel %vm1015_vm10, 1, %v3066_v0  ;;  %vm775_vm13 = vcmp.lt.s32.totalorder %v3406_v39, 0 }
 0x136   : > { %v890_v45 = vor.u32 4788187, %v889_v19  ;;  %v1010_v51 = vshrl.u32 %v1005_v4, 16  ;;  %v1018_v28 = vadd.s32 %v1016_v14, %v1014_v34  ;;  %v1086_v11 = vand.u32 2139095040, %v3689_v25 }
 0x137   : > { %v893_v47 = vcvt.s32.f32 %v886_v54  ;;  %v998_v7 = vadd.s32 %v997_v37, %v988_v38  ;;  %v1017_v62 = vadd.s32 %v1013_v1, %v1009_v36  ;;  %v967_v61 = vsel %vm961_vm0, %v964_v32, %v966_v59 }
 0x138   : > { %v891_v6 = vand.u32 2147483647, %v890_v45  ;;  %v1019_v48 = vadd.s32 %v1018_v28, %v1008_v44  ;;  %v1083_v30 = vand.u32 2147483647, %v3689_v25  ;;  %v1087_v50 = vshrl.u32 %v1086_v11, 23 }
 0x139   : > { %v898_v2 = vsel %vm775_vm13, %v897_v26, %v3641_v23  ;;  %vm774_vm11 = vcmp.le.f32.partialorder %v773_v15, 0.7853982  ;;  %v1021_v4 = vmul.u32 %v3648_v21, %v967_v61  ;;  %vm1023_vm12 = vc.u32 %v998_v7, %v1017_v62 }
 0x13a   : > { %v894_v63 = vmul.f32 %v893_v47, %v891_v6  ;;  %v1020_v31 = vadd.s32 %v1019_v48, %v1010_v51  ;;  %v2904_v58 = vadd.s32 4294967169, %v1087_v50  ;;  %v900_v12 = vsel %vm774_vm11, 0, %v898_v2 }
 0x13b   : > { %v1090_v9 = vand.u32 8388607, %v1083_v30  ;;  %v917_v15 = vadd.s32 3, %v900_v12  ;;  %v278_v21 = vmul.f32 %v3660_v10, %v222_v27  ;;  %v3732_v54 = vadd.s32 %v1017_v62, %v998_v7 }
 0x13c   : > { %v895_v5 = vxor.u32 2147483648, %v894_v63  ;;  %v1024_v3 = vadd.s32 1, %v1020_v31  ;;  %v1093_v8 = vadd.s32 1, %v2904_v58  ;;  %vm930_vm15 = vcmp.lt.s32.totalorder %v3402_v17, 0 }
 0x13d   : > { %v1091_v60 = vor.u32 8388608, %v1090_v9  ;;  %v3727_v29 = vand.u32 3, %v917_v15  ;;  %v3730_v34 = vadd.f32 %v3686_v16, %v278_v21  ;;  %vm3756_vm3 = vcmp.le.f32.partialorder %v928_v57, 0.7853982 }
 0x13e   : > { %v896_v22 = vsel %vm775_vm13, %v895_v5, %v894_v63  ;;  %v1025_v35 = vsel %vm1023_vm12, %v1024_v3, %v1020_v31  ;;  %vm1094_vm14 = vcmp.gt.s32.totalorder %v1093_v8, 0  ;;  %vm916_vm5 = vweird.f32 %v3406_v39 }
 0x13f   : > { %v899_v23 = vsel %vm774_vm11, %v3406_v39, %v896_v22  ;;  %v1026_v33 = vadd.s32 %v1025_v35, %v1021_v4  ;;  %v1095_v18 = vsel %vm1094_vm14, %v1093_v8, 0  ;;  %v3735_v38 = vshll.u32 %v1091_v60, 8 }
 0x140   : > { %v901_v53 = vmul.f32 %v899_v23, %v899_v23  ;;  %v1097_v41 = vand.u32 31, %v1095_v18  ;;  %vm923_vm0 = vcmp.eq.s32.totalorder %v3727_v29, 2  ;;  %v3746_v47 = vshrl.u32 %v1095_v18, 5 }
 0x141   : > { %v1027_v56 = vadd.s32 536870912, %v1026_v33  ;;  %vm920_vm1 = vcmp.eq.s32.totalorder %v3727_v29, 0  ;;  %vm919_vm2 = vcmp.lt.s32.totalorder %v3727_v29, 2  ;;  %v1132_v22 = vand.u32 65535, %v3735_v38 }
 0x142   : > { %v902_v36 = vmul.f32 -0.001358992, %v901_v53  ;;  %v909_v13 = vmul.f32 -0.00019511016, %v901_v53  ;;  %v1098_v24 = vsub.s32 32, %v1097_v41  ;;  %v1100_v19 = vshll.u32 %v3067_v40, %v1097_v41 }
 0x143   : > { %v1028_v1 = vshrl.u32 %v1027_v56, 30  ;;  %v1103_v45 = vshll.u32 %v3068_v42, %v1097_v41  ;;  %v1109_v14 = vshll.u32 %v3070_v49, %v1097_v41  ;;  %v1106_v7 = vshll.u32 %v3069_v46, %v1097_v41 }
 0x144   : > { %v903_v43 = vadd.f32 0.041655596, %v902_v36  ;;  %v910_v20 = vadd.f32 0.008332121, %v909_v13  ;;  %v1101_v26 = vshrl.u32 %v3068_v42, %v1098_v24  ;;  %v1104_v59 = vshrl.u32 %v3069_v46, %v1098_v24 }
 0x145   : > { %v1029_v44 = vshll.u32 %v1028_v1, 30  ;;  %v1110_v51 = vshrl.u32 %v3071_v52, %v1098_v24  ;;  %v1107_v62 = vshrl.u32 %v3070_v49, %v1098_v24  ;;  %v1112_v61 = vshll.u32 %v3071_v52, %v1097_v41 }
 0x146   : > { %v904_v32 = vmul.f32 %v903_v43, %v901_v53  ;;  %v911_v37 = vmul.f32 %v910_v20, %v901_v53  ;;  %v1113_v48 = vshrl.u32 %v3072_v55, %v1098_v24  ;;  %v1052_v58 = vsub.s32 4, %v1028_v1 }
 0x147   : > { %v3744_v6 = vsub.s32 %v1026_v33, %v1029_v44  ;;  %v1102_v5 = vor.u32 %v1101_v26, %v1100_v19  ;;  %v1105_v4 = vor.u32 %v1104_v59, %v1103_v45  ;;  %v1111_v12 = vor.u32 %v1110_v51, %v1109_v14 }
 0x148   : > { %v905_v28 = vadd.f32 -0.4999988, %v904_v32  ;;  %v912_v11 = vadd.f32 -0.16666654, %v911_v37  ;;  %vm1115_vm6 = vcmp.lt.s32.totalorder %v3746_v47, 1  ;;  %v1108_v27 = vor.u32 %v1107_v62, %v1106_v7 }
 0x149   : > { %vm1031_vm4 = vcmp.lt.s32.totalorder %v3744_v6, 0  ;;  %v1032_v31 = vsub.s32 0, %v3744_v6  ;;  %vm1118_vm7 = vcmp.lt.s32.totalorder %v3746_v47, 4  ;;  %v1114_v15 = vor.u32 %v1113_v48, %v1112_v61 }
 0x14a   : > { %v906_v50 = vmul.f32 %v905_v28, %v901_v53  ;;  %v913_v63 = vmul.f32 %v912_v11, %v901_v53  ;;  %vm1117_vm8 = vcmp.lt.s32.totalorder %v3746_v47, 3  ;;  %vm1116_vm9 = vcmp.lt.s32.totalorder %v3746_v47, 2 }
 0x14b   : > { %v1033_v8 = vsel %vm1031_vm4, %v1032_v31, %v3744_v6  ;;  %v1123_v18 = vsel %vm1115_vm6, %v1102_v5, %v1105_v4  ;;  %v1133_v21 = vshrl.u32 %v3735_v38, 16  ;;  %v3774_v41 = vsel %vm930_vm15, %v1052_v58, %v1028_v1 }
 0x14c   : > { %v907_v3 = vadd.f32 1.0, %v906_v50  ;;  %v914_v9 = vadd.f32 1.0, %v913_v63  ;;  %v1034_v57 = vclz %v1033_v8  ;;  %v1099_v36 = vshrl.u32 %v3067_v40, %v1098_v24 }
 0x14d   : > { %v1127_v43 = vsel %vm1115_vm6, %v1105_v4, %v1108_v27  ;;  %v1128_v19 = vsel %vm1118_vm7, %v1114_v15, 1326507024  ;;  %v1055_v45 = vsel %vm3756_vm3, 0, %v3774_v41  ;;  %v1120_v62 = vsel %vm1118_vm7, %v1108_v27, 2102212464 }
 0x14e   : > { %v915_v35 = vmul.f32 %v914_v9, %v899_v23  ;;  %v924_v53 = vxor.u32 2147483648, %v907_v3  ;;  %v2902_v33 = vadd.s32 4294967294, %v1034_v57  ;;  %v1124_v23 = vsel %vm1118_vm7, %v1111_v12, 920167782 }
 0x14f   : > { %v1125_v56 = vsel %vm1117_vm8, %v1108_v27, %v1124_v23  ;;  %v1129_v59 = vsel %vm1117_vm8, %v1111_v12, %v1128_v19  ;;  %v1121_v8 = vsel %vm1117_vm8, %v1105_v4, %v1120_v62  ;;  %vm1071_vm4 = vweird.f32 %v3402_v17 }
 0x150   : > { %v921_v60 = vxor.u32 2147483648, %v915_v35  ;;  %v925_v13 = vsel %vm923_vm0, %v924_v53, %v915_v35  ;;  %vm2903_vm10 = vcmp.lt.s32.totalorder %v2902_v33, 0  ;;  %v1126_v24 = vsel %vm1116_vm9, %v1123_v18, %v1125_v56 }
 0x151   : > { %v1037_v1 = vsel %vm2903_vm10, 0, %v2902_v33  ;;  %v1156_v14 = vand.u32 65535, %v1126_v24  ;;  %v1157_v51 = vshrl.u32 %v1126_v24, 16  ;;  %v1130_v7 = vsel %vm1116_vm9, %v1127_v43, %v1129_v59 }
 0x152   : > { %v922_v20 = vsel %vm920_vm1, %v907_v3, %v921_v60  ;;  %v1038_v37 = vsub.s32 32, %v1037_v1  ;;  %v1042_v44 = vsub.s32 4294967266, %v1037_v1  ;;  %v1039_v28 = vshll.u32 %v3744_v6, %v1037_v1 }
 0x153   : > { %v926_v32 = vsel %vm919_vm2, %v922_v20, %v925_v13  ;;  %v1134_v61 = vand.u32 65535, %v1130_v7  ;;  %v1135_v39 = vshrl.u32 %v1130_v7, 16  ;;  %v1159_v48 = vmul.u32 %v1157_v51, %v1132_v22  ;;  %v227_v20 = vpop.permute.xlu1 %226 }
 0x154   : > { %v927_v26 = vsel %vm916_vm5, nan, %v926_v32  ;;  %v1040_v11 = vshrl.u32 %v3732_v54, %v1038_v37  ;;  %v1043_v29 = vadd.s32 127, %v1042_v44  ;;  %v1158_v31 = vmul.u32 %v1156_v14, %v1132_v22 }
 0x155   : > { %2791 = vst [vmem:[%s3458_s8 + $0x18] sm:$0xff] %v927_v26  ;;  %v1160_v58 = vmul.u32 %v1156_v14, %v1133_v21  ;;  %v1119_v6 = vsel %vm1115_vm6, %v1099_v36, %v1102_v5  ;;  %v1136_v12 = vmul.u32 %v1134_v61, %v1132_v22  ;;  %v1137_v54 = vmul.u32 %v1135_v39, %v1132_v22 }
 0x156   : > { %v1041_v50 = vor.u32 %v1040_v11, %v1039_v28  ;;  %v1044_v63 = vshll.u32 %v1043_v29, 23  ;;  %v1138_v3 = vmul.u32 %v1134_v61, %v1133_v21  ;;  %v1161_v57 = vmul.u32 %v1157_v51, %v1133_v21 }
 0x157   : > { %v1162_v35 = vshll.u32 %v1159_v48, 16  ;;  %v1139_v53 = vmul.u32 %v1135_v39, %v1133_v21  ;;  %v1140_v15 = vshll.u32 %v1137_v54, 16  ;;  %v1163_v60 = vshrl.u32 %v1159_v48, 16 }
 0x158   : > { %v1045_v9 = vor.u32 4788187, %v1044_v63  ;;  %v1048_v27 = vcvt.s32.f32 %v1041_v50  ;;  %v1142_v33 = vshll.u32 %v1138_v3, 16  ;;  %v1164_v23 = vshll.u32 %v1160_v58, 16 }
 0x159   : > { %vm1166_vm13 = vc.u32 %v1158_v31, %v1162_v35  ;;  %vm1144_vm11 = vc.u32 %v1136_v12, %v1140_v15  ;;  %v1146_v13 = vadd.s32 %v1140_v15, %v1136_v12  ;;  %v1168_v22 = vadd.s32 %v1162_v35, %v1158_v31 }
 0x15a   : > { %v1046_v18 = vand.u32 2147483647, %v1045_v9  ;;  %v1167_v5 = vsel %vm1166_vm13, 1, %v3066_v0  ;;  %v1141_v56 = vshrl.u32 %v1137_v54, 16  ;;  %v1145_v43 = vsel %vm1144_vm11, 1, %v3066_v0 }
 0x15b   : > { %v1169_v4 = vadd.s32 %v1167_v5, %v1161_v57  ;;  %v1143_v1 = vshrl.u32 %v1138_v3, 16  ;;  %v1147_v24 = vadd.s32 %v1145_v43, %v1139_v53  ;;  %vm1148_vm12 = vc.u32 %v1146_v13, %v1142_v33 }
 0x15c   : > { %v1049_v36 = vmul.f32 %v1048_v27, %v1046_v18  ;;  %vm1170_vm14 = vc.u32 %v1168_v22, %v1164_v23  ;;  %v1149_v19 = vsel %vm1148_vm12, 1, %v3066_v0  ;;  %v1165_v32 = vshrl.u32 %v1160_v58, 16 }
 0x15d   : > { %v1171_v37 = vsel %vm1170_vm14, 1, %v3066_v0  ;;  %v1151_v44 = vadd.s32 %v1149_v19, %v1147_v24  ;;  %v1238_v59 = vand.u32 2147483647, %v3730_v34  ;;  %v1241_v14 = vand.u32 2139095040, %v3730_v34 }
 0x15e   : > { %v1050_v21 = vxor.u32 2147483648, %v1049_v36  ;;  %v1173_v26 = vadd.s32 %v1171_v37, %v1169_v4  ;;  %v279_v51 = vmul.f32 %v3660_v10, %v227_v20  ;;  %v3820_v11 = vadd.s32 %v1168_v22, %v1164_v23 }
 0x15f   : > { %v1152_v7 = vadd.s32 %v1151_v44, %v1141_v56  ;;  %v1242_v61 = vshrl.u32 %v1241_v14, 23  ;;  %v1072_v48 = vadd.s32 3, %v1055_v45  ;;  %v1122_v50 = vsel %vm1116_vm9, %v1119_v6, %v1121_v8 }
 0x160   : > { %v1051_v28 = vsel %vm930_vm15, %v1050_v21, %v1049_v36  ;;  %v1174_v62 = vadd.s32 %v1173_v26, %v1163_v60  ;;  %v1245_v12 = vand.u32 8388607, %v1238_v59  ;;  %v3834_v9 = vadd.f32 %v3686_v16, %v279_v51 }
 0x161   : > { %v1054_v29 = vsel %vm3756_vm3, %v3402_v17, %v1051_v28  ;;  %v1153_v63 = vadd.s32 %v1152_v7, %v1143_v1  ;;  %v2907_v58 = vadd.s32 4294967169, %v1242_v61  ;;  %v1176_v47 = vmul.u32 %v3735_v38, %v1122_v50 }
 0x162   : > { %v1056_v39 = vmul.f32 %v1054_v29, %v1054_v29  ;;  %v1175_v31 = vadd.s32 %v1174_v62, %v1165_v32  ;;  %v1073_v6 = vand.u32 3, %v1072_v48  ;;  %v1246_v35 = vor.u32 8388608, %v1245_v12 }
 0x163   : > { %vm1178_vm15 = vc.u32 %v1153_v63, %v3820_v11  ;;  %v1248_v57 = vadd.s32 1, %v2907_v58  ;;  %v1396_v60 = vand.u32 2139095040, %v3834_v9  ;;  %vm1085_vm6 = vcmp.lt.s32.totalorder %v3689_v25, 0 }
 0x164   : > { %v1057_v54 = vmul.f32 -0.001358992, %v1056_v39  ;;  %v1064_v3 = vmul.f32 -0.00019511016, %v1056_v39  ;;  %v1179_v2 = vadd.s32 1, %v1175_v31  ;;  %vm1075_vm1 = vcmp.eq.s32.totalorder %v1073_v6, 0 }
 0x165   : > { %vm1249_vm0 = vcmp.gt.s32.totalorder %v1248_v57, 0  ;;  %vm1078_vm2 = vcmp.eq.s32.totalorder %v1073_v6, 2  ;;  %vm1074_vm3 = vcmp.lt.s32.totalorder %v1073_v6, 2  ;;  %v3843_v43 = vshll.u32 %v1246_v35, 8 }
 0x166   : > { %v1058_v41 = vadd.f32 0.041655596, %v1057_v54  ;;  %v1065_v45 = vadd.f32 0.008332121, %v1064_v3  ;;  %v1180_v8 = vsel %vm1178_vm15, %v1179_v2, %v1175_v31  ;;  %v1250_v33 = vsel %vm1249_vm0, %v1248_v57, 0 }
 0x167   : > { %v1181_v15 = vadd.s32 %v1180_v8, %v1176_v47  ;;  %v1252_v18 = vand.u32 31, %v1250_v33  ;;  %v3846_v4 = vshrl.u32 %v1250_v33, 5  ;;  %v1397_v24 = vshrl.u32 %v1396_v60, 23 }
 0x168   : > { %v1059_v27 = vmul.f32 %v1058_v41, %v1056_v39  ;;  %v1066_v53 = vmul.f32 %v1065_v45, %v1056_v39  ;;  %v1177_v3 = vadd.s32 %v3820_v11, %v1153_v63  ;;  %v1288_v33 = vshrl.u32 %v3843_v43, 16 }
 0x169   : > { %v1182_v5 = vadd.s32 536870912, %v1181_v15  ;;  %v3839_v22 = vsub.s32 32, %v1252_v18  ;;  %v1255_v37 = vshll.u32 %v3067_v40, %v1252_v18  ;;  %v1258_v44 = vshll.u32 %v3068_v42, %v1252_v18 }
 0x16a   : > { %v1060_v23 = vadd.f32 -0.4999988, %v1059_v27  ;;  %v1067_v13 = vadd.f32 -0.16666654, %v1066_v53  ;;  %v1264_v14 = vshll.u32 %v3070_v49, %v1252_v18  ;;  %v1261_v61 = vshll.u32 %v3069_v46, %v1252_v18 }
 0x16b   : > { %v3841_v56 = vshrl.u32 %v1182_v5, 30  ;;  %v1256_v20 = vshrl.u32 %v3068_v42, %v3839_v22  ;;  %v1259_v1 = vshrl.u32 %v3069_v46, %v3839_v22  ;;  %v1262_v26 = vshrl.u32 %v3070_v49, %v3839_v22 }
 0x16c   : > { %v1061_v36 = vmul.f32 %v1060_v23, %v1056_v39  ;;  %v1068_v38 = vmul.f32 %v1067_v13, %v1056_v39  ;;  %v1265_v51 = vshrl.u32 %v3071_v52, %v3839_v22  ;;  %v1268_v31 = vshrl.u32 %v3072_v55, %v3839_v22 }
 0x16d   : > { %v1184_v32 = vshll.u32 %v3841_v56, 30  ;;  %v1257_v39 = vor.u32 %v1256_v20, %v1255_v37  ;;  %v1260_v48 = vor.u32 %v1259_v1, %v1258_v44  ;;  %v1267_v54 = vshll.u32 %v3071_v52, %v1252_v18 }
 0x16e   : > { %v1062_v21 = vadd.f32 1.0, %v1061_v36  ;;  %v1069_v19 = vadd.f32 1.0, %v1068_v38  ;;  %v1266_v50 = vor.u32 %v1265_v51, %v1264_v14  ;;  %v1263_v2 = vor.u32 %v1262_v26, %v1261_v61 }
 0x16f   : > { %v1185_v62 = vsub.s32 %v1181_v15, %v1184_v32  ;;  %v2910_v57 = vadd.s32 4294967169, %v1397_v24  ;;  %v1269_v8 = vor.u32 %v1268_v31, %v1267_v54  ;;  %vm1270_vm7 = vcmp.lt.s32.totalorder %v3846_v4, 1 }
 0x170   : > { %v1070_v28 = vmul.f32 %v1069_v19, %v1054_v29  ;;  %v1079_v7 = vxor.u32 2147483648, %v1062_v21  ;;  %v1393_v29 = vand.u32 2147483647, %v3834_v9  ;;  %vm1273_vm8 = vcmp.lt.s32.totalorder %v3846_v4, 4 }
 0x171   : > { %vm1186_vm5 = vcmp.lt.s32.totalorder %v1185_v62, 0  ;;  %v1187_v12 = vsub.s32 0, %v1185_v62  ;;  %v1278_v63 = vsel %vm1270_vm7, %v1257_v39, %v1260_v48  ;;  %v1279_v53 = vsel %vm1273_vm8, %v1266_v50, 920167782 }
 0x172   : > { %v1076_v58 = vxor.u32 2147483648, %v1070_v28  ;;  %v1080_v45 = vsel %vm1078_vm2, %v1079_v7, %v1070_v28  ;;  %v1287_v15 = vand.u32 65535, %v3843_v43  ;;  %vm1272_vm9 = vcmp.lt.s32.totalorder %v3846_v4, 3 }
 0x173   : > { %v1188_v47 = vsel %vm1186_vm5, %v1187_v12, %v1185_v62  ;;  %v1403_v18 = vadd.s32 1, %v2910_v57  ;;  %vm1271_vm10 = vcmp.lt.s32.totalorder %v3846_v4, 2  ;;  %v1280_v17 = vsel %vm1272_vm9, %v1263_v2, %v1279_v53 }
 0x174   : > { %v1077_v41 = vsel %vm1075_vm1, %v1062_v21, %v1076_v58  ;;  %v1189_v27 = vclz %v1188_v47  ;;  %v1282_v60 = vsel %vm1270_vm7, %v1260_v48, %v1263_v2  ;;  %v1283_v23 = vsel %vm1273_vm8, %v1269_v8, 1326507024 }
 0x175   : > { %v1081_v35 = vsel %vm1074_vm3, %v1077_v41, %v1080_v45  ;;  %v1207_v13 = vsub.s32 4, %v3841_v56  ;;  %v1281_v5 = vsel %vm1271_vm10, %v1278_v63, %v1280_v17  ;;  %v1284_v36 = vsel %vm1272_vm9, %v1266_v50, %v1283_v23 }
 0x176   : > { %v1082_v11 = vsel %vm1071_vm4, nan, %v1081_v35  ;;  %v2905_v6 = vadd.s32 4294967294, %v1189_v27  ;;  %v1285_v20 = vsel %vm1271_vm10, %v1282_v60, %v1284_v36  ;;  %v1311_v1 = vand.u32 65535, %v1281_v5 }
 0x177   : > { %2792 = vst [vmem:[%s3458_s8 + $0x20] sm:$0xff] %v1082_v11  ;;  %v1312_v24 = vshrl.u32 %v1281_v5, 16  ;;  %v1254_v32 = vshrl.u32 %v3067_v40, %v3839_v22  ;;  %v1289_v37 = vand.u32 65535, %v1285_v20  ;;  %v1275_v26 = vsel %vm1273_vm8, %v1263_v2, 2102212464 }
 0x178   : > { %vm2906_vm13 = vcmp.lt.s32.totalorder %v2905_v6, 0  ;;  %v1290_v14 = vshrl.u32 %v1285_v20, 16  ;;  %v1315_v50 = vmul.u32 %v1311_v1, %v1288_v33  ;;  %v3903_v31 = vsel %vm1085_vm6, %v1207_v13, %v3841_v56 }
 0x179   : > { %v1192_v38 = vsel %vm2906_vm13, 0, %v2905_v6  ;;  %v1314_v51 = vmul.u32 %v1312_v24, %v1287_v15  ;;  %v1293_v61 = vmul.u32 %v1289_v37, %v1288_v33  ;;  %v1274_v58 = vsel %vm1270_vm7, %v1254_v32, %v1257_v39 }
 0x17a   : > { %v1193_v21 = vsub.s32 32, %v1192_v38  ;;  %v1197_v19 = vsub.s32 4294967266, %v1192_v38  ;;  %v1194_v44 = vshll.u32 %v1185_v62, %v1192_v38  ;;  %v1292_v22 = vmul.u32 %v1290_v14, %v1287_v15 }
 0x17b   : > { %v1317_v12 = vshll.u32 %v1314_v51, 16  ;;  %v1276_v2 = vsel %vm1272_vm9, %v1260_v48, %v1275_v26  ;;  %v1313_v57 = vmul.u32 %v1311_v1, %v1287_v15  ;;  %v1294_v41 = vmul.u32 %v1290_v14, %v1288_v33 }
 0x17c   : > { %v1195_v28 = vshrl.u32 %v1177_v3, %v1193_v21  ;;  %v1198_v7 = vadd.s32 127, %v1197_v19  ;;  %v1291_v3 = vmul.u32 %v1289_v37, %v1287_v15  ;;  %v1295_v45 = vshll.u32 %v1292_v22, 16 }
 0x17d   : > { %v1316_v47 = vmul.u32 %v1312_v24, %v1288_v33  ;;  %v1297_v35 = vshll.u32 %v1293_v61, 16  ;;  %v1319_v27 = vshll.u32 %v1315_v50, 16  ;;  %vm1321_vm11 = vc.u32 %v1313_v57, %v1317_v12 }
 0x17e   : > { %v1196_v62 = vor.u32 %v1195_v28, %v1194_v44  ;;  %v1199_v54 = vshll.u32 %v1198_v7, 23  ;;  %vm1299_vm12 = vc.u32 %v1291_v3, %v1295_v45  ;;  %v1301_v56 = vadd.s32 %v1295_v45, %v1291_v3 }
 0x17f   : > { %v1322_v39 = vsel %vm1321_vm11, 1, %v3066_v0  ;;  %v1323_v11 = vadd.s32 %v1317_v12, %v1313_v57  ;;  %v1300_v6 = vsel %vm1299_vm12, 1, %v3066_v0  ;;  %v1296_v48 = vshrl.u32 %v1292_v22, 16 }
 0x180   : > { %v1200_v8 = vor.u32 4788187, %v1199_v54  ;;  %v1203_v53 = vcvt.s32.f32 %v1196_v62  ;;  %v1324_v17 = vadd.s32 %v1322_v39, %v1316_v47  ;;  %v1302_v60 = vadd.s32 %v1300_v6, %v1294_v41 }
 0x181   : > { %vm1303_vm14 = vc.u32 %v1301_v56, %v1297_v35  ;;  %vm1325_vm15 = vc.u32 %v1323_v11, %v1319_v27  ;;  %vm1404_vm0 = vcmp.gt.s32.totalorder %v1403_v18, 0  ;;  %v1318_v5 = vshrl.u32 %v1314_v51, 16 }
 0x182   : > { %v1201_v63 = vand.u32 2147483647, %v1200_v8  ;;  %v1304_v33 = vsel %vm1303_vm14, 1, %v3066_v0  ;;  %v1326_v23 = vsel %vm1325_vm15, 1, %v3066_v0  ;;  %v1405_v38 = vsel %vm1404_vm0, %v1403_v18, 0 }
 0x183   : > { %v1306_v13 = vadd.s32 %v1304_v33, %v1302_v60  ;;  %v1328_v36 = vadd.s32 %v1326_v23, %v1324_v17  ;;  %vm3915_vm1 = vcmp.le.f32.partialorder %v1083_v30, 0.7853982  ;;  %v1277_v24 = vsel %vm1271_vm10, %v1274_v58, %v1276_v2 }
 0x184   : > { %v1204_v15 = vmul.f32 %v1203_v53, %v1201_v63  ;;  %v1407_v21 = vand.u32 31, %v1405_v38  ;;  %v1298_v19 = vshrl.u32 %v1293_v61, 16  ;;  %v1320_v37 = vshrl.u32 %v1315_v50, 16 }
 0x185   : > { %v1307_v32 = vadd.s32 %v1306_v13, %v1296_v48  ;;  %v1329_v44 = vadd.s32 %v1328_v36, %v1318_v5  ;;  %v1210_v18 = vsel %vm3915_vm1, 0, %v3903_v31  ;;  %v1400_v30 = vand.u32 8388607, %v1393_v29 }
 0x186   : > { %v1205_v1 = vxor.u32 2147483648, %v1204_v15  ;;  %v3928_v14 = vsub.s32 32, %v1407_v21  ;;  %v3935_v28 = vadd.s32 %v1323_v11, %v1319_v27  ;;  %v1331_v50 = vmul.u32 %v3843_v43, %v1277_v24  ;;  %v232_v24 = vpop.permute.xlu2 %231 }
 0x187   : > { %v3933_v51 = vadd.s32 %v1307_v32, %v1298_v19  ;;  %v1330_v7 = vadd.s32 %v1329_v44, %v1320_v37  ;;  %v3938_v58 = vshrl.u32 %v1405_v38, 5  ;;  %v1410_v12 = vshll.u32 %v3067_v40, %v1407_v21 }
 0x188   : > { %v1206_v26 = vsel %vm1085_vm6, %v1205_v1, %v1204_v15  ;;  %v1411_v31 = vshrl.u32 %v3068_v42, %v3928_v14  ;;  %v1414_v62 = vshrl.u32 %v3069_v46, %v3928_v14  ;;  %v1413_v57 = vshll.u32 %v3068_v42, %v1407_v21 }
 0x189   : > { %v1209_v4 = vsel %vm3915_vm1, %v3689_v25, %v1206_v26  ;;  %vm1333_vm2 = vc.u32 %v3933_v51, %v3935_v28  ;;  %v1334_v22 = vadd.s32 1, %v1330_v7  ;;  %v1417_v43 = vshrl.u32 %v3070_v49, %v3928_v14 }
 0x18a   : > { %v1211_v61 = vmul.f32 %v1209_v4, %v1209_v4  ;;  %v1416_v41 = vshll.u32 %v3069_v46, %v1407_v21  ;;  %v1419_v45 = vshll.u32 %v3070_v49, %v1407_v21  ;;  %v1420_v47 = vshrl.u32 %v3071_v52, %v3928_v14 }
 0x18b   : > { %v1335_v3 = vsel %vm1333_vm2, %v1334_v22, %v1330_v7  ;;  %v3954_v56 = vor.u32 %v1411_v31, %v1410_v12  ;;  %v3956_v39 = vor.u32 %v1414_v62, %v1413_v57  ;;  %v1422_v63 = vshll.u32 %v3071_v52, %v1407_v21 }
 0x18c   : > { %v1212_v54 = vmul.f32 -0.001358992, %v1211_v61  ;;  %v1219_v2 = vmul.f32 -0.00019511016, %v1211_v61  ;;  %v1336_v27 = vadd.s32 %v1335_v3, %v1331_v50  ;;  %v1421_v11 = vor.u32 %v1420_v47, %v1419_v45 }
 0x18d   : > { %v1423_v53 = vshrl.u32 %v3072_v55, %v3928_v14  ;;  %v3961_v60 = vor.u32 %v1417_v43, %v1416_v41  ;;  %v1227_v15 = vadd.s32 3, %v1210_v18  ;;  %v1401_v33 = vor.u32 8388608, %v1400_v30 }
 0x18e   : > { %v1213_v8 = vadd.f32 0.041655596, %v1212_v54  ;;  %v1220_v35 = vadd.f32 0.008332121, %v1219_v2  ;;  %v1337_v48 = vadd.s32 536870912, %v1336_v27  ;;  %vm1425_vm3 = vcmp.lt.s32.totalorder %v3938_v58, 1 }
 0x18f   : > { %v1424_v23 = vor.u32 %v1423_v53, %v1422_v63  ;;  %vm1428_vm4 = vcmp.lt.s32.totalorder %v3938_v58, 4  ;;  %vm1427_vm5 = vcmp.lt.s32.totalorder %v3938_v58, 3  ;;  %v1433_v38 = vsel %vm1425_vm3, %v3954_v56, %v3956_v39 }
 0x190   : > { %v1214_v6 = vmul.f32 %v1213_v8, %v1211_v61  ;;  %v1221_v17 = vmul.f32 %v1220_v35, %v1211_v61  ;;  %v3964_v36 = vshrl.u32 %v1337_v48, 30  ;;  %v1434_v20 = vsel %vm1428_vm4, %v1421_v11, 920167782 }
 0x191   : > { %v1438_v1 = vsel %vm1428_vm4, %v1424_v23, 1326507024  ;;  %v1437_v37 = vsel %vm1425_vm3, %v3956_v39, %v3961_v60  ;;  %v1228_v44 = vand.u32 3, %v1227_v15  ;;  %v1435_v26 = vsel %vm1427_vm5, %v3961_v60, %v1434_v20 }
 0x192   : > { %v1215_v13 = vadd.f32 -0.4999988, %v1214_v6  ;;  %v1222_v5 = vadd.f32 -0.16666654, %v1221_v17  ;;  %v1339_v32 = vshll.u32 %v3964_v36, 30  ;;  %v1439_v18 = vsel %vm1427_vm5, %v1421_v11, %v1438_v1 }
 0x193   : > { %v3986_v30 = vshll.u32 %v1401_v33, 8  ;;  %vm1426_vm6 = vcmp.lt.s32.totalorder %v3938_v58, 2  ;;  %v280_v31 = vmul.f32 %v3660_v10, %v232_v24  ;;  %vm1229_vm8 = vcmp.lt.s32.totalorder %v1228_v44, 2 }
 0x194   : > { %v1216_v21 = vmul.f32 %v1215_v13, %v1211_v61  ;;  %v1223_v19 = vmul.f32 %v1222_v5, %v1211_v61  ;;  %v1340_v61 = vsub.s32 %v1336_v27, %v1339_v32  ;;  %v1436_v22 = vsel %vm1426_vm6, %v1433_v38, %v1435_v26 }
 0x195   : > { %v1440_v12 = vsel %vm1426_vm6, %v1437_v37, %v1439_v18  ;;  %v1442_v57 = vand.u32 65535, %v3986_v30  ;;  %vm1230_vm9 = vcmp.eq.s32.totalorder %v1228_v44, 0  ;;  %v1443_v10 = vshrl.u32 %v3986_v30, 16 }
 0x196   : > { %v1217_v7 = vadd.f32 1.0, %v1216_v21  ;;  %v1224_v50 = vadd.f32 1.0, %v1223_v19  ;;  %vm1341_vm7 = vcmp.lt.s32.totalorder %v1340_v61, 0  ;;  %v1342_v2 = vsub.s32 0, %v1340_v61 }
 0x197   : > { %v1444_v43 = vand.u32 65535, %v1440_v12  ;;  %v1445_v3 = vshrl.u32 %v1440_v12, 16  ;;  %vm1233_vm10 = vcmp.eq.s32.totalorder %v1228_v44, 2  ;;  %v1467_v35 = vshrl.u32 %v1436_v22, 16 }
 0x198   : > { %v1225_v62 = vmul.f32 %v1224_v50, %v1209_v4  ;;  %v1234_v54 = vxor.u32 2147483648, %v1217_v7  ;;  %v1343_v45 = vsel %vm1341_vm7, %v1342_v2, %v1340_v61  ;;  %v1466_v63 = vand.u32 65535, %v1436_v22 }
 0x199   : > { %v1344_v47 = vclz %v1343_v45  ;;  %v1447_v8 = vmul.u32 %v1445_v3, %v1442_v57  ;;  %v1448_v11 = vmul.u32 %v1444_v43, %v1443_v10  ;;  %v3997_v53 = vadd.f32 %v3686_v16, %v280_v31 }
 0x19a   : > { %v1231_v41 = vxor.u32 2147483648, %v1225_v62  ;;  %v1235_v4 = vsel %vm1233_vm10, %v1234_v54, %v1225_v62  ;;  %vm1226_vm13 = vweird.f32 %v3689_v25  ;;  %v1332_v15 = vadd.s32 %v3935_v28, %v3933_v51 }
 0x19b   : > { %v2908_v17 = vadd.s32 4294967294, %v1344_v47  ;;  %v1446_v33 = vmul.u32 %v1444_v43, %v1442_v57  ;;  %v1450_v23 = vshll.u32 %v1447_v8, 16  ;;  %v1449_v13 = vmul.u32 %v1445_v3, %v1443_v10 }
 0x19c   : > { %v1232_v27 = vsel %vm1230_vm9, %v1217_v7, %v1231_v41  ;;  %v1452_v5 = vshll.u32 %v1448_v11, 16  ;;  %v1469_v38 = vmul.u32 %v1467_v35, %v1442_v57  ;;  %v1470_v1 = vmul.u32 %v1466_v63, %v1443_v10 }
 0x19d   : > { %v1236_v6 = vsel %vm1229_vm8, %v1232_v27, %v1235_v4  ;;  %vm2909_vm11 = vcmp.lt.s32.totalorder %v2908_v17, 0  ;;  %vm1454_vm12 = vc.u32 %v1446_v33, %v1450_v23  ;;  %v1456_v16 = vadd.s32 %v1450_v23, %v1446_v33 }
 0x19e   : > { %v1237_v48 = vsel %vm1226_vm13, nan, %v1236_v6  ;;  %v1347_v20 = vsel %vm2909_vm11, 0, %v2908_v17  ;;  %v1455_v21 = vsel %vm1454_vm12, 1, %v3066_v0  ;;  %v1468_v19 = vmul.u32 %v1466_v63, %v1442_v57 }
 0x19f   : > { %2793 = vst [vmem:[%s3458_s8 + $0x28] sm:$0xff] %v1237_v48  ;;  %v1348_v24 = vsub.s32 32, %v1347_v20  ;;  %v1352_v25 = vsub.s32 4294967266, %v1347_v20  ;;  %v1451_v32 = vshrl.u32 %v1447_v8, 16  ;;  %v1457_v37 = vadd.s32 %v1455_v21, %v1449_v13 }
 0x1a0   : > { %vm1458_vm14 = vc.u32 %v1456_v16, %v1452_v5  ;;  %v1472_v51 = vshll.u32 %v1469_v38, 16  ;;  %v1349_v28 = vshll.u32 %v1340_v61, %v1347_v20  ;;  %v1471_v50 = vmul.u32 %v1467_v35, %v1443_v10 }
 0x1a1   : > { %v1350_v44 = vshrl.u32 %v1332_v15, %v1348_v24  ;;  %v1353_v26 = vadd.s32 127, %v1352_v25  ;;  %v1459_v18 = vsel %vm1458_vm14, 1, %v3066_v0  ;;  %v1474_v31 = vshll.u32 %v1470_v1, 16  ;;  %v4047_v25 = vld [vmem:[%s4966_s1] ss:$0 sm:$0xff] }
 0x1a2   : > { %v1461_v7 = vadd.s32 %v1459_v18, %v1457_v37  ;;  %vm1476_vm15 = vc.u32 %v1468_v19, %v1472_v51  ;;  %v1478_v54 = vadd.s32 %v1472_v51, %v1468_v19  ;;  %v1409_v3 = vshrl.u32 %v3067_v40, %v3928_v14  ;;  %v242_v51 = vpop.permute.xlu1 %241 }
 0x1a3   : > { %v1351_v22 = vor.u32 %v1350_v44, %v1349_v28  ;;  %v1354_v12 = vshll.u32 %v1353_v26, 23  ;;  %v1477_v62 = vsel %vm1476_vm15, 1, %v3066_v0  ;;  %v1430_v61 = vsel %vm1428_vm4, %v3961_v60, 2102212464 }
 0x1a4   : > { %v1462_v2 = vadd.s32 %v1461_v7, %v1451_v32  ;;  %v1479_v57 = vadd.s32 %v1477_v62, %v1471_v50  ;;  %vm1480_vm0 = vc.u32 %v1478_v54, %v1474_v31  ;;  %v1362_v41 = vsub.s32 4, %v3964_v36 }
 0x1a5   : > { %v1355_v43 = vor.u32 4788187, %v1354_v12  ;;  %v1453_v45 = vshrl.u32 %v1448_v11, 16  ;;  %v1481_v10 = vsel %vm1480_vm0, 1, %v3066_v0  ;;  %v1551_v47 = vand.u32 2139095040, %v3997_v53 }
 0x1a6   : > { %v1358_v35 = vcvt.s32.f32 %v1351_v22  ;;  %v1473_v27 = vshrl.u32 %v1469_v38, 16  ;;  %v1483_v4 = vadd.s32 %v1481_v10, %v1479_v57  ;;  %v1429_v14 = vsel %vm1425_vm3, %v1409_v3, %v3954_v56  ;;  %v237_v38 = vpop.permute.xlu0 %236  ;;  %v4060_v12 = vld [vmem:[%s4967_s2] ss:$0 sm:$0xff] }
 0x1a7   : > { %v1356_v8 = vand.u32 2147483647, %v1355_v43  ;;  %v1431_v60 = vsel %vm1427_vm5, %v3956_v39, %v1430_v61  ;;  %v4021_v63 = vadd.s32 %v1462_v2, %v1453_v45  ;;  %v1552_v6 = vshrl.u32 %v1551_v47, 23 }
 0x1a8   : > { %vm1240_vm1 = vcmp.lt.s32.totalorder %v3730_v34, 0  ;;  %v1475_v17 = vshrl.u32 %v1470_v1, 16  ;;  %v1484_v48 = vadd.s32 %v1483_v4, %v1473_v27  ;;  %v4025_v33 = vadd.s32 %v1478_v54, %v1474_v31 }
 0x1a9   : > { %v1359_v11 = vmul.f32 %v1358_v35, %v1356_v8  ;;  %v1363_v15 = vsel %vm1240_vm1, %v1362_v41, %v3964_v36  ;;  %v2913_v23 = vadd.s32 4294967169, %v1552_v6  ;;  %v1432_v56 = vsel %vm1426_vm6, %v1429_v14, %v1431_v60 }
 0x1aa   : > { %v1485_v5 = vadd.s32 %v1484_v48, %v1475_v17  ;;  %vm4031_vm2 = vcmp.le.f32.partialorder %v1238_v59, 0.7853982  ;;  %vm1488_vm3 = vc.u32 %v4021_v63, %v4025_v33  ;;  %v1548_v36 = vand.u32 2147483647, %v3997_v53 }
 0x1ab   : > { %v1360_v13 = vxor.u32 2147483648, %v1359_v11  ;;  %v1558_v20 = vadd.s32 1, %v2913_v23  ;;  %v1365_v1 = vsel %vm4031_vm2, 0, %v1363_v15  ;;  %v1486_v59 = vmul.u32 %v3986_v30, %v1432_v56 }
 0x1ac   : > { %v1489_v58 = vadd.s32 1, %v1485_v5  ;;  %v281_v21 = vmul.f32 %v4047_v25, %v237_v38  ;;  %v1382_v28 = vadd.s32 3, %v1365_v1  ;;  %v1555_v26 = vand.u32 8388607, %v1548_v36 }
 0x1ad   : > { %v1361_v16 = vsel %vm1240_vm1, %v1360_v13, %v1359_v11  ;;  %vm1559_vm4 = vcmp.gt.s32.totalorder %v1558_v20, 0  ;;  %v4055_v22 = vmul.f32 %v4047_v25, %v242_v51  ;;  %vm1381_vm8 = vweird.f32 %v3730_v34 }
 0x1ae   : > { %v1364_v24 = vsel %vm4031_vm2, %v3730_v34, %v1361_v16  ;;  %v1490_v32 = vsel %vm1488_vm3, %v1489_v58, %v1485_v5  ;;  %v1560_v37 = vsel %vm1559_vm4, %v1558_v20, 0  ;;  %v4063_v62 = vadd.f32 %v4060_v12, %v281_v21 }
 0x1af   : > { %v1366_v19 = vmul.f32 %v1364_v24, %v1364_v24  ;;  %v1491_v44 = vadd.s32 %v1490_v32, %v1486_v59  ;;  %v1562_v18 = vand.u32 31, %v1560_v37  ;;  %v1383_v57 = vand.u32 3, %v1382_v28 }
 0x1b0   : > { %v1556_v3 = vor.u32 8388608, %v1555_v26  ;;  %v4067_v61 = vshrl.u32 %v1560_v37, 5  ;;  %vm1395_vm13 = vcmp.lt.s32.totalorder %v3834_v9, 0  ;;  %vm4138_vm0 = vcmp.le.f32.partialorder %v1393_v29, 0.7853982 }
 0x1b1   : > { %v1367_v7 = vmul.f32 -0.001358992, %v1366_v19  ;;  %v1374_v30 = vmul.f32 -0.00019511016, %v1366_v19  ;;  %v1492_v50 = vadd.s32 536870912, %v1491_v44  ;;  %v4052_v31 = vsub.s32 32, %v1562_v18 }
 0x1b2   : > { %v1565_v10 = vshll.u32 %v3067_v40, %v1562_v18  ;;  %v1568_v47 = vshll.u32 %v3068_v42, %v1562_v18  ;;  %v1571_v27 = vshll.u32 %v3069_v46, %v1562_v18  ;;  %v1574_v4 = vshll.u32 %v3070_v49, %v1562_v18 }
 0x1b3   : > { %v1368_v54 = vadd.f32 0.041655596, %v1367_v7  ;;  %v1375_v2 = vadd.f32 0.008332121, %v1374_v30  ;;  %v4065_v43 = vshrl.u32 %v1492_v50, 30  ;;  %v1566_v35 = vshrl.u32 %v3068_v42, %v4052_v31 }
 0x1b4   : > { %v1569_v6 = vshrl.u32 %v3069_v46, %v4052_v31  ;;  %v1572_v11 = vshrl.u32 %v3070_v49, %v4052_v31  ;;  %v1575_v48 = vshrl.u32 %v3071_v52, %v4052_v31  ;;  %v1577_v15 = vshll.u32 %v3071_v52, %v1562_v18 }
 0x1b5   : > { %v1369_v41 = vmul.f32 %v1368_v54, %v1366_v19  ;;  %v1376_v45 = vmul.f32 %v1375_v2, %v1366_v19  ;;  %v1494_v8 = vshll.u32 %v4065_v43, 30  ;;  %v1578_v23 = vshrl.u32 %v3072_v55, %v4052_v31 }
 0x1b6   : > { %vm1384_vm5 = vcmp.lt.s32.totalorder %v1383_v57, 2  ;;  %vm1385_vm6 = vcmp.eq.s32.totalorder %v1383_v57, 0  ;;  %vm1388_vm7 = vcmp.eq.s32.totalorder %v1383_v57, 2  ;;  %v4090_v38 = vor.u32 %v1566_v35, %v1565_v10 }
 0x1b7   : > { %v1370_v14 = vadd.f32 -0.4999988, %v1369_v41  ;;  %v1377_v60 = vadd.f32 -0.16666654, %v1376_v45  ;;  %v4080_v17 = vsub.s32 %v1491_v44, %v1494_v8  ;;  %v4092_v39 = vshll.u32 %v1556_v3, 8 }
 0x1b8   : > { %v4094_v1 = vor.u32 %v1569_v6, %v1568_v47  ;;  %v4096_v58 = vor.u32 %v1572_v11, %v1571_v27  ;;  %v1576_v21 = vor.u32 %v1575_v48, %v1574_v4  ;;  %vm1580_vm10 = vcmp.lt.s32.totalorder %v4067_v61, 1 }
 0x1b9   : > { %v1371_v13 = vmul.f32 %v1370_v14, %v1366_v19  ;;  %v1378_v56 = vmul.f32 %v1377_v60, %v1366_v19  ;;  %vm1496_vm9 = vcmp.lt.s32.totalorder %v4080_v17, 0  ;;  %v1497_v5 = vsub.s32 0, %v4080_v17 }
 0x1ba   : > { %v1579_v19 = vor.u32 %v1578_v23, %v1577_v15  ;;  %vm1583_vm11 = vcmp.lt.s32.totalorder %v4067_v61, 4  ;;  %v1517_v28 = vsub.s32 4, %v4065_v43  ;;  %vm1582_vm12 = vcmp.lt.s32.totalorder %v4067_v61, 3 }
 0x1bb   : > { %v1372_v20 = vadd.f32 1.0, %v1371_v13  ;;  %v1379_v16 = vadd.f32 1.0, %v1378_v56  ;;  %v1498_v59 = vsel %vm1496_vm9, %v1497_v5, %v4080_v17  ;;  %v1597_v44 = vand.u32 65535, %v4092_v39 }
 0x1bc   : > { %v1499_v51 = vclz %v1498_v59  ;;  %v1598_v26 = vshrl.u32 %v4092_v39, 16  ;;  %vm1581_vm14 = vcmp.lt.s32.totalorder %v4067_v61, 2  ;;  %v1589_v50 = vsel %vm1583_vm11, %v1576_v21, 920167782 }
 0x1bd   : > { %v1380_v32 = vmul.f32 %v1379_v16, %v1364_v24  ;;  %v1389_v37 = vxor.u32 2147483648, %v1372_v20  ;;  %v1588_v24 = vsel %vm1580_vm10, %v4090_v38, %v4094_v1  ;;  %v1592_v54 = vsel %vm1580_vm10, %v4094_v1, %v4096_v58 }
 0x1be   : > { %v2911_v30 = vadd.s32 4294967294, %v1499_v51  ;;  %v1593_v2 = vsel %vm1583_vm11, %v1579_v19, 1326507024  ;;  %v1590_v41 = vsel %vm1582_vm12, %v4096_v58, %v1589_v50  ;;  %v1487_v4 = vadd.s32 %v4025_v33, %v4021_v63 }
 0x1bf   : > { %v1386_v18 = vxor.u32 2147483648, %v1380_v32  ;;  %v1390_v7 = vsel %vm1388_vm7, %v1389_v37, %v1380_v32  ;;  %v1594_v45 = vsel %vm1582_vm12, %v1576_v21, %v1593_v2  ;;  %v1591_v8 = vsel %vm1581_vm14, %v1588_v24, %v1590_v41 }
 0x1c0   : > { %vm2912_vm15 = vcmp.lt.s32.totalorder %v2911_v30, 0  ;;  %v1595_v35 = vsel %vm1581_vm14, %v1592_v54, %v1594_v45  ;;  %v1621_v48 = vand.u32 65535, %v1591_v8  ;;  %v1622_v57 = vshrl.u32 %v1591_v8, 16 }
 0x1c1   : > { %v1387_v3 = vsel %vm1385_vm6, %v1372_v20, %v1386_v18  ;;  %v1502_v47 = vsel %vm2912_vm15, 0, %v2911_v30  ;;  %v1599_v6 = vand.u32 65535, %v1595_v35  ;;  %v1600_v11 = vshrl.u32 %v1595_v35, 16 }
 0x1c2   : > { %v1391_v10 = vsel %vm1384_vm5, %v1387_v3, %v1390_v7  ;;  %v1503_v14 = vsub.s32 32, %v1502_v47  ;;  %v1507_v60 = vsub.s32 4294967266, %v1502_v47  ;;  %v1504_v23 = vshll.u32 %v4080_v17, %v1502_v47 }
 0x1c3   : > { %v1392_v27 = vsel %vm1381_vm8, nan, %v1391_v10  ;;  %v1518_v63 = vsel %vm1395_vm13, %v1517_v28, %v4065_v43  ;;  %v1601_v33 = vmul.u32 %v1599_v6, %v1597_v44  ;;  %v1602_v56 = vmul.u32 %v1600_v11, %v1597_v44 }
 0x1c4   : > { %2794 = vst [vmem:[%s3458_s8 + $0x30] sm:$0xff] %v1392_v27  ;;  %v1505_v34 = vshrl.u32 %v1487_v4, %v1503_v14  ;;  %v1508_v13 = vadd.s32 127, %v1507_v60  ;;  %v1603_v5 = vmul.u32 %v1599_v6, %v1598_v26  ;;  %v1564_v59 = vshrl.u32 %v3067_v40, %v4052_v31 }
 0x1c5   : > { %v1624_v29 = vmul.u32 %v1622_v57, %v1597_v44  ;;  %v1604_v21 = vmul.u32 %v1600_v11, %v1598_v26  ;;  %v1605_v19 = vshll.u32 %v1602_v56, 16  ;;  %v1623_v37 = vmul.u32 %v1621_v48, %v1597_v44 }
 0x1c6   : > { %v1506_v20 = vor.u32 %v1505_v34, %v1504_v23  ;;  %v1509_v16 = vshll.u32 %v1508_v13, 23  ;;  %v1607_v32 = vshll.u32 %v1603_v5, 16  ;;  %v1520_v51 = vsel %vm4138_vm0, 0, %v1518_v63 }
 0x1c7   : > { %v1625_v18 = vmul.u32 %v1621_v48, %v1598_v26  ;;  %v1703_v43 = vand.u32 2147483647, %v4063_v62  ;;  %vm1609_vm1 = vc.u32 %v1601_v33, %v1605_v19  ;;  %v1611_v28 = vadd.s32 %v1605_v19, %v1601_v33 }
 0x1c8   : > { %v1510_v17 = vor.u32 4788187, %v1509_v16  ;;  %v1626_v7 = vmul.u32 %v1622_v57, %v1598_v26  ;;  %v1627_v30 = vshll.u32 %v1624_v29, 16  ;;  %v1513_v50 = vcvt.s32.f32 %v1506_v20 }
 0x1c9   : > { %v1610_v31 = vsel %vm1609_vm1, 1, %v3066_v0  ;;  %v1629_v54 = vshll.u32 %v1625_v18, 16  ;;  %vm1613_vm2 = vc.u32 %v1611_v28, %v1607_v32  ;;  %v1585_v41 = vsel %vm1583_vm11, %v4096_v58, 2102212464 }
 0x1ca   : > { %v1511_v24 = vand.u32 2147483647, %v1510_v17  ;;  %v1612_v2 = vadd.s32 %v1610_v31, %v1604_v21  ;;  %vm1631_vm3 = vc.u32 %v1623_v37, %v1627_v30  ;;  %v1633_v44 = vadd.s32 %v1627_v30, %v1623_v37 }
 0x1cb   : > { %v1614_v45 = vsel %vm1613_vm2, 1, %v3066_v0  ;;  %v1632_v10 = vsel %vm1631_vm3, 1, %v3066_v0  ;;  %v1606_v26 = vshrl.u32 %v1602_v56, 16  ;;  %v1608_v27 = vshrl.u32 %v1603_v5, 16 }
 0x1cc   : > { %v1514_v3 = vmul.f32 %v1513_v50, %v1511_v24  ;;  %v1616_v47 = vadd.s32 %v1614_v45, %v1612_v2  ;;  %v1634_v8 = vadd.s32 %v1632_v10, %v1626_v7  ;;  %vm1635_vm4 = vc.u32 %v1633_v44, %v1629_v54 }
 0x1cd   : > { %v1636_v4 = vsel %vm1635_vm4, 1, %v3066_v0  ;;  %v1706_v14 = vand.u32 2139095040, %v4063_v62  ;;  %v1628_v6 = vshrl.u32 %v1624_v29, 16  ;;  %v1710_v58 = vand.u32 8388607, %v1703_v43 }
 0x1ce   : > { %v1515_v35 = vxor.u32 2147483648, %v1514_v3  ;;  %v1617_v60 = vadd.s32 %v1616_v47, %v1606_v26  ;;  %v1638_v11 = vadd.s32 %v1636_v4, %v1634_v8  ;;  %v1584_v57 = vsel %vm1580_vm10, %v1564_v59, %v4090_v38 }
 0x1cf   : > { %v1586_v23 = vsel %vm1582_vm12, %v4094_v1, %v1585_v41  ;;  %v1707_v34 = vshrl.u32 %v1706_v14, 23  ;;  %v1630_v33 = vshrl.u32 %v1625_v18, 16  ;;  %v4174_v5 = vadd.f32 %v4060_v12, %v4055_v22 }
 0x1d0   : > { %v1516_v48 = vsel %vm1395_vm13, %v1515_v35, %v1514_v3  ;;  %v1618_v63 = vadd.s32 %v1617_v60, %v1608_v27  ;;  %v1639_v56 = vadd.s32 %v1638_v11, %v1628_v6  ;;  %v1637_v16 = vadd.s32 %v1633_v44, %v1629_v54 }
 0x1d1   : > { %v1519_v13 = vsel %vm4138_vm0, %v3834_v9, %v1516_v48  ;;  %v2916_v29 = vadd.s32 4294967169, %v1707_v34  ;;  %v1537_v38 = vadd.s32 3, %v1520_v51  ;;  %v1587_v59 = vsel %vm1581_vm14, %v1584_v57, %v1586_v23 }
 0x1d2   : > { %v1521_v20 = vmul.f32 %v1519_v13, %v1519_v13  ;;  %v1640_v1 = vadd.s32 %v1639_v56, %v1630_v33  ;;  %v1711_v21 = vor.u32 8388608, %v1710_v58  ;;  %vm1643_vm5 = vc.u32 %v1618_v63, %v1637_v16 }
 0x1d3   : > { %v1713_v15 = vadd.s32 1, %v2916_v29  ;;  %v1641_v28 = vmul.u32 %v4092_v39, %v1587_v59  ;;  %v1538_v22 = vand.u32 3, %v1537_v38  ;;  %v1861_v51 = vand.u32 2139095040, %v4174_v5 }
 0x1d4   : > { %v1522_v19 = vmul.f32 -0.001358992, %v1521_v20  ;;  %v1529_v32 = vmul.f32 -0.00019511016, %v1521_v20  ;;  %v1644_v37 = vadd.s32 1, %v1640_v1  ;;  %v4180_v31 = vshll.u32 %v1711_v21, 8 }
 0x1d5   : > { %vm1714_vm6 = vcmp.gt.s32.totalorder %v1713_v15, 0  ;;  %vm1540_vm7 = vcmp.eq.s32.totalorder %v1538_v22, 0  ;;  %vm1543_vm8 = vcmp.eq.s32.totalorder %v1538_v22, 2  ;;  %v4182_v41 = vadd.s32 %v1637_v16, %v1618_v63 }
 0x1d6   : > { %v1523_v17 = vadd.f32 0.041655596, %v1522_v19  ;;  %v1530_v18 = vadd.f32 0.008332121, %v1529_v32  ;;  %v1645_v7 = vsel %vm1643_vm5, %v1644_v37, %v1640_v1  ;;  %v1715_v30 = vsel %vm1714_vm6, %v1713_v15, 0 }
 0x1d7   : > { %v1646_v50 = vadd.s32 %v1645_v7, %v1641_v28  ;;  %v1717_v54 = vand.u32 31, %v1715_v30  ;;  %v1858_v45 = vand.u32 2147483647, %v4174_v5  ;;  %v1862_v10 = vshrl.u32 %v1861_v51, 23 }
 0x1d8   : > { %v1524_v24 = vmul.f32 %v1523_v17, %v1521_v20  ;;  %v1531_v61 = vmul.f32 %v1530_v18, %v1521_v20  ;;  %vm1539_vm9 = vcmp.lt.s32.totalorder %v1538_v22, 2  ;;  %v4186_v35 = vand.u32 65535, %v4180_v31 }
 0x1d9   : > { %v1647_v3 = vadd.s32 536870912, %v1646_v50  ;;  %v1718_v39 = vsub.s32 32, %v1717_v54  ;;  %vm1536_vm10 = vweird.f32 %v3834_v9  ;;  %v4189_v27 = vshrl.u32 %v1715_v30, 5 }
 0x1da   : > { %v1525_v2 = vadd.f32 -0.4999988, %v1524_v24  ;;  %v1532_v44 = vadd.f32 -0.16666654, %v1531_v61  ;;  %v4194_v60 = vshrl.u32 %v4180_v31, 16  ;;  %vm1550_vm13 = vcmp.lt.s32.totalorder %v3997_v53, 0 }
 0x1db   : > { %v1648_v8 = vshrl.u32 %v1647_v3, 30  ;;  %v1721_v4 = vshrl.u32 %v3068_v42, %v1718_v39  ;;  %v1724_v14 = vshrl.u32 %v3069_v46, %v1718_v39  ;;  %v1720_v48 = vshll.u32 %v3067_v40, %v1717_v54 }
 0x1dc   : > { %v1526_v26 = vmul.f32 %v1525_v2, %v1521_v20  ;;  %v1533_v47 = vmul.f32 %v1532_v44, %v1521_v20  ;;  %v1723_v57 = vshll.u32 %v3068_v42, %v1717_v54  ;;  %v1727_v23 = vshrl.u32 %v3070_v49, %v1718_v39 }
 0x1dd   : > { %v1649_v58 = vshll.u32 %v1648_v8, 30  ;;  %v1729_v34 = vshll.u32 %v3070_v49, %v1717_v54  ;;  %v1730_v63 = vshrl.u32 %v3071_v52, %v1718_v39  ;;  %v1726_v16 = vshll.u32 %v3069_v46, %v1717_v54 }
 0x1de   : > { %v1527_v6 = vadd.f32 1.0, %v1526_v26  ;;  %v1534_v11 = vadd.f32 1.0, %v1533_v47  ;;  %v1722_v29 = vor.u32 %v1721_v4, %v1720_v48  ;;  %v1725_v38 = vor.u32 %v1724_v14, %v1723_v57 }
 0x1df   : > { %v1650_v20 = vsub.s32 %v1646_v50, %v1649_v58  ;;  %v1731_v59 = vor.u32 %v1730_v63, %v1729_v34  ;;  %v1733_v1 = vshrl.u32 %v3072_v55, %v1718_v39  ;;  %v1732_v32 = vshll.u32 %v3071_v52, %v1717_v54 }
 0x1e0   : > { %v1535_v33 = vmul.f32 %v1534_v11, %v1519_v13  ;;  %v1544_v56 = vxor.u32 2147483648, %v1527_v6  ;;  %v1672_v15 = vsub.s32 4, %v1648_v8  ;;  %v1728_v37 = vor.u32 %v1727_v23, %v1726_v16 }
 0x1e1   : > { %vm1651_vm11 = vcmp.lt.s32.totalorder %v1650_v20, 0  ;;  %v1652_v19 = vsub.s32 0, %v1650_v20  ;;  %v2919_v17 = vadd.s32 4294967169, %v1862_v10  ;;  %v4207_v13 = vand.u32 8388607, %v1858_v45 }
 0x1e2   : > { %v1541_v21 = vxor.u32 2147483648, %v1535_v33  ;;  %v1545_v28 = vsel %vm1543_vm8, %v1544_v56, %v1535_v33  ;;  %v1734_v30 = vor.u32 %v1733_v1, %v1732_v32  ;;  %vm4214_vm12 = vcmp.le.f32.partialorder %v1548_v36, 0.7853982 }
 0x1e3   : > { %v1653_v7 = vsel %vm1651_vm11, %v1652_v19, %v1650_v20  ;;  %vm1735_vm14 = vcmp.lt.s32.totalorder %v4189_v27, 1  ;;  %vm1738_vm15 = vcmp.lt.s32.totalorder %v4189_v27, 4  ;;  %v1719_v54 = vshrl.u32 %v3067_v40, %v1718_v39 }
 0x1e4   : > { %v1542_v18 = vsel %vm1540_vm7, %v1527_v6, %v1541_v21  ;;  %v1654_v61 = vclz %v1653_v7  ;;  %v1743_v22 = vsel %vm1735_vm14, %v1722_v29, %v1725_v38  ;;  %v1744_v2 = vsel %vm1738_vm15, %v1731_v59, 920167782 }
 0x1e5   : > { %v1546_v51 = vsel %vm1539_vm9, %v1542_v18, %v1545_v28  ;;  %v4227_v36 = vsel %vm1550_vm13, %v1672_v15, %v1648_v8  ;;  %vm1736_vm0 = vcmp.lt.s32.totalorder %v4189_v27, 2  ;;  %vm1737_vm1 = vcmp.lt.s32.totalorder %v4189_v27, 3 }
 0x1e6   : > { %v1547_v50 = vsel %vm1536_vm10, nan, %v1546_v51  ;;  %v2914_v44 = vadd.s32 4294967294, %v1654_v61  ;;  %v1740_v3 = vsel %vm1738_vm15, %v1728_v37, 2102212464  ;;  %v1745_v9 = vsel %vm1737_vm1, %v1728_v37, %v1744_v2 }
 0x1e7   : > { %2795 = vst [vmem:[%s3458_s8 + $0x38] sm:$0xff] %v1547_v50  ;;  %v1747_v39 = vsel %vm1735_vm14, %v1725_v38, %v1728_v37  ;;  %v1748_v10 = vsel %vm1738_vm15, %v1734_v30, 1326507024  ;;  %v1739_v26 = vsel %vm1735_vm14, %v1719_v54, %v1722_v29  ;;  %v1746_v47 = vsel %vm1736_vm0, %v1743_v22, %v1745_v9 }
 0x1e8   : > { %vm2915_vm2 = vcmp.lt.s32.totalorder %v2914_v44, 0  ;;  %v1749_v8 = vsel %vm1737_vm1, %v1731_v59, %v1748_v10  ;;  %v1776_v6 = vand.u32 65535, %v1746_v47  ;;  %v1777_v11 = vshrl.u32 %v1746_v47, 16 }
 0x1e9   : > { %v1657_v4 = vsel %vm2915_vm2, 0, %v2914_v44  ;;  %v1750_v14 = vsel %vm1736_vm0, %v1747_v39, %v1749_v8  ;;  %v1741_v57 = vsel %vm1737_vm1, %v1725_v38, %v1740_v3  ;;  %v1868_v56 = vadd.s32 1, %v2919_v17 }
 0x1ea   : > { %v1658_v58 = vsub.s32 32, %v1657_v4  ;;  %v1662_v48 = vsub.s32 4294967266, %v1657_v4  ;;  %v1754_v23 = vand.u32 65535, %v1750_v14  ;;  %v1659_v34 = vshll.u32 %v1650_v20, %v1657_v4 }
 0x1eb   : > { %v1755_v63 = vshrl.u32 %v1750_v14, 16  ;;  %v1779_v33 = vmul.u32 %v1777_v11, %v4186_v35  ;;  %v1780_v1 = vmul.u32 %v1776_v6, %v4194_v60  ;;  %v1675_v21 = vsel %vm4214_vm12, 0, %v4227_v36 }
 0x1ec   : > { %v1660_v16 = vshrl.u32 %v4182_v41, %v1658_v58  ;;  %v1663_v29 = vadd.s32 127, %v1662_v48  ;;  %v1758_v59 = vmul.u32 %v1754_v23, %v4194_v60  ;;  %v4255_v38 = vsel %vm1736_vm0, %v1739_v26, %v1741_v57 }
 0x1ed   : > { %v1757_v20 = vmul.u32 %v1755_v63, %v4186_v35  ;;  %v1782_v19 = vshll.u32 %v1779_v33, 16  ;;  %v1756_v41 = vmul.u32 %v1754_v23, %v4186_v35  ;;  %v1778_v37 = vmul.u32 %v1776_v6, %v4186_v35 }
 0x1ee   : > { %v1661_v32 = vor.u32 %v1660_v16, %v1659_v34  ;;  %v1664_v15 = vshll.u32 %v1663_v29, 23  ;;  %v1759_v17 = vmul.u32 %v1755_v63, %v4194_v60  ;;  %v1762_v28 = vshll.u32 %v1758_v59, 16 }
 0x1ef   : > { %v1760_v18 = vshll.u32 %v1757_v20, 16  ;;  %v1781_v7 = vmul.u32 %v1777_v11, %v4194_v60  ;;  %v1784_v27 = vshll.u32 %v1780_v1, 16  ;;  %vm1786_vm3 = vc.u32 %v1778_v37, %v1782_v19 }
 0x1f0   : > { %v1665_v30 = vor.u32 4788187, %v1664_v15  ;;  %v1668_v51 = vcvt.s32.f32 %v1661_v32  ;;  %v1787_v50 = vsel %vm1786_vm3, 1, %v3066_v0  ;;  %v1788_v54 = vadd.s32 %v1782_v19, %v1778_v37  ;;  %v247_v15 = vpop.permute.xlu2 %246 }
 0x1f1   : > { %vm1764_vm4 = vc.u32 %v1756_v41, %v1760_v18  ;;  %v1766_v61 = vadd.s32 %v1760_v18, %v1756_v41  ;;  %v1789_v44 = vadd.s32 %v1787_v50, %v1781_v7  ;;  %vm1869_vm5 = vcmp.gt.s32.totalorder %v1868_v56, 0 }
 0x1f2   : > { %v1666_v22 = vand.u32 2147483647, %v1665_v30  ;;  %v1765_v2 = vsel %vm1764_vm4, 1, %v3066_v0  ;;  %v1761_v35 = vshrl.u32 %v1757_v20, 16  ;;  %vm1790_vm7 = vc.u32 %v1788_v54, %v1784_v27 }
 0x1f3   : > { %v1767_v36 = vadd.s32 %v1765_v2, %v1759_v17  ;;  %vm1768_vm6 = vc.u32 %v1766_v61, %v1762_v28  ;;  %v1791_v9 = vsel %vm1790_vm7, 1, %v3066_v0  ;;  %v1870_v39 = vsel %vm1869_vm5, %v1868_v56, 0 }
 0x1f4   : > { %v1669_v3 = vmul.f32 %v1668_v51, %v1666_v22  ;;  %v1769_v60 = vsel %vm1768_vm6, 1, %v3066_v0  ;;  %v1783_v26 = vshrl.u32 %v1779_v33, 16  ;;  %v1793_v47 = vadd.s32 %v1791_v9, %v1789_v44 }
 0x1f5   : > { %v1771_v10 = vadd.s32 %v1769_v60, %v1767_v36  ;;  %v1872_v8 = vand.u32 31, %v1870_v39  ;;  %v1692_v14 = vadd.s32 3, %v1675_v21  ;;  %v1763_v6 = vshrl.u32 %v1758_v59, 16 }
 0x1f6   : > { %v1670_v4 = vxor.u32 2147483648, %v1669_v3  ;;  %v1796_v11 = vmul.u32 %v4180_v31, %v4255_v38  ;;  %v1785_v48 = vshrl.u32 %v1780_v1, 16  ;;  %v1794_v57 = vadd.s32 %v1793_v47, %v1783_v26 }
 0x1f7   : > { %v1772_v58 = vadd.s32 %v1771_v10, %v1761_v35  ;;  %v4268_v23 = vsub.s32 32, %v1872_v8  ;;  %v4272_v63 = vadd.s32 %v1788_v54, %v1784_v27  ;;  %v4274_v56 = vshrl.u32 %v1870_v39, 5 }
 0x1f8   : > { %v1671_v34 = vsel %vm1550_vm13, %v1670_v4, %v1669_v3  ;;  %v1875_v33 = vshll.u32 %v3067_v40, %v1872_v8  ;;  %v1795_v31 = vadd.s32 %v1794_v57, %v1785_v48  ;;  %v1878_v59 = vshll.u32 %v3068_v42, %v1872_v8 }
 0x1f9   : > { %v1674_v16 = vsel %vm4214_vm12, %v3997_v53, %v1671_v34  ;;  %v4280_v29 = vadd.s32 %v1772_v58, %v1763_v6  ;;  %v1876_v21 = vshrl.u32 %v3068_v42, %v4268_v23  ;;  %v1879_v38 = vshrl.u32 %v3069_v46, %v4268_v23 }
 0x1fa   : > { %v1676_v1 = vmul.f32 %v1674_v16, %v1674_v16  ;;  %v1884_v20 = vshll.u32 %v3070_v49, %v1872_v8  ;;  %v1799_v19 = vadd.s32 1, %v1795_v31  ;;  %v1882_v24 = vshrl.u32 %v3070_v49, %v4268_v23 }
 0x1fb   : > { %vm1798_vm8 = vc.u32 %v4280_v29, %v4272_v63  ;;  %v1885_v32 = vshrl.u32 %v3071_v52, %v4268_v23  ;;  %v4294_v17 = vor.u32 %v1876_v21, %v1875_v33  ;;  %v1881_v18 = vshll.u32 %v3069_v46, %v1872_v8 }
 0x1fc   : > { %v1677_v41 = vmul.f32 -0.001358992, %v1676_v1  ;;  %v1684_v37 = vmul.f32 -0.00019511016, %v1676_v1  ;;  %v1800_v28 = vsel %vm1798_vm8, %v1799_v19, %v1795_v31  ;;  %v4297_v7 = vor.u32 %v1879_v38, %v1878_v59 }
 0x1fd   : > { %v1886_v30 = vor.u32 %v1885_v32, %v1884_v20  ;;  %v1887_v51 = vshll.u32 %v3071_v52, %v1872_v8  ;;  %v1801_v50 = vadd.s32 %v1800_v28, %v1796_v11  ;;  %v1888_v54 = vshrl.u32 %v3072_v55, %v4268_v23 }
 0x1fe   : > { %v1678_v27 = vadd.f32 0.041655596, %v1677_v41  ;;  %v1685_v61 = vadd.f32 0.008332121, %v1684_v37  ;;  %v283_v22 = vmul.f32 %v4047_v25, %v247_v15  ;;  %v1866_v2 = vor.u32 8388608, %v4207_v13 }
 0x1ff   : > { %v1883_v44 = vor.u32 %v1882_v24, %v1881_v18  ;;  %vm1893_vm9 = vcmp.lt.s32.totalorder %v4274_v56, 4  ;;  %v1802_v3 = vadd.s32 536870912, %v1801_v50  ;;  %v1889_v60 = vor.u32 %v1888_v54, %v1887_v51 }
 0x200   : > { %v1679_v35 = vmul.f32 %v1678_v27, %v1676_v1  ;;  %v1686_v36 = vmul.f32 %v1685_v61, %v1676_v1  ;;  %v1693_v9 = vand.u32 3, %v1692_v14  ;;  %vm1890_vm10 = vcmp.lt.s32.totalorder %v4274_v56, 1 }
 0x201   : > { %vm1892_vm13 = vcmp.lt.s32.totalorder %v4274_v56, 3  ;;  %v1899_v39 = vsel %vm1893_vm9, %v1886_v30, 920167782  ;;  %v4309_v47 = vshrl.u32 %v1802_v3, 30  ;;  %v1898_v13 = vsel %vm1890_vm10, %v4294_v17, %v4297_v7 }
 0x202   : > { %v1680_v10 = vadd.f32 -0.4999988, %v1679_v35  ;;  %v1687_v26 = vadd.f32 -0.16666654, %v1686_v36  ;;  %v4316_v8 = vadd.f32 %v4060_v12, %v283_v22  ;;  %vm1891_vm11 = vcmp.lt.s32.totalorder %v4274_v56, 2 }
 0x203   : > { %v1900_v4 = vsel %vm1892_vm13, %v1883_v44, %v1899_v39  ;;  %v1903_v14 = vsel %vm1893_vm9, %v1889_v60, 1326507024  ;;  %v1804_v58 = vshll.u32 %v4309_v47, 30  ;;  %v1902_v48 = vsel %vm1890_vm10, %v4297_v7, %v1883_v44 }
 0x204   : > { %v1681_v6 = vmul.f32 %v1680_v10, %v1676_v1  ;;  %v1688_v11 = vmul.f32 %v1687_v26, %v1676_v1  ;;  %vm1691_vm12 = vweird.f32 %v3997_v53  ;;  %v1901_v12 = vsel %vm1891_vm11, %v1898_v13, %v1900_v4 }
 0x205   : > { %v1904_v57 = vsel %vm1892_vm13, %v1886_v30, %v1903_v14  ;;  %v4332_v34 = vshll.u32 %v1866_v2, 8  ;;  %vm1694_vm14 = vcmp.lt.s32.totalorder %v1693_v9, 2  ;;  %v1805_v59 = vsub.s32 %v1801_v50, %v1804_v58 }
 0x206   : > { %v1682_v33 = vadd.f32 1.0, %v1681_v6  ;;  %v1689_v31 = vadd.f32 1.0, %v1688_v11  ;;  %vm1695_vm15 = vcmp.eq.s32.totalorder %v1693_v9, 0  ;;  %vm1698_vm0 = vcmp.eq.s32.totalorder %v1693_v9, 2 }
 0x207   : > { %v1905_v1 = vsel %vm1891_vm11, %v1902_v48, %v1904_v57  ;;  %v1932_v21 = vshrl.u32 %v1901_v12, 16  ;;  %vm1806_vm1 = vcmp.lt.s32.totalorder %v1805_v59, 0  ;;  %v1807_v19 = vsub.s32 0, %v1805_v59 }
 0x208   : > { %v1690_v38 = vmul.f32 %v1689_v31, %v1674_v16  ;;  %v1699_v20 = vxor.u32 2147483648, %v1682_v33  ;;  %v1907_v24 = vand.u32 65535, %v4332_v34  ;;  %v1909_v32 = vand.u32 65535, %v1905_v1 }
 0x209   : > { %v1910_v15 = vshrl.u32 %v1905_v1, 16  ;;  %v2016_v41 = vand.u32 2139095040, %v4316_v8  ;;  %v1808_v18 = vsel %vm1806_vm1, %v1807_v19, %v1805_v59  ;;  %v1874_v28 = vshrl.u32 %v3067_v40, %v4268_v23 }
 0x20a   : > { %v1696_v37 = vxor.u32 2147483648, %v1690_v38  ;;  %v1908_v30 = vshrl.u32 %v4332_v34, 16  ;;  %v1809_v51 = vclz %v1808_v18  ;;  %v1895_v16 = vsel %vm1893_vm9, %v1883_v44, 2102212464 }
 0x20b   : > { %v1912_v27 = vmul.u32 %v1910_v15, %v1907_v24  ;;  %v1931_v61 = vand.u32 65535, %v1901_v12  ;;  %v1700_v54 = vsel %vm1698_vm0, %v1699_v20, %v1690_v38  ;;  %v1934_v2 = vmul.u32 %v1932_v21, %v1907_v24 }
 0x20c   : > { %v1697_v50 = vsel %vm1695_vm15, %v1682_v33, %v1696_v37  ;;  %v1913_v22 = vmul.u32 %v1909_v32, %v1908_v30  ;;  %v1797_v23 = vadd.s32 %v4272_v63, %v4280_v29  ;;  %v2917_v36 = vadd.s32 4294967294, %v1809_v51 }
 0x20d   : > { %v1701_v35 = vsel %vm1694_vm14, %v1697_v50, %v1700_v54  ;;  %v1894_v3 = vsel %vm1890_vm10, %v1874_v28, %v4294_v17  ;;  %v1896_v60 = vsel %vm1892_vm13, %v4297_v7, %v1895_v16  ;;  %v1911_v39 = vmul.u32 %v1909_v32, %v1907_v24 }
 0x20e   : > { %v1702_v44 = vsel %vm1691_vm12, nan, %v1701_v35  ;;  %v1915_v10 = vshll.u32 %v1912_v27, 16  ;;  %vm2918_vm2 = vcmp.lt.s32.totalorder %v2917_v36, 0  ;;  %v1914_v9 = vmul.u32 %v1910_v15, %v1908_v30 }
 0x20f   : > { %v1917_v26 = vshll.u32 %v1913_v22, 16  ;;  %v1935_v13 = vmul.u32 %v1931_v61, %v1908_v30  ;;  %2796 = vst [vmem:[%s3458_s8 + $0x40] sm:$0xff] %v1702_v44  ;;  %v1812_v63 = vsel %vm2918_vm2, 0, %v2917_v36  ;;  %v1937_v4 = vshll.u32 %v1934_v2, 16 }
 0x210   : > { %vm1919_vm3 = vc.u32 %v1911_v39, %v1915_v10  ;;  %v1921_v29 = vadd.s32 %v1915_v10, %v1911_v39  ;;  %v1813_v14 = vsub.s32 32, %v1812_v63  ;;  %v1817_v17 = vsub.s32 4294967266, %v1812_v63 }
 0x211   : > { %v1920_v53 = vsel %vm1919_vm3, 1, %v3066_v0  ;;  %v1933_v6 = vmul.u32 %v1931_v61, %v1907_v24  ;;  %v1916_v11 = vshrl.u32 %v1912_v27, 16  ;;  %v1936_v7 = vmul.u32 %v1932_v21, %v1908_v30 }
 0x212   : > { %v1922_v58 = vadd.s32 %v1920_v53, %v1914_v9  ;;  %vm1923_vm4 = vc.u32 %v1921_v29, %v1917_v26  ;;  %v1814_v48 = vshll.u32 %v1805_v59, %v1812_v63  ;;  %v1815_v12 = vshrl.u32 %v1797_v23, %v1813_v14 }
 0x213   : > { %v1818_v57 = vadd.s32 127, %v1817_v17  ;;  %v1924_v33 = vsel %vm1923_vm4, 1, %v3066_v0  ;;  %v1939_v1 = vshll.u32 %v1935_v13, 16  ;;  %vm1941_vm5 = vc.u32 %v1933_v6, %v1937_v4 }
 0x214   : > { %v1926_v31 = vadd.s32 %v1924_v33, %v1922_v58  ;;  %v1943_v38 = vadd.s32 %v1937_v4, %v1933_v6  ;;  %v1816_v20 = vor.u32 %v1815_v12, %v1814_v48  ;;  %v1942_v32 = vsel %vm1941_vm5, 1, %v3066_v0 }
 0x215   : > { %v1819_v19 = vshll.u32 %v1818_v57, 23  ;;  %v2017_v15 = vshrl.u32 %v2016_v41, 23  ;;  %v1827_v24 = vsub.s32 4, %v4309_v47  ;;  %v1944_v18 = vadd.s32 %v1942_v32, %v1936_v7 }
 0x216   : > { %v1927_v37 = vadd.s32 %v1926_v31, %v1916_v11  ;;  %vm1945_vm6 = vc.u32 %v1943_v38, %v1939_v1  ;;  %v1918_v59 = vshrl.u32 %v1913_v22, 16  ;;  %vm1705_vm7 = vcmp.lt.s32.totalorder %v4063_v62, 0 }
 0x217   : > { %v1820_v21 = vor.u32 4788187, %v1819_v19  ;;  %v1946_v28 = vsel %vm1945_vm6, 1, %v3066_v0  ;;  %v2922_v30 = vadd.s32 4294967169, %v2017_v15  ;;  %v1938_v51 = vshrl.u32 %v1934_v2, 16 }
 0x218   : > { %v1948_v16 = vadd.s32 %v1946_v28, %v1944_v18  ;;  %v1823_v61 = vcvt.s32.f32 %v1816_v20  ;;  %v4363_v50 = vadd.s32 %v1927_v37, %v1918_v59  ;;  %v1897_v41 = vsel %vm1891_vm11, %v1894_v3, %v1896_v60 }
 0x219   : > { %v1821_v27 = vand.u32 2147483647, %v1820_v21  ;;  %v2023_v54 = vadd.s32 1, %v2922_v30  ;;  %v1940_v35 = vshrl.u32 %v1935_v13, 16  ;;  %v2013_v36 = vand.u32 2147483647, %v4316_v8 }
 0x21a   : > { %v1949_v23 = vadd.s32 %v1948_v16, %v1938_v51  ;;  %v1828_v44 = vsel %vm1705_vm7, %v1827_v24, %v4309_v47  ;;  %v4371_v39 = vadd.s32 %v1943_v38, %v1939_v1  ;;  %vm4375_vm9 = vcmp.le.f32.partialorder %v1703_v43, 0.7853982  ;;  %v257_v24 = vpop.permute.xlu1 %256 }
 0x21b   : > { %v1824_v22 = vmul.f32 %v1823_v61, %v1821_v27  ;;  %vm2024_vm8 = vcmp.gt.s32.totalorder %v2023_v54, 0  ;;  %v1830_v60 = vsel %vm4375_vm9, 0, %v1828_v44  ;;  %v1951_v47 = vmul.u32 %v4332_v34, %v1897_v41 }
 0x21c   : > { %v1950_v2 = vadd.s32 %v1949_v23, %v1940_v35  ;;  %v2025_v10 = vsel %vm2024_vm8, %v2023_v54, 0  ;;  %vm1953_vm10 = vc.u32 %v4363_v50, %v4371_v39  ;;  %v2020_v43 = vand.u32 8388607, %v2013_v36  ;;  %v252_v23 = vpop.permute.xlu0 %251 }
 0x21d   : > { %v1825_v56 = vxor.u32 2147483648, %v1824_v22  ;;  %v2027_v3 = vand.u32 31, %v2025_v10  ;;  %v4388_v63 = vshrl.u32 %v2025_v10, 5  ;;  %v1847_v1 = vadd.s32 3, %v1830_v60 }
 0x21e   : > { %v1954_v26 = vadd.s32 1, %v1950_v2  ;;  %v2021_v20 = vor.u32 8388608, %v2020_v43  ;;  %v4423_v61 = vmul.f32 %v4047_v25, %v257_v24  ;;  %vm1846_vm0 = vweird.f32 %v4063_v62 }
 0x21f   : > { %v1826_v13 = vsel %vm1705_vm7, %v1825_v56, %v1824_v22  ;;  %v4390_v29 = vsub.s32 32, %v2027_v3  ;;  %v2030_v17 = vshll.u32 %v3067_v40, %v2027_v3  ;;  %v2039_v34 = vshll.u32 %v3070_v49, %v2027_v3 }
 0x220   : > { %v1829_v4 = vsel %vm4375_vm9, %v4063_v62, %v1826_v13  ;;  %v1955_v14 = vsel %vm1953_vm10, %v1954_v26, %v1950_v2  ;;  %v2033_v58 = vshll.u32 %v3068_v42, %v2027_v3  ;;  %v2036_v48 = vshll.u32 %v3069_v46, %v2027_v3 }
 0x221   : > { %v1831_v53 = vmul.f32 %v1829_v4, %v1829_v4  ;;  %v1956_v6 = vadd.s32 %v1955_v14, %v1951_v47  ;;  %v2031_v11 = vshrl.u32 %v3068_v42, %v4390_v29  ;;  %v2034_v7 = vshrl.u32 %v3069_v46, %v4390_v29 }
 0x222   : > { %v2037_v12 = vshrl.u32 %v3070_v49, %v4390_v29  ;;  %v2040_v57 = vshrl.u32 %v3071_v52, %v4390_v29  ;;  %v2042_v32 = vshll.u32 %v3071_v52, %v2027_v3  ;;  %v2043_v15 = vshrl.u32 %v3072_v55, %v4390_v29 }
 0x223   : > { %v1832_v33 = vmul.f32 -0.001358992, %v1831_v53  ;;  %v1839_v31 = vmul.f32 -0.00019511016, %v1831_v53  ;;  %v1957_v38 = vadd.s32 536870912, %v1956_v6  ;;  %v4412_v59 = vor.u32 %v2031_v11, %v2030_v17 }
 0x224   : > { %v2041_v19 = vor.u32 %v2040_v57, %v2039_v34  ;;  %v4414_v28 = vor.u32 %v2034_v7, %v2033_v58  ;;  %v4416_v30 = vor.u32 %v2037_v12, %v2036_v48  ;;  %vm2045_vm13 = vcmp.lt.s32.totalorder %v4388_v63, 1 }
 0x225   : > { %v1833_v37 = vadd.f32 0.041655596, %v1832_v33  ;;  %v1840_v18 = vadd.f32 0.008332121, %v1839_v31  ;;  %v4410_v21 = vshrl.u32 %v1957_v38, 30  ;;  %vm2048_vm11 = vcmp.lt.s32.totalorder %v4388_v63, 4 }
 0x226   : > { %vm2047_vm12 = vcmp.lt.s32.totalorder %v4388_v63, 3  ;;  %v1848_v54 = vand.u32 3, %v1847_v1  ;;  %v2044_v41 = vor.u32 %v2043_v15, %v2042_v32  ;;  %v2054_v35 = vsel %vm2048_vm11, %v2041_v19, 920167782 }
 0x227   : > { %v1834_v51 = vmul.f32 %v1833_v37, %v1831_v53  ;;  %v1841_v16 = vmul.f32 %v1840_v18, %v1831_v53  ;;  %v1959_v27 = vshll.u32 %v4410_v21, 30  ;;  %v4427_v10 = vshll.u32 %v2021_v20, 8 }
 0x228   : > { %vm2046_vm14 = vcmp.lt.s32.totalorder %v4388_v63, 2  ;;  %v2053_v9 = vsel %vm2045_vm13, %v4412_v59, %v4414_v28  ;;  %v2055_v56 = vsel %vm2047_vm12, %v4416_v30, %v2054_v35  ;;  %v2057_v3 = vsel %vm2045_vm13, %v4414_v28, %v4416_v30  ;;  %v4507_v63 = vld [vmem:[%s4966_s1] ss:$0 sm:$0xff] }
 0x229   : > { %v1835_v22 = vadd.f32 -0.4999988, %v1834_v51  ;;  %v1842_v44 = vadd.f32 -0.16666654, %v1841_v16  ;;  %v1960_v2 = vsub.s32 %v1956_v6, %v1959_v27  ;;  %v284_v13 = vmul.f32 %v4047_v25, %v252_v23 }
 0x22a   : > { %vm1849_vm1 = vcmp.lt.s32.totalorder %v1848_v54, 2  ;;  %v2058_v43 = vsel %vm2048_vm11, %v2044_v41, 1326507024  ;;  %v2062_v25 = vand.u32 65535, %v4427_v10  ;;  %vm1850_vm2 = vcmp.eq.s32.totalorder %v1848_v54, 0 }
 0x22b   : > { %v1836_v60 = vmul.f32 %v1835_v22, %v1831_v53  ;;  %v1843_v47 = vmul.f32 %v1842_v44, %v1831_v53  ;;  %vm1961_vm15 = vcmp.lt.s32.totalorder %v1960_v2, 0  ;;  %v1962_v26 = vsub.s32 0, %v1960_v2 }
 0x22c   : > { %v2059_v6 = vsel %vm2047_vm12, %v2041_v19, %v2058_v43  ;;  %v2056_v53 = vsel %vm2046_vm14, %v2053_v9, %v2055_v56  ;;  %vm1853_vm3 = vcmp.eq.s32.totalorder %v1848_v54, 2  ;;  %v2063_v31 = vshrl.u32 %v4427_v10, 16  ;;  %v4463_v54 = vld [vmem:[%s4967_s2] ss:$0 sm:$0xff] }
 0x22d   : > { %v1837_v14 = vadd.f32 1.0, %v1836_v60  ;;  %v1844_v17 = vadd.f32 1.0, %v1843_v47  ;;  %v1963_v34 = vsel %vm1961_vm15, %v1962_v26, %v1960_v2  ;;  %v2060_v58 = vsel %vm2046_vm14, %v2057_v3, %v2059_v6 }
 0x22e   : > { %v1964_v11 = vclz %v1963_v34  ;;  %v2064_v12 = vand.u32 65535, %v2060_v58  ;;  %v2065_v57 = vshrl.u32 %v2060_v58, 16  ;;  %v1952_v38 = vadd.s32 %v4371_v39, %v4363_v50 }
 0x22f   : > { %v1845_v7 = vmul.f32 %v1844_v17, %v1829_v4  ;;  %v1854_v48 = vxor.u32 2147483648, %v1837_v14  ;;  %v2086_v19 = vand.u32 65535, %v2056_v53  ;;  %v2087_v51 = vshrl.u32 %v2056_v53, 16 }
 0x230   : > { %v2920_v33 = vadd.s32 4294967294, %v1964_v11  ;;  %v2067_v20 = vmul.u32 %v2065_v57, %v2062_v25  ;;  %v2066_v15 = vmul.u32 %v2064_v12, %v2062_v25  ;;  %v2068_v24 = vmul.u32 %v2064_v12, %v2063_v31 }
 0x231   : > { %v1851_v1 = vxor.u32 2147483648, %v1845_v7  ;;  %v1855_v32 = vsel %vm1853_vm3, %v1854_v48, %v1845_v7  ;;  %v2069_v35 = vmul.u32 %v2065_v57, %v2063_v31  ;;  %v4466_v3 = vadd.f32 %v4463_v54, %v284_v13 }
 0x232   : > { %vm2921_vm4 = vcmp.lt.s32.totalorder %v2920_v33, 0  ;;  %v2070_v18 = vshll.u32 %v2067_v20, 16  ;;  %v2072_v39 = vshll.u32 %v2068_v24, 16  ;;  %v2089_v62 = vmul.u32 %v2087_v51, %v2062_v25 }
 0x233   : > { %v1852_v37 = vsel %vm1850_vm2, %v1837_v14, %v1851_v1  ;;  %v1967_v4 = vsel %vm2921_vm4, 0, %v2920_v33  ;;  %v2090_v47 = vmul.u32 %v2086_v19, %v2063_v31  ;;  %v2029_v43 = vshrl.u32 %v3067_v40, %v4390_v29 }
 0x234   : > { %v1856_v16 = vsel %vm1849_vm1, %v1852_v37, %v1855_v32  ;;  %v1968_v27 = vsub.s32 32, %v1967_v4  ;;  %v1972_v41 = vsub.s32 4294967266, %v1967_v4  ;;  %v1969_v50 = vshll.u32 %v1960_v2, %v1967_v4 }
 0x235   : > { %v1857_v23 = vsel %vm1846_vm0, nan, %v1856_v16  ;;  %vm2074_vm5 = vc.u32 %v2066_v15, %v2070_v18  ;;  %v2076_v56 = vadd.s32 %v2070_v18, %v2066_v15  ;;  %v1982_v14 = vsub.s32 4, %v4410_v21 }
 0x236   : > { %v1970_v22 = vshrl.u32 %v1952_v38, %v1968_v27  ;;  %v1973_v44 = vadd.s32 127, %v1972_v41  ;;  %v2075_v9 = vsel %vm2074_vm5, 1, %v3066_v0  ;;  %2797 = vst [vmem:[%s3458_s8 + $0x48] sm:$0xff] %v1857_v23  ;;  %v2088_v34 = vmul.u32 %v2086_v19, %v2062_v25 }
 0x237   : > { %v2077_v60 = vadd.s32 %v2075_v9, %v2069_v35  ;;  %vm2078_vm6 = vc.u32 %v2076_v56, %v2072_v39  ;;  %v2092_v6 = vshll.u32 %v2089_v62, 16  ;;  %v2050_v13 = vsel %vm2048_vm11, %v4416_v30, 2102212464 }
 0x238   : > { %v1971_v2 = vor.u32 %v1970_v22, %v1969_v50  ;;  %v1974_v26 = vshll.u32 %v1973_v44, 23  ;;  %v2079_v17 = vsel %vm2078_vm6, 1, %v3066_v0  ;;  %v2071_v53 = vshrl.u32 %v2067_v20, 16  ;;  %v262_v44 = vpop.permute.xlu2 %261 }
 0x239   : > { %v2081_v58 = vadd.s32 %v2079_v17, %v2077_v60  ;;  %v2091_v7 = vmul.u32 %v2087_v51, %v2063_v31  ;;  %v2094_v48 = vshll.u32 %v2090_v47, 16  ;;  %vm2096_vm7 = vc.u32 %v2088_v34, %v2092_v6 }
 0x23a   : > { %v1975_v11 = vor.u32 4788187, %v1974_v26  ;;  %v2098_v12 = vadd.s32 %v2092_v6, %v2088_v34  ;;  %v1978_v29 = vcvt.s32.f32 %v1971_v2  ;;  %v2097_v1 = vsel %vm2096_vm7, 1, %v3066_v0 }
 0x23b   : > { %v2082_v33 = vadd.s32 %v2081_v58, %v2071_v53  ;;  %vm1860_vm8 = vcmp.lt.s32.totalorder %v4174_v5, 0  ;;  %v2049_v25 = vsel %vm2045_vm13, %v2029_v43, %v4412_v59  ;;  %v2099_v38 = vadd.s32 %v2097_v1, %v2091_v7 }
 0x23c   : > { %v1976_v57 = vand.u32 2147483647, %v1975_v11  ;;  %vm2100_vm9 = vc.u32 %v2098_v12, %v2094_v48  ;;  %v2073_v20 = vshrl.u32 %v2068_v24, 16  ;;  %v2171_v19 = vand.u32 2139095040, %v4466_v3 }
 0x23d   : > { %v2101_v31 = vsel %vm2100_vm9, 1, %v3066_v0  ;;  %v1983_v32 = vsel %vm1860_vm8, %v1982_v14, %v4410_v21  ;;  %v2051_v15 = vsel %vm2047_vm12, %v4414_v28, %v2050_v13  ;;  %v2093_v37 = vshrl.u32 %v2089_v62, 16 }
 0x23e   : > { %v1979_v30 = vmul.f32 %v1978_v29, %v1976_v57  ;;  %v2103_v4 = vadd.s32 %v2101_v31, %v2099_v38  ;;  %v2083_v59 = vadd.s32 %v2082_v33, %v2073_v20  ;;  %v2168_v51 = vand.u32 2147483647, %v4466_v3 }
 0x23f   : > { %v2172_v16 = vshrl.u32 %v2171_v19, 23  ;;  %v4491_v24 = vadd.f32 %v4463_v54, %v4423_v61  ;;  %vm1859_vm10 = vcmp.le.f32.partialorder %v1858_v45, 0.7853982  ;;  %v2095_v27 = vshrl.u32 %v2090_v47, 16 }
 0x240   : > { %v1980_v18 = vxor.u32 2147483648, %v1979_v30  ;;  %v2104_v21 = vadd.s32 %v2103_v4, %v2093_v37  ;;  %v1985_v28 = vsel %vm1859_vm10, 0, %v1983_v32  ;;  %v2102_v35 = vadd.s32 %v2098_v12, %v2094_v48 }
 0x241   : > { %v2925_v23 = vadd.s32 4294967169, %v2172_v16  ;;  %v2052_v39 = vsel %vm2046_vm14, %v2049_v25, %v2051_v15  ;;  %v2175_v45 = vand.u32 8388607, %v2168_v51  ;;  %v2002_v56 = vadd.s32 3, %v1985_v28 }
 0x242   : > { %v1981_v41 = vsel %vm1860_vm8, %v1980_v18, %v1979_v30  ;;  %v2105_v22 = vadd.s32 %v2104_v21, %v2095_v27  ;;  %vm2108_vm13 = vc.u32 %v2083_v59, %v2102_v35  ;;  %v2326_v62 = vand.u32 2139095040, %v4491_v24 }
 0x243   : > { %v1984_v50 = vsel %vm1859_vm10, %v4174_v5, %v1981_v41  ;;  %v2178_v9 = vadd.s32 1, %v2925_v23  ;;  %v2106_v26 = vmul.u32 %v4427_v10, %v2052_v39  ;;  %v286_v43 = vmul.f32 %v4507_v63, %v262_v44 }
 0x244   : > { %v1986_v61 = vmul.f32 %v1984_v50, %v1984_v50  ;;  %v2109_v60 = vadd.s32 1, %v2105_v22  ;;  %v2176_v13 = vor.u32 8388608, %v2175_v45  ;;  %v2003_v53 = vand.u32 3, %v2002_v56 }
 0x245   : > { %vm2179_vm11 = vcmp.gt.s32.totalorder %v2178_v9, 0  ;;  %v2327_v7 = vshrl.u32 %v2326_v62, 23  ;;  %v4511_v57 = vadd.f32 %v4463_v54, %v286_v43  ;;  %v4513_v29 = vadd.s32 %v2102_v35, %v2083_v59 }
 0x246   : > { %v1987_v47 = vmul.f32 -0.001358992, %v1986_v61  ;;  %v1994_v2 = vmul.f32 -0.00019511016, %v1986_v61  ;;  %v2110_v14 = vsel %vm2108_vm13, %v2109_v60, %v2105_v22  ;;  %v2180_v17 = vsel %vm2179_vm11, %v2178_v9, 0 }
 0x247   : > { %v2111_v11 = vadd.s32 %v2110_v14, %v2106_v26  ;;  %v2182_v58 = vand.u32 31, %v2180_v17  ;;  %v2323_v1 = vand.u32 2147483647, %v4491_v24  ;;  %v4518_v20 = vshll.u32 %v2176_v13, 8 }
 0x248   : > { %v1988_v34 = vadd.f32 0.041655596, %v1987_v47  ;;  %v1995_v6 = vadd.f32 0.008332121, %v1994_v2  ;;  %vm2005_vm12 = vcmp.eq.s32.totalorder %v2003_v53, 0  ;;  %vm2008_vm14 = vcmp.eq.s32.totalorder %v2003_v53, 2 }
 0x249   : > { %v2112_v10 = vadd.s32 536870912, %v2111_v11  ;;  %v2183_v33 = vsub.s32 32, %v2182_v58  ;;  %v4520_v31 = vshrl.u32 %v2180_v17, 5  ;;  %v2928_v15 = vadd.s32 4294967169, %v2327_v7 }
 0x24a   : > { %v1989_v48 = vmul.f32 %v1988_v34, %v1986_v61  ;;  %v1996_v12 = vmul.f32 %v1995_v6, %v1986_v61  ;;  %vm2004_vm15 = vcmp.lt.s32.totalorder %v2003_v53, 2  ;;  %v2185_v59 = vshll.u32 %v3067_v40, %v2182_v58 }
 0x24b   : > { %v4516_v30 = vshrl.u32 %v2112_v10, 30  ;;  %v2186_v19 = vshrl.u32 %v3068_v42, %v2183_v33  ;;  %v2189_v32 = vshrl.u32 %v3069_v46, %v2183_v33  ;;  %vm2001_vm0 = vweird.f32 %v4174_v5 }
 0x24c   : > { %v1990_v25 = vadd.f32 -0.4999988, %v1989_v48  ;;  %v1997_v38 = vadd.f32 -0.16666654, %v1996_v12  ;;  %v2188_v16 = vshll.u32 %v3068_v42, %v2182_v58  ;;  %v2191_v27 = vshll.u32 %v3069_v46, %v2182_v58 }
 0x24d   : > { %v2114_v18 = vshll.u32 %v4516_v30, 30  ;;  %v2194_v21 = vshll.u32 %v3070_v49, %v2182_v58  ;;  %v2195_v41 = vshrl.u32 %v3071_v52, %v2183_v33  ;;  %v2192_v39 = vshrl.u32 %v3070_v49, %v2183_v33 }
 0x24e   : > { %v1991_v37 = vmul.f32 %v1990_v25, %v1986_v61  ;;  %v1998_v4 = vmul.f32 %v1997_v38, %v1986_v61  ;;  %v2187_v22 = vor.u32 %v2186_v19, %v2185_v59  ;;  %v2190_v44 = vor.u32 %v2189_v32, %v2188_v16 }
 0x24f   : > { %v2115_v23 = vsub.s32 %v2111_v11, %v2114_v18  ;;  %v2196_v61 = vor.u32 %v2195_v41, %v2194_v21  ;;  %v2198_v45 = vshrl.u32 %v3072_v55, %v2183_v33  ;;  %vm2015_vm1 = vcmp.lt.s32.totalorder %v4316_v8, 0 }
 0x250   : > { %v1992_v28 = vadd.f32 1.0, %v1991_v37  ;;  %v1999_v35 = vadd.f32 1.0, %v1998_v4  ;;  %v2197_v62 = vshll.u32 %v3071_v52, %v2182_v58  ;;  %v2217_v47 = vand.u32 65535, %v4518_v20 }
 0x251   : > { %vm2116_vm2 = vcmp.lt.s32.totalorder %v2115_v23, 0  ;;  %v2117_v60 = vsub.s32 0, %v2115_v23  ;;  %v2218_v2 = vshrl.u32 %v4518_v20, 16  ;;  %v4539_v26 = vand.u32 8388607, %v2323_v1 }
 0x252   : > { %v2000_v9 = vmul.f32 %v1999_v35, %v1984_v50  ;;  %v2009_v56 = vxor.u32 2147483648, %v1992_v28  ;;  %v2193_v17 = vor.u32 %v2192_v39, %v2191_v27  ;;  %v4541_v34 = vadd.s32 1, %v2928_v15 }
 0x253   : > { %v2118_v14 = vsel %vm2116_vm2, %v2117_v60, %v2115_v23  ;;  %vm4545_vm3 = vcmp.le.f32.partialorder %v2013_v36, 0.7853982  ;;  %v2199_v11 = vor.u32 %v2198_v45, %v2197_v62  ;;  %vm2200_vm4 = vcmp.lt.s32.totalorder %v4520_v31, 1 }
 0x254   : > { %v2006_v43 = vxor.u32 2147483648, %v2000_v9  ;;  %v2119_v6 = vclz %v2118_v14  ;;  %vm2203_vm5 = vcmp.lt.s32.totalorder %v4520_v31, 4  ;;  %v2010_v58 = vsel %vm2008_vm14, %v2009_v56, %v2000_v9 }
 0x255   : > { %v2208_v7 = vsel %vm2200_vm4, %v2187_v22, %v2190_v44  ;;  %v2209_v36 = vsel %vm2203_vm5, %v2196_v61, 920167782  ;;  %v2137_v10 = vsub.s32 4, %v4516_v30  ;;  %vm2202_vm6 = vcmp.lt.s32.totalorder %v4520_v31, 3 }
 0x256   : > { %v2007_v13 = vsel %vm2005_vm12, %v1992_v28, %v2006_v43  ;;  %v2923_v12 = vadd.s32 4294967294, %v2119_v6  ;;  %v2184_v38 = vshrl.u32 %v3067_v40, %v2183_v33  ;;  %vm2201_vm7 = vcmp.lt.s32.totalorder %v4520_v31, 2 }
 0x257   : > { %v2011_v48 = vsel %vm2004_vm15, %v2007_v13, %v2010_v58  ;;  %v2210_v19 = vsel %vm2202_vm6, %v2193_v17, %v2209_v36  ;;  %v2212_v32 = vsel %vm2200_vm4, %v2190_v44, %v2193_v17  ;;  %v2213_v15 = vsel %vm2203_vm5, %v2199_v11, 1326507024 }
 0x258   : > { %v2012_v25 = vsel %vm2001_vm0, nan, %v2011_v48  ;;  %vm2924_vm8 = vcmp.lt.s32.totalorder %v2923_v12, 0  ;;  %v2211_v53 = vsel %vm2201_vm7, %v2208_v7, %v2210_v19  ;;  %v2214_v33 = vsel %vm2202_vm6, %v2196_v61, %v2213_v15 }
 0x259   : > { %2798 = vst [vmem:[%s3458_s8 + $0x50] sm:$0xff] %v2012_v25  ;;  %v2122_v5 = vsel %vm2924_vm8, 0, %v2923_v12  ;;  %v2241_v37 = vand.u32 65535, %v2211_v53  ;;  %v2242_v4 = vshrl.u32 %v2211_v53, 16  ;;  %v4578_v16 = vsel %vm2015_vm1, %v2137_v10, %v4516_v30 }
 0x25a   : > { %v2123_v18 = vsub.s32 32, %v2122_v5  ;;  %v2127_v59 = vsub.s32 4294967266, %v2122_v5  ;;  %v2215_v27 = vsel %vm2201_vm7, %v2212_v32, %v2214_v33  ;;  %v2205_v21 = vsel %vm2203_vm5, %v2193_v17, 2102212464 }
 0x25b   : > { %v2219_v41 = vand.u32 65535, %v2215_v27  ;;  %v2220_v28 = vshrl.u32 %v2215_v27, 16  ;;  %v2244_v35 = vmul.u32 %v2242_v4, %v2217_v47  ;;  %v2124_v39 = vshll.u32 %v2115_v23, %v2122_v5 }
 0x25c   : > { %v2125_v61 = vshrl.u32 %v4513_v29, %v2123_v18  ;;  %v2128_v45 = vadd.s32 127, %v2127_v59  ;;  %v2245_v9 = vmul.u32 %v2241_v37, %v2218_v2  ;;  %v2140_v56 = vsel %vm4545_vm3, 0, %v4578_v16 }
 0x25d   : > { %v2204_v30 = vsel %vm2200_vm4, %v2184_v38, %v2187_v22  ;;  %v2222_v60 = vmul.u32 %v2220_v28, %v2217_v47  ;;  %v2223_v62 = vmul.u32 %v2219_v41, %v2218_v2  ;;  %v2206_v17 = vsel %vm2202_vm6, %v2190_v44, %v2205_v21 }
 0x25e   : > { %v2126_v43 = vor.u32 %v2125_v61, %v2124_v39  ;;  %v2129_v14 = vshll.u32 %v2128_v45, 23  ;;  %v2247_v6 = vshll.u32 %v2244_v35, 16  ;;  %v2221_v23 = vmul.u32 %v2219_v41, %v2217_v47 }
 0x25f   : > { %v2225_v11 = vshll.u32 %v2222_v60, 16  ;;  %v2243_v29 = vmul.u32 %v2241_v37, %v2217_v47  ;;  %v2246_v13 = vmul.u32 %v2242_v4, %v2218_v2  ;;  %v2224_v7 = vmul.u32 %v2220_v28, %v2218_v2 }
 0x260   : > { %v2130_v58 = vor.u32 4788187, %v2129_v14  ;;  %v2227_v36 = vshll.u32 %v2223_v62, 16  ;;  %v2249_v48 = vshll.u32 %v2245_v9, 16  ;;  %v2133_v25 = vcvt.s32.f32 %v2126_v43 }
 0x261   : > { %vm2229_vm9 = vc.u32 %v2221_v23, %v2225_v11  ;;  %v2231_v12 = vadd.s32 %v2225_v11, %v2221_v23  ;;  %vm2251_vm10 = vc.u32 %v2243_v29, %v2247_v6  ;;  %v2253_v22 = vadd.s32 %v2247_v6, %v2243_v29 }
 0x262   : > { %v2131_v10 = vand.u32 2147483647, %v2130_v58  ;;  %v2230_v38 = vsel %vm2229_vm9, 1, %v3066_v0  ;;  %v2252_v19 = vsel %vm2251_vm10, 1, %v3066_v0  ;;  %v2248_v2 = vshrl.u32 %v2244_v35, 16 }
 0x263   : > { %v2232_v44 = vadd.s32 %v2230_v38, %v2224_v7  ;;  %vm2233_vm13 = vc.u32 %v2231_v12, %v2227_v36  ;;  %v2254_v53 = vadd.s32 %v2252_v19, %v2246_v13  ;;  %vm2255_vm11 = vc.u32 %v2253_v22, %v2249_v48 }
 0x264   : > { %v2134_v47 = vmul.f32 %v2133_v25, %v2131_v10  ;;  %v2234_v32 = vsel %vm2233_vm13, 1, %v3066_v0  ;;  %v2256_v15 = vsel %vm2255_vm11, 1, %v3066_v0  ;;  %v2226_v5 = vshrl.u32 %v2222_v60, 16 }
 0x265   : > { %v2236_v33 = vadd.s32 %v2234_v32, %v2232_v44  ;;  %v2258_v37 = vadd.s32 %v2256_v15, %v2254_v53  ;;  %vm2334_vm12 = vcmp.gt.s32.totalorder %v4541_v34, 0  ;;  %v2207_v18 = vsel %vm2201_vm7, %v2204_v30, %v2206_v17 }
 0x266   : > { %v2135_v4 = vxor.u32 2147483648, %v2134_v47  ;;  %v2228_v59 = vshrl.u32 %v2223_v62, 16  ;;  %v2335_v16 = vsel %vm2334_vm12, %v4541_v34, 0  ;;  %v2250_v21 = vshrl.u32 %v2245_v9, 16 }
 0x267   : > { %v2237_v27 = vadd.s32 %v2236_v33, %v2226_v5  ;;  %v2259_v41 = vadd.s32 %v2258_v37, %v2248_v2  ;;  %v2337_v28 = vand.u32 31, %v2335_v16  ;;  %v4602_v39 = vadd.s32 %v2253_v22, %v2249_v48 }
 0x268   : > { %v2136_v35 = vsel %vm2015_vm1, %v2135_v4, %v2134_v47  ;;  %v2478_v61 = vand.u32 2147483647, %v4511_v57  ;;  %v2481_v45 = vand.u32 2139095040, %v4511_v57  ;;  %v2157_v62 = vadd.s32 3, %v2140_v56 }
 0x269   : > { %v2139_v31 = vsel %vm4545_vm3, %v4316_v8, %v2136_v35  ;;  %v4609_v30 = vadd.s32 %v2237_v27, %v2228_v59  ;;  %v2260_v34 = vadd.s32 %v2259_v41, %v2250_v21  ;;  %v4611_v60 = vsub.s32 32, %v2337_v28 }
 0x26a   : > { %v2141_v9 = vmul.f32 %v2139_v31, %v2139_v31  ;;  %v2261_v43 = vmul.u32 %v4518_v20, %v2207_v18  ;;  %v4614_v14 = vshrl.u32 %v2335_v16, 5  ;;  %v2340_v6 = vshll.u32 %v3067_v40, %v2337_v28 }
 0x26b   : > { %vm2263_vm14 = vc.u32 %v4609_v30, %v4602_v39  ;;  %v2264_v17 = vadd.s32 1, %v2260_v34  ;;  %v2343_v50 = vshll.u32 %v3068_v42, %v2337_v28  ;;  %v2341_v29 = vshrl.u32 %v3068_v42, %v4611_v60 }
 0x26c   : > { %v2142_v23 = vmul.f32 -0.001358992, %v2141_v9  ;;  %v2149_v11 = vmul.f32 -0.00019511016, %v2141_v9  ;;  %v2344_v56 = vshrl.u32 %v3069_v46, %v4611_v60  ;;  %v2347_v20 = vshrl.u32 %v3070_v49, %v4611_v60 }
 0x26d   : > { %v2265_v13 = vsel %vm2263_vm14, %v2264_v17, %v2260_v34  ;;  %v2349_v58 = vshll.u32 %v3070_v49, %v2337_v28  ;;  %v2350_v7 = vshrl.u32 %v3071_v52, %v4611_v60  ;;  %v2346_v22 = vshll.u32 %v3069_v46, %v2337_v28 }
 0x26e   : > { %v2143_v36 = vadd.f32 0.041655596, %v2142_v23  ;;  %v2150_v48 = vadd.f32 0.008332121, %v2149_v11  ;;  %v2266_v12 = vadd.s32 %v2265_v13, %v2261_v43  ;;  %v4630_v10 = vor.u32 %v2341_v29, %v2340_v6 }
 0x26f   : > { %v4632_v25 = vor.u32 %v2344_v56, %v2343_v50  ;;  %v2351_v38 = vor.u32 %v2350_v7, %v2349_v58  ;;  %v2352_v19 = vshll.u32 %v3071_v52, %v2337_v28  ;;  %v2353_v32 = vshrl.u32 %v3072_v55, %v4611_v60 }
 0x270   : > { %v2144_v44 = vmul.f32 %v2143_v36, %v2141_v9  ;;  %v2151_v53 = vmul.f32 %v2150_v48, %v2141_v9  ;;  %v2267_v47 = vadd.s32 536870912, %v2266_v12  ;;  %v2331_v2 = vor.u32 8388608, %v4539_v26 }
 0x271   : > { %v2348_v15 = vor.u32 %v2347_v20, %v2346_v22  ;;  %vm2358_vm15 = vcmp.lt.s32.totalorder %v4614_v14, 4  ;;  %v2482_v5 = vshrl.u32 %v2481_v45, 23  ;;  %v2354_v18 = vor.u32 %v2353_v32, %v2352_v19 }
 0x272   : > { %v2145_v33 = vadd.f32 -0.4999988, %v2144_v44  ;;  %v2152_v37 = vadd.f32 -0.16666654, %v2151_v53  ;;  %v4639_v4 = vshrl.u32 %v2267_v47, 30  ;;  %v2158_v59 = vand.u32 3, %v2157_v62 }
 0x273   : > { %vm2355_vm0 = vcmp.lt.s32.totalorder %v4614_v14, 1  ;;  %vm2357_vm1 = vcmp.lt.s32.totalorder %v4614_v14, 3  ;;  %v2364_v16 = vsel %vm2358_vm15, %v2351_v38, 920167782  ;;  %vm2156_vm2 = vweird.f32 %v4316_v8 }
 0x274   : > { %v2146_v27 = vmul.f32 %v2145_v33, %v2141_v9  ;;  %v2153_v21 = vmul.f32 %v2152_v37, %v2141_v9  ;;  %v2269_v26 = vshll.u32 %v4639_v4, 30  ;;  %v2363_v41 = vsel %vm2355_vm0, %v4630_v10, %v4632_v25 }
 0x275   : > { %vm2356_vm3 = vcmp.lt.s32.totalorder %v4614_v14, 2  ;;  %v2365_v28 = vsel %vm2357_vm1, %v2348_v15, %v2364_v16  ;;  %v2368_v35 = vsel %vm2358_vm15, %v2354_v18, 1326507024  ;;  %v4656_v45 = vshll.u32 %v2331_v2, 8 }
 0x276   : > { %v2147_v34 = vadd.f32 1.0, %v2146_v27  ;;  %v2154_v9 = vadd.f32 1.0, %v2153_v21  ;;  %v2270_v62 = vsub.s32 %v2266_v12, %v2269_v26  ;;  %v2367_v43 = vsel %vm2355_vm0, %v4632_v25, %v2348_v15 }
 0x277   : > { %vm2159_vm4 = vcmp.lt.s32.totalorder %v2158_v59, 2  ;;  %v2366_v17 = vsel %vm2356_vm3, %v2363_v41, %v2365_v28  ;;  %v2369_v6 = vsel %vm2357_vm1, %v2351_v38, %v2368_v35  ;;  %v4667_v50 = vand.u32 8388607, %v2478_v61 }
 0x278   : > { %v2155_v23 = vmul.f32 %v2154_v9, %v2139_v31  ;;  %v2164_v11 = vxor.u32 2147483648, %v2147_v34  ;;  %vm2271_vm5 = vcmp.lt.s32.totalorder %v2270_v62, 0  ;;  %v2272_v29 = vsub.s32 0, %v2270_v62 }
 0x279   : > { %vm2160_vm6 = vcmp.eq.s32.totalorder %v2158_v59, 0  ;;  %vm2163_vm7 = vcmp.eq.s32.totalorder %v2158_v59, 2  ;;  %v2370_v56 = vsel %vm2356_vm3, %v2367_v43, %v2369_v6  ;;  %v2397_v13 = vshrl.u32 %v2366_v17, 16 }
 0x27a   : > { %v2161_v20 = vxor.u32 2147483648, %v2155_v23  ;;  %v2273_v58 = vsel %vm2271_vm5, %v2272_v29, %v2270_v62  ;;  %v2372_v7 = vand.u32 65535, %v4656_v45  ;;  %v2374_v36 = vand.u32 65535, %v2370_v56 }
 0x27b   : > { %v2274_v48 = vclz %v2273_v58  ;;  %v2373_v12 = vshrl.u32 %v4656_v45, 16  ;;  %v2375_v22 = vshrl.u32 %v2370_v56, 16  ;;  %v2396_v38 = vand.u32 65535, %v2366_v17 }
 0x27c   : > { %v2162_v31 = vsel %vm2160_vm6, %v2147_v34, %v2161_v20  ;;  %v2165_v19 = vsel %vm2163_vm7, %v2164_v11, %v2155_v23  ;;  %v2262_v44 = vadd.s32 %v4602_v39, %v4609_v30  ;;  %v2931_v53 = vadd.s32 4294967169, %v2482_v5 }
 0x27d   : > { %v2166_v47 = vsel %vm2159_vm4, %v2162_v31, %v2165_v19  ;;  %v2926_v32 = vadd.s32 4294967294, %v2274_v48  ;;  %v2378_v2 = vmul.u32 %v2374_v36, %v2373_v12  ;;  %v2399_v33 = vmul.u32 %v2397_v13, %v2372_v7 }
 0x27e   : > { %v2167_v37 = vsel %vm2156_vm2, nan, %v2166_v47  ;;  %v2339_v18 = vshrl.u32 %v3067_v40, %v4611_v60  ;;  %v2360_v16 = vsel %vm2358_vm15, %v2348_v15, 2102212464  ;;  %v2377_v27 = vmul.u32 %v2375_v22, %v2372_v7 }
 0x27f   : > { %vm2927_vm8 = vcmp.lt.s32.totalorder %v2926_v32, 0  ;;  %v2292_v21 = vsub.s32 4, %v4639_v4  ;;  %v2398_v39 = vmul.u32 %v2396_v38, %v2372_v7  ;;  %v2400_v30 = vmul.u32 %v2396_v38, %v2373_v12  ;;  %2799 = vst [vmem:[%s3458_s8 + $0x58] sm:$0xff] %v2167_v37 }
 0x280   : > { %vm2170_vm9 = vcmp.lt.s32.totalorder %v4466_v3, 0  ;;  %v2277_v5 = vsel %vm2927_vm8, 0, %v2926_v32  ;;  %v2376_v59 = vmul.u32 %v2374_v36, %v2372_v7  ;;  %v2379_v26 = vmul.u32 %v2375_v22, %v2373_v12 }
 0x281   : > { %v2380_v8 = vshll.u32 %v2377_v27, 16  ;;  %v2278_v41 = vsub.s32 32, %v2277_v5  ;;  %v2282_v28 = vsub.s32 4294967266, %v2277_v5  ;;  %v2382_v35 = vshll.u32 %v2378_v2, 16 }
 0x282   : > { %v2402_v60 = vshll.u32 %v2399_v33, 16  ;;  %v2279_v34 = vshll.u32 %v2270_v62, %v2277_v5  ;;  %v2401_v9 = vmul.u32 %v2397_v13, %v2373_v12  ;;  %v2404_v23 = vshll.u32 %v2400_v30, 16 }
 0x283   : > { %vm2384_vm10 = vc.u32 %v2376_v59, %v2380_v8  ;;  %v2386_v15 = vadd.s32 %v2380_v8, %v2376_v59  ;;  %v2280_v43 = vshrl.u32 %v2262_v44, %v2278_v41  ;;  %v2283_v17 = vadd.s32 127, %v2282_v28 }
 0x284   : > { %v2385_v6 = vsel %vm2384_vm10, 1, %v3066_v0  ;;  %vm2406_vm11 = vc.u32 %v2398_v39, %v2402_v60  ;;  %v2408_v29 = vadd.s32 %v2402_v60, %v2398_v39  ;;  %v2381_v36 = vshrl.u32 %v2377_v27, 16 }
 0x285   : > { %v2387_v11 = vadd.s32 %v2385_v6, %v2379_v26  ;;  %vm2388_vm13 = vc.u32 %v2386_v15, %v2382_v35  ;;  %v2281_v56 = vor.u32 %v2280_v43, %v2279_v34  ;;  %v2284_v20 = vshll.u32 %v2283_v17, 23 }
 0x286   : > { %v2389_v58 = vsel %vm2388_vm13, 1, %v3066_v0  ;;  %v2407_v7 = vsel %vm2406_vm11, 1, %v3066_v0  ;;  %vm2410_vm12 = vc.u32 %v2408_v29, %v2404_v23  ;;  %v2359_v12 = vsel %vm2355_vm0, %v2339_v18, %v4630_v10  ;;  %v267_v18 = vpop.permute.xlu0 %266 }
 0x287   : > { %v2391_v62 = vadd.s32 %v2389_v58, %v2387_v11  ;;  %v2409_v48 = vadd.s32 %v2407_v7, %v2401_v9  ;;  %v2285_v13 = vor.u32 4788187, %v2284_v20  ;;  %v2383_v22 = vshrl.u32 %v2378_v2, 16 }
 0x288   : > { %v2411_v38 = vsel %vm2410_vm12, 1, %v3066_v0  ;;  %v2403_v19 = vshrl.u32 %v2399_v33, 16  ;;  %v2488_v47 = vadd.s32 1, %v2931_v53  ;;  %v2288_v37 = vcvt.s32.f32 %v2281_v56 }
 0x289   : > { %v2392_v31 = vadd.s32 %v2391_v62, %v2381_v36  ;;  %v2413_v44 = vadd.s32 %v2411_v38, %v2409_v48  ;;  %v2286_v32 = vand.u32 2147483647, %v2285_v13  ;;  %v2293_v27 = vsel %vm2170_vm9, %v2292_v21, %v4639_v4 }
 0x28a   : > { %v2361_v39 = vsel %vm2357_vm1, %v4632_v25, %v2360_v16  ;;  %v2405_v10 = vshrl.u32 %v2400_v30, 16  ;;  %vm2489_vm14 = vcmp.gt.s32.totalorder %v2488_v47, 0  ;;  %vm4702_vm15 = vcmp.le.f32.partialorder %v2168_v51, 0.7853982 }
 0x28b   : > { %v4698_v5 = vadd.s32 %v2392_v31, %v2383_v22  ;;  %v2414_v2 = vadd.s32 %v2413_v44, %v2403_v19  ;;  %v2289_v33 = vmul.f32 %v2288_v37, %v2286_v32  ;;  %v4706_v59 = vadd.s32 %v2408_v29, %v2404_v23 }
 0x28c   : > { %v2490_v4 = vsel %vm2489_vm14, %v2488_v47, 0  ;;  %v2295_v21 = vsel %vm4702_vm15, 0, %v2293_v27  ;;  %v2362_v25 = vsel %vm2356_vm3, %v2359_v12, %v2361_v39  ;;  %v287_v51 = vmul.f32 %v4507_v63, %v267_v18 }
 0x28d   : > { %v2415_v16 = vadd.s32 %v2414_v2, %v2405_v10  ;;  %v2290_v30 = vxor.u32 2147483648, %v2289_v33  ;;  %vm2418_vm0 = vc.u32 %v4698_v5, %v4706_v59  ;;  %v2492_v26 = vand.u32 31, %v2490_v4 }
 0x28e   : > { %v2486_v41 = vor.u32 8388608, %v4667_v50  ;;  %v2312_v35 = vadd.s32 3, %v2295_v21  ;;  %v2416_v60 = vmul.u32 %v4656_v45, %v2362_v25  ;;  %v4724_v9 = vshrl.u32 %v2490_v4, 5 }
 0x28f   : > { %v2419_v8 = vadd.s32 1, %v2415_v16  ;;  %v2291_v28 = vsel %vm2170_vm9, %v2290_v30, %v2289_v33  ;;  %v4719_v34 = vsub.s32 32, %v2492_v26  ;;  %v2495_v63 = vshll.u32 %v3067_v40, %v2492_v26 }
 0x290   : > { %v2294_v14 = vsel %vm4702_vm15, %v4466_v3, %v2291_v28  ;;  %v2498_v50 = vshll.u32 %v3068_v42, %v2492_v26  ;;  %v2504_v6 = vshll.u32 %v3070_v49, %v2492_v26  ;;  %v2501_v7 = vshll.u32 %v3069_v46, %v2492_v26 }
 0x291   : > { %v2420_v15 = vsel %vm2418_vm0, %v2419_v8, %v2415_v16  ;;  %v2296_v43 = vmul.f32 %v2294_v14, %v2294_v14  ;;  %v2496_v45 = vshrl.u32 %v3068_v42, %v4719_v34  ;;  %v2499_v23 = vshrl.u32 %v3069_v46, %v4719_v34 }
 0x292   : > { %v2421_v17 = vadd.s32 %v2420_v15, %v2416_v60  ;;  %v2502_v11 = vshrl.u32 %v3070_v49, %v4719_v34  ;;  %v2505_v29 = vshrl.u32 %v3071_v52, %v4719_v34  ;;  %v2507_v48 = vshll.u32 %v3071_v52, %v2492_v26 }
 0x293   : > { %v2297_v56 = vmul.f32 -0.001358992, %v2296_v43  ;;  %v2304_v20 = vmul.f32 -0.00019511016, %v2296_v43  ;;  %v4738_v36 = vor.u32 %v2499_v23, %v2498_v50  ;;  %v2508_v13 = vshrl.u32 %v3072_v55, %v4719_v34 }
 0x294   : > { %v2422_v58 = vadd.s32 536870912, %v2421_v17  ;;  %v2506_v62 = vor.u32 %v2505_v29, %v2504_v6  ;;  %v4745_v31 = vor.u32 %v2502_v11, %v2501_v7  ;;  %v2313_v19 = vand.u32 3, %v2312_v35 }
 0x295   : > { %v2298_v12 = vadd.f32 0.041655596, %v2297_v56  ;;  %v2305_v22 = vadd.f32 0.008332121, %v2304_v20  ;;  %v4747_v44 = vor.u32 %v2496_v45, %v2495_v63  ;;  %v2509_v47 = vor.u32 %v2508_v13, %v2507_v48 }
 0x296   : > { %v4743_v38 = vshrl.u32 %v2422_v58, 30  ;;  %v4749_v32 = vshll.u32 %v2486_v41, 8  ;;  %vm2513_vm1 = vcmp.lt.s32.totalorder %v4724_v9, 4  ;;  %vm2510_vm2 = vcmp.lt.s32.totalorder %v4724_v9, 1 }
 0x297   : > { %v2299_v37 = vmul.f32 %v2298_v12, %v2296_v43  ;;  %v2306_v27 = vmul.f32 %v2305_v22, %v2296_v43  ;;  %vm2512_vm3 = vcmp.lt.s32.totalorder %v4724_v9, 3  ;;  %v2519_v10 = vsel %vm2513_vm1, %v2506_v62, 920167782 }
 0x298   : > { %v2424_v39 = vshll.u32 %v4743_v38, 30  ;;  %v2523_v2 = vsel %vm2513_vm1, %v2509_v47, 1326507024  ;;  %v2522_v4 = vsel %vm2510_vm2, %v4738_v36, %v4745_v31  ;;  %vm2511_vm4 = vcmp.lt.s32.totalorder %v4724_v9, 2 }
 0x299   : > { %v2300_v18 = vadd.f32 -0.4999988, %v2299_v37  ;;  %v2307_v53 = vadd.f32 -0.16666654, %v2306_v27  ;;  %v2518_v21 = vsel %vm2510_vm2, %v4747_v44, %v4738_v36  ;;  %v2520_v25 = vsel %vm2512_vm3, %v4745_v31, %v2519_v10 }
 0x29a   : > { %v2425_v33 = vsub.s32 %v2421_v17, %v2424_v39  ;;  %v2524_v16 = vsel %vm2512_vm3, %v2506_v62, %v2523_v2  ;;  %v4774_v41 = vadd.f32 %v4463_v54, %v287_v51  ;;  %vm2311_vm6 = vweird.f32 %v4466_v3 }
 0x29b   : > { %v2301_v30 = vmul.f32 %v2300_v18, %v2296_v43  ;;  %v2308_v26 = vmul.f32 %v2307_v53, %v2296_v43  ;;  %v2525_v28 = vsel %vm2511_vm4, %v2522_v4, %v2524_v16  ;;  %v2521_v50 = vsel %vm2511_vm4, %v2518_v21, %v2520_v25 }
 0x29c   : > { %vm2426_vm5 = vcmp.lt.s32.totalorder %v2425_v33, 0  ;;  %v2427_v8 = vsub.s32 0, %v2425_v33  ;;  %v2529_v63 = vand.u32 65535, %v2525_v28  ;;  %v2528_v43 = vshrl.u32 %v4749_v32, 16 }
 0x29d   : > { %v2302_v35 = vadd.f32 1.0, %v2301_v30  ;;  %v2309_v60 = vadd.f32 1.0, %v2308_v26  ;;  %v2530_v6 = vshrl.u32 %v2525_v28, 16  ;;  %vm2314_vm7 = vcmp.lt.s32.totalorder %v2313_v19, 2 }
 0x29e   : > { %v2428_v15 = vsel %vm2426_vm5, %v2427_v8, %v2425_v33  ;;  %v2527_v51 = vand.u32 65535, %v4749_v32  ;;  %vm2315_vm8 = vcmp.eq.s32.totalorder %v2313_v19, 0  ;;  %vm2318_vm9 = vcmp.eq.s32.totalorder %v2313_v19, 2 }
 0x29f   : > { %v2429_v17 = vclz %v2428_v15  ;;  %v2310_v45 = vmul.f32 %v2309_v60, %v2294_v14  ;;  %v2319_v54 = vxor.u32 2147483648, %v2302_v35  ;;  %v2533_v11 = vmul.u32 %v2529_v63, %v2528_v43 }
 0x2a0   : > { %v2417_v56 = vadd.s32 %v4706_v59, %v4698_v5  ;;  %v2532_v20 = vmul.u32 %v2530_v6, %v2527_v51  ;;  %v2551_v58 = vand.u32 65535, %v2521_v50  ;;  %v2531_v62 = vmul.u32 %v2529_v63, %v2527_v51 }
 0x2a1   : > { %v2929_v23 = vadd.s32 4294967294, %v2429_v17  ;;  %v2316_v29 = vxor.u32 2147483648, %v2310_v45  ;;  %v2320_v7 = vsel %vm2318_vm9, %v2319_v54, %v2310_v45  ;;  %v2552_v48 = vshrl.u32 %v2521_v50, 16 }
 0x2a2   : > { %v2534_v12 = vmul.u32 %v2530_v6, %v2528_v43  ;;  %v2535_v22 = vshll.u32 %v2532_v20, 16  ;;  %v2537_v39 = vshll.u32 %v2533_v11, 16  ;;  %v2553_v25 = vmul.u32 %v2551_v58, %v2527_v51 }
 0x2a3   : > { %vm2930_vm10 = vcmp.lt.s32.totalorder %v2929_v23, 0  ;;  %v2317_v13 = vsel %vm2315_vm8, %v2302_v35, %v2316_v29  ;;  %v2554_v4 = vmul.u32 %v2552_v48, %v2527_v51  ;;  %v2555_v19 = vmul.u32 %v2551_v58, %v2528_v43 }
 0x2a4   : > { %v2432_v14 = vsel %vm2930_vm10, 0, %v2929_v23  ;;  %v2321_v47 = vsel %vm2314_vm7, %v2317_v13, %v2320_v7  ;;  %vm2539_vm13 = vc.u32 %v2531_v62, %v2535_v22  ;;  %v2541_v59 = vadd.s32 %v2535_v22, %v2531_v62 }
 0x2a5   : > { %v2433_v37 = vsub.s32 32, %v2432_v14  ;;  %v2437_v27 = vsub.s32 4294967266, %v2432_v14  ;;  %v2322_v10 = vsel %vm2311_vm6, nan, %v2321_v47  ;;  %v2434_v5 = vshll.u32 %v2425_v33, %v2432_v14 }
 0x2a6   : > { %v2540_v53 = vsel %vm2539_vm13, 1, %v3066_v0  ;;  %2800 = vst [vmem:[%s3458_s8 + $0x60] sm:$0xff] %v2322_v10  ;;  %vm2543_vm11 = vc.u32 %v2541_v59, %v2537_v39  ;;  %v2557_v8 = vshll.u32 %v2554_v4, 16  ;;  %v2494_v3 = vshrl.u32 %v3067_v40, %v4719_v34 }
 0x2a7   : > { %v2435_v2 = vshrl.u32 %v2417_v56, %v2433_v37  ;;  %v2438_v18 = vadd.s32 127, %v2437_v27  ;;  %v2542_v21 = vadd.s32 %v2540_v53, %v2534_v12  ;;  %v2544_v26 = vsel %vm2543_vm11, 1, %v3066_v0 }
 0x2a8   : > { %v2536_v33 = vshrl.u32 %v2532_v20, 16  ;;  %v2556_v35 = vmul.u32 %v2552_v48, %v2528_v43  ;;  %v2559_v15 = vshll.u32 %v2555_v19, 16  ;;  %vm2561_vm12 = vc.u32 %v2553_v25, %v2557_v8 }
 0x2a9   : > { %v2436_v16 = vor.u32 %v2435_v2, %v2434_v5  ;;  %v2439_v30 = vshll.u32 %v2438_v18, 23  ;;  %v2546_v28 = vadd.s32 %v2544_v26, %v2542_v21  ;;  %v2563_v63 = vadd.s32 %v2557_v8, %v2553_v25 }
 0x2aa   : > { %v2447_v17 = vsub.s32 4, %v4743_v38  ;;  %v2515_v50 = vsel %vm2513_vm1, %v4745_v31, 2102212464  ;;  %v2562_v45 = vsel %vm2561_vm12, 1, %v3066_v0  ;;  %vm2325_vm15 = vcmp.lt.s32.totalorder %v4491_v24, 0 }
 0x2ab   : > { %v2440_v60 = vor.u32 4788187, %v2439_v30  ;;  %v2547_v6 = vadd.s32 %v2546_v28, %v2536_v33  ;;  %v2443_v51 = vcvt.s32.f32 %v2436_v16  ;;  %v2564_v23 = vadd.s32 %v2562_v45, %v2556_v35 }
 0x2ac   : > { %vm2565_vm14 = vc.u32 %v2563_v63, %v2559_v15  ;;  %v2538_v34 = vshrl.u32 %v2533_v11, 16  ;;  %v2636_v29 = vand.u32 2139095040, %v4774_v41  ;;  %v2514_v20 = vsel %vm2510_vm2, %v2494_v3, %v4747_v44 }
 0x2ad   : > { %v2441_v54 = vand.u32 2147483647, %v2440_v60  ;;  %v2566_v43 = vsel %vm2565_vm14, 1, %v3066_v0  ;;  %v2558_v31 = vshrl.u32 %v2554_v4, 16  ;;  %v2448_v7 = vsel %vm2325_vm15, %v2447_v17, %v4743_v38 }
 0x2ae   : > { %v2568_v58 = vadd.s32 %v2566_v43, %v2564_v23  ;;  %v2516_v62 = vsel %vm2512_vm3, %v4738_v36, %v2515_v50  ;;  %v4810_v11 = vadd.s32 %v2547_v6, %v2538_v34  ;;  %v2637_v48 = vshrl.u32 %v2636_v29, 23 }
 0x2af   : > { %v2444_v56 = vmul.f32 %v2443_v51, %v2441_v54  ;;  %v2560_v14 = vshrl.u32 %v2555_v19, 16  ;;  %vm2324_vm0 = vcmp.le.f32.partialorder %v2323_v1, 0.7853982  ;;  %v4814_v44 = vadd.s32 %v2563_v63, %v2559_v15 }
 0x2b0   : > { %v2569_v12 = vadd.s32 %v2568_v58, %v2558_v31  ;;  %v2934_v22 = vadd.s32 4294967169, %v2637_v48  ;;  %v2450_v38 = vsel %vm2324_vm0, 0, %v2448_v7  ;;  %v2517_v37 = vsel %vm2511_vm4, %v2514_v20, %v2516_v62 }
 0x2b1   : > { %v2445_v13 = vxor.u32 2147483648, %v2444_v56  ;;  %vm2573_vm1 = vc.u32 %v4810_v11, %v4814_v44  ;;  %v2467_v1 = vadd.s32 3, %v2450_v38  ;;  %v2571_v59 = vmul.u32 %v4749_v32, %v2517_v37 }
 0x2b2   : > { %v2570_v36 = vadd.s32 %v2569_v12, %v2560_v14  ;;  %v2643_v39 = vadd.s32 1, %v2934_v22  ;;  %v2633_v2 = vand.u32 2147483647, %v4774_v41  ;;  %vm2466_vm5 = vweird.f32 %v4491_v24 }
 0x2b3   : > { %v2446_v47 = vsel %vm2325_vm15, %v2445_v13, %v2444_v56  ;;  %v2468_v30 = vand.u32 3, %v2467_v1 }
 0x2b4   : > { %v2449_v27 = vsel %vm2324_vm0, %v4491_v24, %v2446_v47  ;;  %v2574_v5 = vadd.s32 1, %v2570_v36  ;;  %vm2644_vm2 = vcmp.gt.s32.totalorder %v2643_v39, 0  ;;  %v2640_v8 = vand.u32 8388607, %v2633_v2 }
 0x2b5   : > { %v2451_v10 = vmul.f32 %v2449_v27, %v2449_v27  ;;  %v2645_v9 = vsel %vm2644_vm2, %v2643_v39, 0  ;;  %vm2470_vm3 = vcmp.eq.s32.totalorder %v2468_v30, 0  ;;  %vm2469_vm4 = vcmp.lt.s32.totalorder %v2468_v30, 2 }
 0x2b6   : > { %v2575_v4 = vsel %vm2573_vm1, %v2574_v5, %v2570_v36  ;;  %v2647_v25 = vand.u32 31, %v2645_v9  ;;  %v2641_v63 = vor.u32 8388608, %v2640_v8  ;;  %v4832_v17 = vshrl.u32 %v2645_v9, 5 }
 0x2b7   : > { %v2452_v18 = vmul.f32 -0.001358992, %v2451_v10  ;;  %v2459_v53 = vmul.f32 -0.00019511016, %v2451_v10  ;;  %v2576_v21 = vadd.s32 %v2575_v4, %v2571_v59  ;;  %vm2473_vm7 = vcmp.eq.s32.totalorder %v2468_v30, 2 }
 0x2b8   : > { %v4827_v28 = vsub.s32 32, %v2647_v25  ;;  %v2650_v50 = vshll.u32 %v3067_v40, %v2647_v25  ;;  %v2653_v31 = vshll.u32 %v3068_v42, %v2647_v25  ;;  %v2656_v58 = vshll.u32 %v3069_v46, %v2647_v25 }
 0x2b9   : > { %v2453_v19 = vadd.f32 0.041655596, %v2452_v18  ;;  %v2460_v16 = vadd.f32 0.008332121, %v2459_v53  ;;  %v2577_v26 = vadd.s32 536870912, %v2576_v21  ;;  %v2659_v62 = vshll.u32 %v3070_v49, %v2647_v25 }
 0x2ba   : > { %v2651_v54 = vshrl.u32 %v3068_v42, %v4827_v28  ;;  %v2654_v51 = vshrl.u32 %v3069_v46, %v4827_v28  ;;  %v2657_v34 = vshrl.u32 %v3070_v49, %v4827_v28  ;;  %v2660_v43 = vshrl.u32 %v3071_v52, %v4827_v28 }
 0x2bb   : > { %v2454_v3 = vmul.f32 %v2453_v19, %v2451_v10  ;;  %v2461_v33 = vmul.f32 %v2460_v16, %v2451_v10  ;;  %v4829_v32 = vshrl.u32 %v2577_v26, 30  ;;  %v2663_v29 = vshrl.u32 %v3072_v55, %v4827_v28 }
 0x2bc   : > { %v2662_v48 = vshll.u32 %v3071_v52, %v2647_v25  ;;  %v4850_v12 = vor.u32 %v2651_v54, %v2650_v50  ;;  %v4852_v22 = vor.u32 %v2654_v51, %v2653_v31  ;;  %v2658_v55 = vor.u32 %v2657_v34, %v2656_v58 }
 0x2bd   : > { %v2455_v35 = vadd.f32 -0.4999988, %v2454_v3  ;;  %v2462_v60 = vadd.f32 -0.16666654, %v2461_v33  ;;  %v2579_v15 = vshll.u32 %v4829_v32, 30  ;;  %v2661_v38 = vor.u32 %v2660_v43, %v2659_v62 }
 0x2be   : > { %v2664_v37 = vor.u32 %v2663_v29, %v2662_v48  ;;  %v4854_v46 = vshll.u32 %v2641_v63, 8  ;;  %vm2665_vm8 = vcmp.lt.s32.totalorder %v4832_v17, 1  ;;  %vm2666_vm9 = vcmp.lt.s32.totalorder %v4832_v17, 2 }
 0x2bf   : > { %v2456_v6 = vmul.f32 %v2455_v35, %v2451_v10  ;;  %v2463_v45 = vmul.f32 %v2462_v60, %v2451_v10  ;;  %v2580_v23 = vsub.s32 %v2576_v21, %v2579_v15  ;;  %vm2667_vm10 = vcmp.lt.s32.totalorder %v4832_v17, 3 }
 0x2c0   : > { %vm2668_vm13 = vcmp.lt.s32.totalorder %v4832_v17, 4  ;;  %v2673_v39 = vsel %vm2665_vm8, %v4850_v12, %v4852_v22  ;;  %v2677_v1 = vsel %vm2665_vm8, %v4852_v22, %v2658_v55  ;;  %v2572_v9 = vadd.s32 %v4814_v44, %v4810_v11 }
 0x2c1   : > { %v2457_v56 = vadd.f32 1.0, %v2456_v6  ;;  %v2464_v20 = vadd.f32 1.0, %v2463_v45  ;;  %vm2581_vm6 = vcmp.lt.s32.totalorder %v2580_v23, 0  ;;  %v2582_v7 = vsub.s32 0, %v2580_v23 }
 0x2c2   : > { %v2674_v5 = vsel %vm2668_vm13, %v2661_v38, 920167782  ;;  %v2678_v59 = vsel %vm2668_vm13, %v2664_v37, 1326507024  ;;  %v2683_v30 = vshrl.u32 %v4854_v46, 16  ;;  %v2682_v8 = vand.u32 65535, %v4854_v46 }
 0x2c3   : > { %v2465_v13 = vmul.f32 %v2464_v20, %v2449_v27  ;;  %v2474_v14 = vxor.u32 2147483648, %v2457_v56  ;;  %v2583_v47 = vsel %vm2581_vm6, %v2582_v7, %v2580_v23  ;;  %v2675_v53 = vsel %vm2667_vm10, %v2658_v55, %v2674_v5 }
 0x2c4   : > { %v2584_v42 = vclz %v2583_v47  ;;  %v2679_v4 = vsel %vm2667_vm10, %v2661_v38, %v2678_v59  ;;  %v2676_v25 = vsel %vm2666_vm9, %v2673_v39, %v2675_v53  ;;  %v2670_v47 = vsel %vm2668_vm13, %v2658_v55, 2102212464 }
 0x2c5   : > { %v2471_v36 = vxor.u32 2147483648, %v2465_v13  ;;  %v2475_v52 = vsel %vm2473_vm7, %v2474_v14, %v2465_v13  ;;  %v2680_v19 = vsel %vm2666_vm9, %v2677_v1, %v2679_v4  ;;  %v2706_v33 = vand.u32 65535, %v2676_v25 }
 0x2c6   : > { %v2932_v27 = vadd.s32 4294967294, %v2584_v42  ;;  %v2684_v26 = vand.u32 65535, %v2680_v19  ;;  %v2685_v3 = vshrl.u32 %v2680_v19, 16  ;;  %v2707_v35 = vshrl.u32 %v2676_v25, 16 }
 0x2c7   : > { %v2472_v49 = vsel %vm2470_vm3, %v2457_v56, %v2471_v36  ;;  %v2708_v43 = vmul.u32 %v2706_v33, %v2682_v8  ;;  %v2710_v29 = vmul.u32 %v2706_v33, %v2683_v30  ;;  %vm2480_vm1 = vcmp.lt.s32.totalorder %v4511_v57, 0 }
 0x2c8   : > { %v2476_v10 = vsel %vm2469_vm4, %v2472_v49, %v2475_v52  ;;  %vm2933_vm11 = vcmp.lt.s32.totalorder %v2932_v27, 0  ;;  %v2688_v15 = vmul.u32 %v2684_v26, %v2683_v30  ;;  %v2687_v63 = vmul.u32 %v2685_v3, %v2682_v8 }
 0x2c9   : > { %v2477_v18 = vsel %vm2466_vm5, nan, %v2476_v10  ;;  %v2587_v21 = vsel %vm2933_vm11, 0, %v2932_v27  ;;  %v2709_v50 = vmul.u32 %v2707_v35, %v2682_v8  ;;  %v2686_v54 = vmul.u32 %v2684_v26, %v2682_v8 }
 0x2ca   : > { %2801 = vst [vmem:[%s3458_s8 + $0x68] sm:$0xff] %v2477_v18  ;;  %v2588_v24 = vsub.s32 32, %v2587_v21  ;;  %v2592_v16 = vsub.s32 4294967266, %v2587_v21  ;;  %v2589_v60 = vshll.u32 %v2580_v23, %v2587_v21  ;;  %v2689_v51 = vmul.u32 %v2685_v3, %v2683_v30 }
 0x2cb   : > { %v2690_v34 = vshll.u32 %v2687_v63, 16  ;;  %v2692_v20 = vshll.u32 %v2688_v15, 16  ;;  %v2711_v31 = vmul.u32 %v2707_v35, %v2683_v30  ;;  %v2712_v58 = vshll.u32 %v2709_v50, 16 }
 0x2cc   : > { %v2590_v11 = vshrl.u32 %v2572_v9, %v2588_v24  ;;  %v2593_v44 = vadd.s32 127, %v2592_v16  ;;  %v2714_v23 = vshll.u32 %v2710_v29, 16  ;;  %v2649_v52 = vshrl.u32 %v3067_v40, %v4827_v28 }
 0x2cd   : > { %vm2694_vm12 = vc.u32 %v2686_v54, %v2690_v34  ;;  %v2696_v62 = vadd.s32 %v2690_v34, %v2686_v54  ;;  %vm2716_vm14 = vc.u32 %v2708_v43, %v2712_v58  ;;  %v2718_v14 = vadd.s32 %v2712_v58, %v2708_v43 }
 0x2ce   : > { %v2591_v6 = vor.u32 %v2590_v11, %v2589_v60  ;;  %v2594_v45 = vshll.u32 %v2593_v44, 23  ;;  %v2695_v13 = vsel %vm2694_vm12, 1, %v3066_v0  ;;  %v2717_v37 = vsel %vm2716_vm14, 1, %v3066_v0 }
 0x2cf   : > { %v2697_v38 = vadd.s32 %v2695_v13, %v2689_v51  ;;  %vm2698_vm15 = vc.u32 %v2696_v62, %v2692_v20  ;;  %v2719_v49 = vadd.s32 %v2717_v37, %v2711_v31  ;;  %vm2720_vm0 = vc.u32 %v2718_v14, %v2714_v23 }
 0x2d0   : > { %v2595_v56 = vor.u32 4788187, %v2594_v45  ;;  %v2598_v7 = vcvt.s32.f32 %v2591_v6  ;;  %v2699_v42 = vsel %vm2698_vm15, 1, %v3066_v0  ;;  %v2691_v27 = vshrl.u32 %v2687_v63, 16 }
 0x2d1   : > { %v2701_v39 = vadd.s32 %v2699_v42, %v2697_v38  ;;  %v2721_v10 = vsel %vm2720_vm0, 1, %v3066_v0  ;;  %v2713_v55 = vshrl.u32 %v2709_v50, 16  ;;  %v2669_v59 = vsel %vm2665_vm8, %v2649_v52, %v4850_v12 }
 0x2d2   : > { %v2596_v48 = vand.u32 2147483647, %v2595_v56  ;;  %v2723_v1 = vadd.s32 %v2721_v10, %v2719_v49  ;;  %v2671_v18 = vsel %vm2667_vm10, %v4852_v22, %v2670_v47  ;;  %v2693_v53 = vshrl.u32 %v2688_v15, 16 }
 0x2d3   : > { %v2702_v4 = vadd.s32 %v2701_v39, %v2691_v27  ;;  %vm4905_vm2 = vcmp.le.f32.partialorder %v2478_v61, 0.7853982  ;;  %v2715_v28 = vshrl.u32 %v2710_v29, 16  ;;  %v2602_v21 = vsub.s32 4, %v4829_v32 }
 0x2d4   : > { %v2599_v36 = vmul.f32 %v2598_v7, %v2596_v48  ;;  %v2724_v9 = vadd.s32 %v2723_v1, %v2713_v55  ;;  %v2722_v25 = vadd.s32 %v2718_v14, %v2714_v23  ;;  %v2672_v61 = vsel %vm2666_vm9, %v2669_v59, %v2671_v18 }
 0x2d5   : > { %v2703_v22 = vadd.s32 %v2702_v4, %v2693_v53  ;;  %v2603_v8 = vsel %vm2480_vm1, %v2602_v21, %v4829_v32  ;;  %v2726_v3 = vmul.u32 %v4854_v46, %v2672_v61  ;;  %vm2621_vm8 = vweird.f32 %v4511_v57 }
 0x2d6   : > { %v2600_v5 = vxor.u32 2147483648, %v2599_v36  ;;  %v2725_v24 = vadd.s32 %v2724_v9, %v2715_v28  ;;  %v2605_v44 = vsel %vm4905_vm2, 0, %v2603_v8  ;;  %vm2635_vm10 = vcmp.lt.s32.totalorder %v4774_v41, 0 }
 0x2d7   : > { %vm2728_vm3 = vc.u32 %v2703_v22, %v2722_v25  ;;  %v2622_v45 = vadd.s32 3, %v2605_v44  ;;  %vm2634_vm13 = vcmp.le.f32.partialorder %v2633_v2, 0.7853982  ;;  %vm2776_vm15 = vweird.f32 %v4774_v41 }
 0x2d8   : > { %v2601_v0 = vsel %vm2480_vm1, %v2600_v5, %v2599_v36  ;;  %v2729_v26 = vadd.s32 1, %v2725_v24  ;;  %v2727_v36 = vadd.s32 %v2722_v25, %v2703_v22 }
 0x2d9   : > { %v2604_v12 = vsel %vm4905_vm2, %v4511_v57, %v2601_v0  ;;  %v2623_v46 = vand.u32 3, %v2622_v45 }
 0x2da   : > { %v2606_v19 = vmul.f32 %v2604_v12, %v2604_v12  ;;  %v2730_v60 = vsel %vm2728_vm3, %v2729_v26, %v2725_v24 }
 0x2db   : > { %v2731_v11 = vadd.s32 %v2730_v60, %v2726_v3  ;;  %vm2625_vm5 = vcmp.eq.s32.totalorder %v2623_v46, 0  ;;  %vm2628_vm6 = vcmp.eq.s32.totalorder %v2623_v46, 2  ;;  %vm2624_vm7 = vcmp.lt.s32.totalorder %v2623_v46, 2 }
 0x2dc   : > { %v2607_v16 = vmul.f32 -0.001358992, %v2606_v19  ;;  %v2614_v30 = vmul.f32 -0.00019511016, %v2606_v19 }
 0x2dd   : > { %v2732_v63 = vadd.s32 536870912, %v2731_v11 }
 0x2de   : > { %v2608_v33 = vadd.f32 0.041655596, %v2607_v16  ;;  %v2615_v35 = vadd.f32 0.008332121, %v2614_v30 }
 0x2df   : > { %v2733_v54 = vshrl.u32 %v2732_v63, 30 }
 0x2e0   : > { %v2609_v17 = vmul.f32 %v2608_v33, %v2606_v19  ;;  %v2616_v15 = vmul.f32 %v2615_v35, %v2606_v19 }
 0x2e1   : > { %v2734_v43 = vshll.u32 %v2733_v54, 30  ;;  %v2757_v4 = vsub.s32 4, %v2733_v54 }
 0x2e2   : > { %v2610_v50 = vadd.f32 -0.4999988, %v2609_v17  ;;  %v2617_v6 = vadd.f32 -0.16666654, %v2616_v15 }
 0x2e3   : > { %v2735_v56 = vsub.s32 %v2731_v11, %v2734_v43  ;;  %v2758_v21 = vsel %vm2635_vm10, %v2757_v4, %v2733_v54 }
 0x2e4   : > { %v2611_v51 = vmul.f32 %v2610_v50, %v2606_v19  ;;  %v2618_v34 = vmul.f32 %v2617_v6, %v2606_v19  ;;  %v2760_v25 = vsel %vm2634_vm13, 0, %v2758_v21 }
 0x2e5   : > { %vm2736_vm4 = vcmp.lt.s32.totalorder %v2735_v56, 0  ;;  %v2737_v58 = vsub.s32 0, %v2735_v56  ;;  %v2777_v30 = vadd.s32 3, %v2760_v25 }
 0x2e6   : > { %v2612_v32 = vadd.f32 1.0, %v2611_v51  ;;  %v2619_v29 = vadd.f32 1.0, %v2618_v34 }
 0x2e7   : > { %v2738_v62 = vsel %vm2736_vm4, %v2737_v58, %v2735_v56  ;;  %v2778_v33 = vand.u32 3, %v2777_v30 }
 0x2e8   : > { %v2620_v20 = vmul.f32 %v2619_v29, %v2604_v12  ;;  %v2629_v31 = vxor.u32 2147483648, %v2612_v32  ;;  %v2739_v13 = vclz %v2738_v62 }
 0x2e9   : > { %vm2780_vm11 = vcmp.eq.s32.totalorder %v2778_v33, 0  ;;  %vm2783_vm12 = vcmp.eq.s32.totalorder %v2778_v33, 2  ;;  %vm2779_vm14 = vcmp.lt.s32.totalorder %v2778_v33, 2 }
 0x2ea   : > { %v2626_v7 = vxor.u32 2147483648, %v2620_v20  ;;  %v2630_v48 = vsel %vm2628_vm6, %v2629_v31, %v2620_v20  ;;  %v2935_v38 = vadd.s32 4294967294, %v2739_v13 }
 0x2ec   : > { %v2627_v23 = vsel %vm2625_vm5, %v2612_v32, %v2626_v7  ;;  %vm2936_vm9 = vcmp.lt.s32.totalorder %v2935_v38, 0 }
 0x2ed   : > { %v2631_v14 = vsel %vm2624_vm7, %v2627_v23, %v2630_v48  ;;  %v2742_v37 = vsel %vm2936_vm9, 0, %v2935_v38 }
 0x2ee   : > { %v2632_v47 = vsel %vm2621_vm8, nan, %v2631_v14  ;;  %v2743_v42 = vsub.s32 32, %v2742_v37  ;;  %v2747_v49 = vsub.s32 4294967266, %v2742_v37  ;;  %v2744_v52 = vshll.u32 %v2735_v56, %v2742_v37 }
 0x2ef   : > { %2802 = vst [vmem:[%s3458_s8 + $0x70] sm:$0xff] %v2632_v47 }
 0x2f0   : > { %v2745_v27 = vshrl.u32 %v2727_v36, %v2743_v42  ;;  %v2748_v39 = vadd.s32 127, %v2747_v49 }
 0x2f2   : > { %v2746_v10 = vor.u32 %v2745_v27, %v2744_v52  ;;  %v2749_v5 = vshll.u32 %v2748_v39, 23 }
 0x2f4   : > { %v2750_v55 = vor.u32 4788187, %v2749_v5  ;;  %v2753_v59 = vcvt.s32.f32 %v2746_v10 }
 0x2f6   : > { %v2751_v1 = vand.u32 2147483647, %v2750_v55 }
 0x2f8   : > { %v2754_v18 = vmul.f32 %v2753_v59, %v2751_v1 }
 0x2fa   : > { %v2755_v53 = vxor.u32 2147483648, %v2754_v18 }
 0x2fc   : > { %v2756_v57 = vsel %vm2635_vm10, %v2755_v53, %v2754_v18 }
 0x2fd   : > { %v2759_v40 = vsel %vm2634_vm13, %v4774_v41, %v2756_v57 }
 0x2fe   : > { %v2761_v0 = vmul.f32 %v2759_v40, %v2759_v40 }
 0x300   : > { %v2762_v28 = vmul.f32 -0.001358992, %v2761_v0  ;;  %v2769_v9 = vmul.f32 -0.00019511016, %v2761_v0 }
 0x302   : > { %v2763_v12 = vadd.f32 0.041655596, %v2762_v28  ;;  %v2770_v22 = vadd.f32 0.008332121, %v2769_v9 }
 0x304   : > { %v2764_v19 = vmul.f32 %v2763_v12, %v2761_v0  ;;  %v2771_v61 = vmul.f32 %v2770_v22, %v2761_v0 }
 0x306   : > { %v2765_v24 = vadd.f32 -0.4999988, %v2764_v19  ;;  %v2772_v16 = vadd.f32 -0.16666654, %v2771_v61 }
 0x308   : > { %v2766_v2 = vmul.f32 %v2765_v24, %v2761_v0  ;;  %v2773_v26 = vmul.f32 %v2772_v16, %v2761_v0 }
 0x30a   : > { %v2767_v8 = vadd.f32 1.0, %v2766_v2  ;;  %v2774_v3 = vadd.f32 1.0, %v2773_v26 }
 0x30c   : > { %v2775_v35 = vmul.f32 %v2774_v3, %v2759_v40  ;;  %v2784_v60 = vxor.u32 2147483648, %v2767_v8 }
 0x30e   : > { %v2781_v11 = vxor.u32 2147483648, %v2775_v35  ;;  %v2785_v17 = vsel %vm2783_vm12, %v2784_v60, %v2775_v35 }
 0x310   : > { %v2782_v44 = vsel %vm2780_vm11, %v2767_v8, %v2781_v11 }
 0x311   : > { %v2786_v15 = vsel %vm2779_vm14, %v2782_v44, %v2785_v17 }
 0x312   : > { %v2787_v63 = vsel %vm2776_vm15, nan, %v2786_v15 }
 0x313   : > { %2803 = vst [vmem:[%s3458_s8 + $0x78] sm:$0xff] %v2787_v63 }
 0x314   : > { %3029 = shalt.err (!%p3026_p3)
}
 0x315   : > { %s3073_s6 = smov 128   ;;  %s3074_s8 = smov 8  }
 0x316   : > { %2943 = dma.vmem_to_hbm [thread:$0]  (%p3133_p5), %s2818_s9, 2048, %s2820_s10, %s2805_s16, %s3073_s6, %s3073_s6, %s3074_s8  }
 0x317 PF: > { %p2949_p4 = scmp.ge.s32.totalorder %s3064_s15, 2  ;;  %s2834_s27 = sand.u32 1, %s3052_s12  }
 0x318   : > { %s2835_s28 = scalar_lea.sflag [#allocation3], %s2834_s27 }
 0x319   : > { %p2946_p7 = pnand %p2949_p4, %p3137_p6 }
 0x31b   : > { %p2947_p8 = pneg %p2946_p7 }
 0x31d   : > { %3047 = dma.done.wait (%p2947_p8), %s2835_s28, 2048  }
 0x31e   : > { %3049 = vsyncadd (%p2947_p8), %s2835_s28, 4294965248  ;;  %p13_p9 = scmp.ge.s32.totalorder %s3120_s18, 4   ;;  %s4995_s12 = smov %s3056_s13 }
 0x31f   : > { %s4996_s13 = smov %s3060_s14  ;;  %s4997_s14 = smov %s3131_s21 }
 0x320   : > { %s4998_s15 = smov %s3120_s18  ;;  %15 = sbr.rel (!%p13_p9) target bundleno = 3 (0x3), region = 67 }
 0x325   :  { %2841 = vsyncpa [#allocation3], 1 }
 0x326   :  { %2843 = vsyncpa [#allocation3 + $0x1], 1 }

</bundles_post_ra>
